<compile_context>
chip_gen: v6e
topology: v6e:2x2x1
jax: 0.10.0
libtpu: 0.0.40
codegen_flags: <defaults>
</compile_context>

<pallas_src>
import math
import functools

import jax
import jax.numpy as jnp
from jax.experimental import pallas as pl
from jax.experimental.pallas import tpu as pltpu


NUM_HEADS = 12
LN_EPS = 1e-5


def _attention_kernel(x_ref, wqkv_ref, bqkv_ref, wo_ref, misc_ref, o_ref,
                      *, num_heads: int, batch_tile: int, seq_len: int,
                      hidden_dim: int, padded_dim: int):
    """One grid step: a (Bt*S, H) row-slab of the flattened (B*S, H) input."""
    H = hidden_dim
    Hp = padded_dim                           # per-segment lane-padded width
    nh = num_heads
    hd = H // nh
    Bt = batch_tile
    S = seq_len
    Rt = Bt * S

    x = x_ref[...]                            # (Rt, H) f32 (kept f32 for residual/LN)
    xb = x.astype(jnp.bfloat16)

    # ---- fused QKV projection: one bf16 MXU matmul, f32 accumulation.
    #      1/sqrt(hd) is already folded into the Q columns / bias.
    qkv = jnp.dot(xb, wqkv_ref[...],
                  preferred_element_type=jnp.float32) + bqkv_ref[0]   # (Rt, 3*Hp) f32

    # lane-aligned segment starts (0, Hp, 2*Hp): no cross-tile slice offsets.
    q = qkv[:, 0:H]
    k = qkv[:, Hp:Hp + H]
    v = qkv[:, 2 * Hp:2 * Hp + H]

    # ---- heads -> grouped batch dim: (Rt, H) -> (Bt*nh, S, hd) ----
    def to_heads(t):
        return t.reshape(Bt, S, nh, hd).transpose(0, 2, 1, 3).reshape(Bt * nh, S, hd)

    qh = to_heads(q).astype(jnp.bfloat16)
    kh = to_heads(k).astype(jnp.bfloat16)
    vh = to_heads(v).astype(jnp.bfloat16)

    # scores[g, q, k] = sum_d Qs[g,q,d] * K[g,k,d]   (scale pre-folded into Wq)
    scores = jnp.einsum('gqd,gkd->gqk', qh, kh,
                        preferred_element_type=jnp.float32)           # (g, S, S) f32

    # numerically-stable softmax over the key axis; reciprocal on the EUP
    # (approx=True -> ~1e-3 rel. error; fine for eval-mode inference).
    m = jnp.max(scores, axis=-1, keepdims=True)
    p = jnp.exp(scores - m)
    attn = p * pl.reciprocal(jnp.sum(p, axis=-1, keepdims=True), approx=True)

    # attended[g, q, d] = sum_k attn[g,q,k] * V[g,k,d]  (bf16 in, f32 acc)
    att = jnp.einsum('gqk,gkd->gqd', attn.astype(jnp.bfloat16), vh,
                     preferred_element_type=jnp.float32)
    att = att.reshape(Bt, nh, S, hd).transpose(0, 2, 1, 3).reshape(Rt, H)

    # ---- output projection (bf16 MXU, f32 accumulate) + bias ----
    out = jnp.dot(att.astype(jnp.bfloat16), wo_ref[...],
                  preferred_element_type=jnp.float32) + misc_ref[0]    # bo

    # ---- residual + LayerNorm(hidden_dim), all f32 ----
    y = x + out
    mean = jnp.mean(y, axis=-1, keepdims=True)
    var = jnp.mean((y - mean) ** 2, axis=-1, keepdims=True)
    normed = (y - mean) * jax.lax.rsqrt(var + LN_EPS)
    o_ref[...] = (normed * misc_ref[1] + misc_ref[2]).astype(o_ref.dtype)


def _choose_batch_tile(B, S, H, Hp, num_heads):
    """Target ~2048 rows per step (S=8 -> Rt multiple of 256), bounded by a
    conservative per-step VMEM footprint and the requirement that Bt | B."""
    target_rows = 2048
    vmem_budget = 40 * 1024 * 1024   # leave headroom under the 48 MiB scoped limit

    def step_bytes(bt):
        rt = bt * S
        g = bt * num_heads
        f32, b16 = 4, 2
        io = 2 * 2 * rt * H * f32          # double-buffered x-in + out blocks
        proj = rt * 3 * Hp * f32           # fused QKV projection output (f32)
        heads = 3 * rt * H * b16           # bf16 q/k/v head views
        core = 2 * g * S * S * f32         # scores + softmax temporaries
        post = 2 * rt * H * f32            # att (f32) + residual/LN temporaries
        weights = (3 * Hp + H) * H * b16 + (3 * Hp + 3 * H) * f32
        return io + proj + heads + core + post + weights

    bt = min(B, max(1, target_rows // max(S, 1)))
    while bt > 1 and (B % bt != 0 or step_bytes(bt) > vmem_budget):
        bt -= 1
    return max(bt, 1)


def enhanced_temporal_attention(x, params, *, num_heads: int = NUM_HEADS,
                                batch_tile: int | None = None):
    """x: (B, S, H) float32. params: dict of weights (PyTorch conventions)."""
    B, S, H = x.shape
    assert H % num_heads == 0
    hd = H // num_heads
    scale = 1.0 / math.sqrt(hd)

    # per-segment lane padding so k/v slices start on 128-lane boundaries
    Hp = ((H + 127) // 128) * 128

    if batch_tile is None:
        batch_tile = _choose_batch_tile(B, S, H, Hp, num_heads)
    Bt = batch_tile
    assert B % Bt == 0
    Rt = Bt * S
    R = B * S

    # --- pack / pre-transpose weights (PyTorch Linear stores (out,in)) ---
    def pad_cols(w):                                   # (H, H) -> (H, Hp)
        return jnp.pad(w, ((0, 0), (0, Hp - H)))

    def pad_vec(b):                                    # (H,) -> (Hp,)
        return jnp.pad(b, (0, Hp - H))

    wqkv_t = jnp.concatenate(
        [pad_cols(params["wq"].T * scale),             # fold 1/sqrt(hd) into Q
         pad_cols(params["wk"].T),
         pad_cols(params["wv"].T)], axis=1).astype(jnp.bfloat16)   # (H, 3*Hp) bf16
    wo_t = params["wo"].T.astype(jnp.bfloat16)                     # (H, H)   bf16
    bqkv = jnp.concatenate(
        [pad_vec(params["bq"] * scale),
         pad_vec(params["bk"]),
         pad_vec(params["bv"])]
    ).reshape(1, 3 * Hp).astype(jnp.float32)                       # (1, 3*Hp) f32
    misc = jnp.stack(
        [params["bo"], params["gamma"], params["beta"]]
    ).astype(jnp.float32)                                          # (3, H)    f32

    # lane-dense row slab view of the activations
    x2 = x.reshape(R, H)

    flops = int(2 * R * H * (3 * Hp) + 2 * R * H * H
                + 4 * B * num_heads * S * S * hd)
    transcendentals = int(B * num_heads * S * S)
    bytes_accessed = int(2 * R * H * 4            # x in + out
                         + wqkv_t.size * 2 + wo_t.size * 2
                         + bqkv.size * 4 + misc.size * 4)

    kernel = functools.partial(_attention_kernel, num_heads=num_heads,
                               batch_tile=Bt, seq_len=S,
                               hidden_dim=H, padded_dim=Hp)

    out2 = pl.pallas_call(
        kernel,
        out_shape=jax.ShapeDtypeStruct((R, H), x.dtype),
        grid_spec=pltpu.PrefetchScalarGridSpec(
            num_scalar_prefetch=0,
            grid=(B // Bt,),
            in_specs=[
                pl.BlockSpec((Rt, H), lambda i: (i, 0)),         # x rows
                pl.BlockSpec((H, 3 * Hp), lambda i: (0, 0)),     # fused Wqkv^T (bf16, padded)
                pl.BlockSpec((1, 3 * Hp), lambda i: (0, 0)),     # fused qkv bias (padded)
                pl.BlockSpec((H, H), lambda i: (0, 0)),          # Wo^T (bf16)
                pl.BlockSpec((3, H), lambda i: (0, 0)),          # [bo, gamma, beta]
            ],
            out_specs=pl.BlockSpec((Rt, H), lambda i: (i, 0)),
        ),
        compiler_params=pltpu.CompilerParams(
            dimension_semantics=("parallel",),
            vmem_limit_bytes=48 * 1024 * 1024),
        cost_estimate=pl.CostEstimate(flops=flops,
                                      transcendentals=transcendentals,
                                      bytes_accessed=bytes_accessed),
    )(x2, wqkv_t, bqkv, wo_t, misc)

    return out2.reshape(B, S, H)


# ---------------- pure-JAX reference (for validation) ----------------
def reference(x, params, num_heads=NUM_HEADS):
    B, S, H = x.shape
    hd = H // num_heads
    lin = lambda a, w, b: a @ w.T + b
    Q = lin(x, params["wq"], params["bq"]).reshape(B, S, num_heads, hd).transpose(0, 2, 1, 3)
    K = lin(x, params["wk"], params["bk"]).reshape(B, S, num_heads, hd).transpose(0, 2, 1, 3)
    V = lin(x, params["wv"], params["bv"]).reshape(B, S, num_heads, hd).transpose(0, 2, 1, 3)
    scores = Q @ jnp.swapaxes(K, -2, -1) / math.sqrt(hd)
    attn = jax.nn.softmax(scores, axis=-1)
    att = (attn @ V).transpose(0, 2, 1, 3).reshape(B, S, H)
    out = lin(att, params["wo"], params["bo"])
    y = x + out
    mean = y.mean(-1, keepdims=True)
    var = ((y - mean) ** 2).mean(-1, keepdims=True)
    return (y - mean) / jnp.sqrt(var + LN_EPS) * params["gamma"] + params["beta"]


def init_params(key, hidden_dim):
    ks = jax.random.split(key, 8)
    limit = math.sqrt(6.0 / (hidden_dim + hidden_dim))  # xavier_uniform
    blim = 1.0 / math.sqrt(hidden_dim)                  # PyTorch Linear bias default
    u = lambda k, shape, lim: jax.random.uniform(k, shape, jnp.float32, -lim, lim)
    return {
        "wq": u(ks[0], (hidden_dim, hidden_dim), limit),
        "wk": u(ks[1], (hidden_dim, hidden_dim), limit),
        "wv": u(ks[2], (hidden_dim, hidden_dim), limit),
        "wo": u(ks[3], (hidden_dim, hidden_dim), limit),
        "bq": u(ks[4], (hidden_dim,), blim),
        "bk": u(ks[5], (hidden_dim,), blim),
        "bv": u(ks[6], (hidden_dim,), blim),
        "bo": u(ks[7], (hidden_dim,), blim),
        "gamma": jnp.ones((hidden_dim,), jnp.float32),
        "beta": jnp.zeros((hidden_dim,), jnp.float32),
    }


if __name__ == "__main__":
    B, S, H = 2, 8, 96          # hidden_dim=96 -> head_dim=8 with 12 heads
    key = jax.random.PRNGKey(0)
    kx, kp = jax.random.split(key)
    x = jax.random.normal(kx, (B, S, H), jnp.float32)
    params = init_params(kp, H)

    out = enhanced_temporal_attention(x, params)
    out = jax.block_until_ready(out)

    ref = reference(x, params)
    assert out.shape == (B, S, H)
    # bf16 matmul inputs (f32 accumulation) -> relaxed tolerance vs f32 reference
    err = float(jnp.max(jnp.abs(out - ref)))
    assert err < 5e-2, f"max abs diff {err}"
    print("KERNEL_OK")
</pallas_src>

<mosaic_0001>
module attributes {stable_mosaic.version = 11 : i64} {
  func.func @_attention_kernel(%arg0: i32, %arg1: memref<16x96xf32, #tpu.memory_space<vmem>>, %arg2: memref<96x384xbf16, #tpu.memory_space<vmem>>, %arg3: memref<1x384xf32, #tpu.memory_space<vmem>>, %arg4: memref<96x96xbf16, #tpu.memory_space<vmem>>, %arg5: memref<3x96xf32, #tpu.memory_space<vmem>>, %arg6: memref<16x96xf32, #tpu.memory_space<vmem>>) attributes {dimension_semantics = [#tpu.dimension_semantics<parallel>], iteration_bounds = array<i64: 1>, scalar_prefetch = 0 : i64, scratch_operands = 0 : i64, tpu.core_type = #tpu.core_type<tc>, window_params = [{transform_indices = @transform_0, window_bounds = array<i64: 16, 96>}, {pipeline_mode = #tpu.pipeline_mode<synchronous>, transform_indices = @transform_1, window_bounds = array<i64: 96, 384>}, {pipeline_mode = #tpu.pipeline_mode<synchronous>, transform_indices = @transform_2, window_bounds = array<i64: 1, 384>}, {pipeline_mode = #tpu.pipeline_mode<synchronous>, transform_indices = @transform_3, window_bounds = array<i64: 96, 96>}, {pipeline_mode = #tpu.pipeline_mode<synchronous>, transform_indices = @transform_4, window_bounds = array<i64: 3, 96>}, {transform_indices = @transform_5, window_bounds = array<i64: 16, 96>}]} {
    %c0 = arith.constant 0 : index
    %c0_0 = arith.constant 0 : index
    %0 = vector.load %arg1[%c0, %c0_0] : memref<16x96xf32, #tpu.memory_space<vmem>>, vector<16x96xf32>
    %1 = arith.truncf %0 : vector<16x96xf32> to vector<16x96xbf16>
    %c0_1 = arith.constant 0 : index
    %c0_2 = arith.constant 0 : index
    %2 = vector.load %arg2[%c0_1, %c0_2] : memref<96x384xbf16, #tpu.memory_space<vmem>>, vector<96x384xbf16>
    %cst = arith.constant dense<0.000000e+00> : vector<16x384xf32>
    %3 = tpu.matmul %1, %2, %cst {dimension_numbers = #tpu.dot_dimension_numbers<[1], [0], [0], [1], [0, 0, 1, 1], [], []>} : vector<16x96xbf16>, vector<96x384xbf16>, vector<16x384xf32> -> vector<16x384xf32>
    %c0_3 = arith.constant 0 : index
    %c0_4 = arith.constant 0 : index
    %4 = vector.load %arg3[%c0_3, %c0_4] : memref<1x384xf32, #tpu.memory_space<vmem>>, vector<1x384xf32>
    %5 = vector.shape_cast %4 : vector<1x384xf32> to vector<384xf32>
    %6 = vector.shape_cast %5 : vector<384xf32> to vector<1x384xf32>
    %7 = vector.broadcast %6 : vector<1x384xf32> to vector<16x384xf32>
    %8 = arith.addf %3, %7 : vector<16x384xf32>
    %9 = vector.extract_strided_slice %8 {offsets = [0, 0], sizes = [16, 96], strides = [1, 1]} : vector<16x384xf32> to vector<16x96xf32>
    %10 = vector.extract_strided_slice %8 {offsets = [0, 128], sizes = [16, 96], strides = [1, 1]} : vector<16x384xf32> to vector<16x96xf32>
    %11 = vector.extract_strided_slice %8 {offsets = [0, 256], sizes = [16, 96], strides = [1, 1]} : vector<16x384xf32> to vector<16x96xf32>
    %12 = vector.shape_cast %9 : vector<16x96xf32> to vector<2x8x12x8xf32>
    %13 = tpu.transpose %12, [0, 2, 1, 3] : vector<2x8x12x8xf32> -> vector<2x12x8x8xf32>
    %14 = vector.shape_cast %13 : vector<2x12x8x8xf32> to vector<24x8x8xf32>
    %15 = arith.truncf %14 : vector<24x8x8xf32> to vector<24x8x8xbf16>
    %16 = vector.shape_cast %10 : vector<16x96xf32> to vector<2x8x12x8xf32>
    %17 = tpu.transpose %16, [0, 2, 1, 3] : vector<2x8x12x8xf32> -> vector<2x12x8x8xf32>
    %18 = vector.shape_cast %17 : vector<2x12x8x8xf32> to vector<24x8x8xf32>
    %19 = arith.truncf %18 : vector<24x8x8xf32> to vector<24x8x8xbf16>
    %20 = vector.shape_cast %11 : vector<16x96xf32> to vector<2x8x12x8xf32>
    %21 = tpu.transpose %20, [0, 2, 1, 3] : vector<2x8x12x8xf32> -> vector<2x12x8x8xf32>
    %22 = vector.shape_cast %21 : vector<2x12x8x8xf32> to vector<24x8x8xf32>
    %23 = arith.truncf %22 : vector<24x8x8xf32> to vector<24x8x8xbf16>
    "tpu.trace_start"() <{level = 10 : i32, message = "gqd,gkd->gqk"}> : () -> ()
    %cst_5 = arith.constant dense<0.000000e+00> : vector<24x8x8xf32>
    %24 = tpu.matmul %15, %19, %cst_5 {dimension_numbers = #tpu.dot_dimension_numbers<[2], [2], [1], [1], [0, 0, 0, 1, 1, 1], [0], [0]>} : vector<24x8x8xbf16>, vector<24x8x8xbf16>, vector<24x8x8xf32> -> vector<24x8x8xf32>
    "tpu.trace_stop"() : () -> ()
    %cst_6 = arith.constant dense<0xFF800000> : vector<24x8xf32>
    %25 = vector.multi_reduction <maximumf>, %24, %cst_6 [2] : vector<24x8x8xf32> to vector<24x8xf32>
    %26 = vector.shape_cast %25 : vector<24x8xf32> to vector<24x8x1xf32>
    %27 = vector.broadcast %26 : vector<24x8x1xf32> to vector<24x8x8xf32>
    %28 = arith.subf %24, %27 : vector<24x8x8xf32>
    %29 = math.exp %28 : vector<24x8x8xf32>
    %cst_7 = arith.constant dense<0.000000e+00> : vector<24x8xf32>
    %30 = vector.multi_reduction <add>, %29, %cst_7 [2] : vector<24x8x8xf32> to vector<24x8xf32>
    %31 = vector.shape_cast %30 : vector<24x8xf32> to vector<24x8x1xf32>
    %32 = tpu.reciprocal %31 {approx = true} : vector<24x8x1xf32> -> vector<24x8x1xf32>
    %33 = vector.broadcast %32 : vector<24x8x1xf32> to vector<24x8x8xf32>
    %34 = arith.mulf %29, %33 : vector<24x8x8xf32>
    %35 = arith.truncf %34 : vector<24x8x8xf32> to vector<24x8x8xbf16>
    "tpu.trace_start"() <{level = 10 : i32, message = "gqk,gkd->gqd"}> : () -> ()
    %cst_8 = arith.constant dense<0.000000e+00> : vector<24x8x8xf32>
    %36 = tpu.matmul %35, %23, %cst_8 {dimension_numbers = #tpu.dot_dimension_numbers<[2], [1], [1], [2], [0, 0, 0, 1, 1, 2], [0], [0]>} : vector<24x8x8xbf16>, vector<24x8x8xbf16>, vector<24x8x8xf32> -> vector<24x8x8xf32>
    "tpu.trace_stop"() : () -> ()
    %37 = vector.shape_cast %36 : vector<24x8x8xf32> to vector<2x12x8x8xf32>
    %38 = tpu.transpose %37, [0, 2, 1, 3] : vector<2x12x8x8xf32> -> vector<2x8x12x8xf32>
    %39 = vector.shape_cast %38 : vector<2x8x12x8xf32> to vector<16x96xf32>
    %40 = arith.truncf %39 : vector<16x96xf32> to vector<16x96xbf16>
    %c0_9 = arith.constant 0 : index
    %c0_10 = arith.constant 0 : index
    %41 = vector.load %arg4[%c0_9, %c0_10] : memref<96x96xbf16, #tpu.memory_space<vmem>>, vector<96x96xbf16>
    %cst_11 = arith.constant dense<0.000000e+00> : vector<16x96xf32>
    %42 = tpu.matmul %40, %41, %cst_11 {dimension_numbers = #tpu.dot_dimension_numbers<[1], [0], [0], [1], [0, 0, 1, 1], [], []>} : vector<16x96xbf16>, vector<96x96xbf16>, vector<16x96xf32> -> vector<16x96xf32>
    %c0_12 = arith.constant 0 : index
    %c0_13 = arith.constant 0 : index
    %43 = vector.load %arg5[%c0_12, %c0_13] : memref<3x96xf32, #tpu.memory_space<vmem>>, vector<1x96xf32>
    %44 = vector.shape_cast %43 : vector<1x96xf32> to vector<96xf32>
    %45 = vector.shape_cast %44 : vector<96xf32> to vector<1x96xf32>
    %46 = vector.broadcast %45 : vector<1x96xf32> to vector<16x96xf32>
    %47 = arith.addf %42, %46 : vector<16x96xf32>
    %48 = arith.addf %0, %47 : vector<16x96xf32>
    %cst_14 = arith.constant dense<0.000000e+00> : vector<16xf32>
    %49 = vector.multi_reduction <add>, %48, %cst_14 [1] : vector<16x96xf32> to vector<16xf32>
    %50 = vector.shape_cast %49 : vector<16xf32> to vector<16x1xf32>
    %cst_15 = arith.constant 9.600000e+01 : f32
    %51 = vector.broadcast %cst_15 : f32 to vector<16x1xf32>
    %52 = arith.divf %50, %51 : vector<16x1xf32>
    %53 = vector.broadcast %52 : vector<16x1xf32> to vector<16x96xf32>
    %54 = arith.subf %48, %53 : vector<16x96xf32>
    %55 = arith.mulf %54, %54 : vector<16x96xf32>
    %cst_16 = arith.constant dense<0.000000e+00> : vector<16xf32>
    %56 = vector.multi_reduction <add>, %55, %cst_16 [1] : vector<16x96xf32> to vector<16xf32>
    %57 = vector.shape_cast %56 : vector<16xf32> to vector<16x1xf32>
    %cst_17 = arith.constant 9.600000e+01 : f32
    %58 = vector.broadcast %cst_17 : f32 to vector<16x1xf32>
    %59 = arith.divf %57, %58 : vector<16x1xf32>
    %60 = vector.broadcast %52 : vector<16x1xf32> to vector<16x96xf32>
    %61 = arith.subf %48, %60 : vector<16x96xf32>
    %cst_18 = arith.constant 9.99999974E-6 : f32
    %62 = vector.broadcast %cst_18 : f32 to vector<16x1xf32>
    %63 = arith.addf %59, %62 : vector<16x1xf32>
    %64 = math.rsqrt %63 : vector<16x1xf32>
    %65 = vector.broadcast %64 : vector<16x1xf32> to vector<16x96xf32>
    %66 = arith.mulf %61, %65 : vector<16x96xf32>
    %c1 = arith.constant 1 : index
    %c0_19 = arith.constant 0 : index
    %67 = vector.load %arg5[%c1, %c0_19] : memref<3x96xf32, #tpu.memory_space<vmem>>, vector<1x96xf32>
    %68 = vector.shape_cast %67 : vector<1x96xf32> to vector<96xf32>
    %69 = vector.shape_cast %68 : vector<96xf32> to vector<1x96xf32>
    %70 = vector.broadcast %69 : vector<1x96xf32> to vector<16x96xf32>
    %71 = arith.mulf %66, %70 : vector<16x96xf32>
    %c2 = arith.constant 2 : index
    %c0_20 = arith.constant 0 : index
    %72 = vector.load %arg5[%c2, %c0_20] : memref<3x96xf32, #tpu.memory_space<vmem>>, vector<1x96xf32>
    %73 = vector.shape_cast %72 : vector<1x96xf32> to vector<96xf32>
    %74 = vector.shape_cast %73 : vector<96xf32> to vector<1x96xf32>
    %75 = vector.broadcast %74 : vector<1x96xf32> to vector<16x96xf32>
    %76 = arith.addf %71, %75 : vector<16x96xf32>
    %c0_21 = arith.constant 0 : index
    %c0_22 = arith.constant 0 : index
    %77 = vector.load %arg6[%c0_21, %c0_22] : memref<16x96xf32, #tpu.memory_space<vmem>>, vector<16x96xf32>
    tpu.vector_store %arg6[%c0_21, %c0_22], %76 {strides = array<i32>} : memref<16x96xf32, #tpu.memory_space<vmem>>, vector<16x96xf32>,
    return
  }
  func.func @transform_0(%arg0: i32) -> (i32, i32) {
    %c0_i32 = arith.constant 0 : i32
    %c0_i32_0 = arith.constant 0 : i32
    return %arg0, %c0_i32 : i32, i32
  }
  func.func @transform_1(%arg0: i32) -> (i32, i32) {
    %c0_i32 = arith.constant 0 : i32
    %c0_i32_0 = arith.constant 0 : i32
    %c0_i32_1 = arith.constant 0 : i32
    return %c0_i32, %c0_i32_0 : i32, i32
  }
  func.func @transform_2(%arg0: i32) -> (i32, i32) {
    %c0_i32 = arith.constant 0 : i32
    %c0_i32_0 = arith.constant 0 : i32
    %c0_i32_1 = arith.constant 0 : i32
    return %c0_i32, %c0_i32_0 : i32, i32
  }
  func.func @transform_3(%arg0: i32) -> (i32, i32) {
    %c0_i32 = arith.constant 0 : i32
    %c0_i32_0 = arith.constant 0 : i32
    %c0_i32_1 = arith.constant 0 : i32
    return %c0_i32, %c0_i32_0 : i32, i32
  }
  func.func @transform_4(%arg0: i32) -> (i32, i32) {
    %c0_i32 = arith.constant 0 : i32
    %c0_i32_0 = arith.constant 0 : i32
    %c0_i32_1 = arith.constant 0 : i32
    return %c0_i32, %c0_i32_0 : i32, i32
  }
  func.func @transform_5(%arg0: i32) -> (i32, i32) {
    %c0_i32 = arith.constant 0 : i32
    %c0_i32_0 = arith.constant 0 : i32
    return %arg0, %c0_i32 : i32, i32
  }
}

</mosaic_0001>

<bundles_post_ra>
// kernel: tpu_custom_call.1
= control target key start
LH: loop header
LB: loop body
LE: loop exit
PB: predicated region body
PF: predicated region fallthrough
CT: control target
= control target key end

     0   :  { %10 = vsyncpa [#allocation3], 0  ;;  %s9361_s0 = inlined_call_operand.hbm [shape: f32[16,96], index: 0, kind: input, shape index: {}]   ;;  %s9362_s1 = inlined_call_operand.hbm [shape: bf16[96,384], index: 1, kind: input, shape index: {}]   ;;  %s9363_s2 = inlined_call_operand.vmem [shape: f32[1,384], index: 2, kind: input, shape index: {}]   ;;  %s9364_s3 = inlined_call_operand.hbm [shape: bf16[96,96], index: 3, kind: input, shape index: {}]   ;;  %s9365_s4 = inlined_call_operand.vmem [shape: f32[3,96], index: 4, kind: input, shape index: {}]   ;;  %s9366_s5 = inlined_call_operand.hbm [shape: f32[16,96], index: 5, kind: output, shape index: {}]  }
   0x1   :  { %11 = vsyncpa [#allocation6], 0 }
   0x2   :  { %12 = vsyncpa [#allocation4], 0  ;;  %s7499_s18 = smov [#allocation5]  }
   0x3   :  { %s30_s19 = sshll.u32 %s7499_s18, 4  ;;  %s31_s19 = int_to_ptr.vmem [resolvable:$true] %s30_s19 }
   0x4   :  { %s7421_s20 = scalar_lea.vmem %s31_s19, 2304  ;;  %p7426_p1 = scmp.lt.s32.totalorder %s31_s19, %s31_s19 }
   0x5   :  { %p7422_p0 = scmp.ne.s32.totalorder %s31_s19, %s7421_s20  ;;  %p7427_p2 = scmp.lt.s32.totalorder %s7421_s20, %s7421_s20 }
   0x7   :  { %p7428_p3 = por %p7427_p2, %p7426_p1 }
   0x9   :  { %p7429_p4 = pnand %p7428_p3, %p7422_p0 }
   0xb   :  { %7432 = shalt.err (!%p7429_p4)
}
   0xc   :  { %s7500_s21 = smov 192   ;;  %s7501_s22 = smov 12  }
   0xd   :  { %36 = dma.hbm_to_vmem [thread:$0]  %s9362_s1, 2304, %s31_s19, [#allocation6], %s7500_s21, %s7500_s21, %s7501_s22  }
   0xe   :  { %s7502_s25 = smov [#allocation2]  }
   0xf   :  { %s18_s26 = sshll.u32 %s7502_s25, 4  ;;  %s19_s26 = int_to_ptr.vmem [resolvable:$true] %s18_s26 }
  0x10   :  { %s7441_s27 = scalar_lea.vmem %s19_s26, 256  ;;  %p7446_p6 = scmp.lt.s32.totalorder %s19_s26, %s19_s26 }
  0x11   :  { %p7442_p5 = scmp.ne.s32.totalorder %s19_s26, %s7441_s27  ;;  %p7447_p7 = scmp.lt.s32.totalorder %s7441_s27, %s7441_s27 }
  0x13   :  { %p7448_p8 = por %p7447_p7, %p7446_p6 }
  0x15   :  { %p7449_p9 = pnand %p7448_p8, %p7442_p5 }
  0x17   :  { %7452 = shalt.err (!%p7449_p9)
}
  0x18   :  { %s7503_s28 = smov 128   ;;  %s7504_s29 = smov 8  }
  0x19   :  { %24 = dma.hbm_to_vmem [thread:$0]  %s9361_s0, 256, %s19_s26, [#allocation3], %s7503_s28, %s7503_s28, %s7504_s29  }
  0x1a   :  { %s7505_s1 = smov [#allocation7]  }
  0x1b   :  { %s44_s7 = sshll.u32 %s7505_s1, 4  ;;  %s45_s7 = int_to_ptr.vmem [resolvable:$true] %s44_s7 }
  0x1c   :  { %s7461_s8 = scalar_lea.vmem %s45_s7, 768  ;;  %p7466_p11 = scmp.lt.s32.totalorder %s45_s7, %s45_s7 }
  0x1d   :  { %p7462_p10 = scmp.ne.s32.totalorder %s45_s7, %s7461_s8  ;;  %p7467_p12 = scmp.lt.s32.totalorder %s7461_s8, %s7461_s8 }
  0x1f   :  { %p7468_p13 = por %p7467_p12, %p7466_p11 }
  0x21   :  { %p7469_p0 = pnand %p7468_p13, %p7462_p10 }
  0x23   :  { %7472 = shalt.err (!%p7469_p0)
}
  0x24   :  { %s7506_s9 = smov 64   ;;  %s7507_s10 = smov 4  }
  0x25   :  { %50 = dma.hbm_to_vmem [thread:$0]  %s9364_s3, 768, %s45_s7, [#allocation6], %s7506_s9, %s7506_s9, %s7507_s10  }
  0x26   :  { %7493 = dma.done.wait [#allocation3], 256  }
  0x27   :  { %7494 = vsyncadd [#allocation3], 4294967040 }
  0x28   :  { %7495 = dma.done.wait [#allocation6], 3072  }
  0x29   :  { %7496 = vsyncadd [#allocation6], 4294964224  ;;  %v7508_v0 = vmov 0   ;;  %v7509_v1 = vmov 0.0   ;;  %vm7510_vm0 = vmmov 0   ;;  %v63_v17 = vld [vmem:[#allocation2] sm:$0xff]  ;;  %v92_v23 = vlaneseq }
  0x2a   :  { %239 = vmatprep.mubr.bf16.mxu0 %v7508_v0  ;;  %6878 = vmatprep.subr.bf16.mxu1 %v7509_v1  ;;  %v7281_v2 = vld [vmem:[#allocation5 + $0x7c] ss:$12 sps:$4 sm:$0xff]   ;;  %v7283_v3 = vld [vmem:[#allocation5 + $0x78] ss:$12 sps:$4 sm:$0xff]   ;;  %v7286_v5 = vld [vmem:[#allocation5 + $0x60] ss:$12 sps:$4 sm:$0xff]  }
  0x2b   :  { %6890 = vmatprep.mubr.msk.bf16.mxu1 %vm7510_vm0, %v7509_v1  ;;  %211 = vmatprep.subr.bf16.mxu0 %v7281_v2  ;;  %v7284_v4 = vld [vmem:[#allocation5 + $0x64] ss:$12 sps:$4 sm:$0xff]   ;;  %v7287_v6 = vld [vmem:[#allocation5 + $0x4c] ss:$12 sps:$4 sm:$0xff]   ;;  %v7289_v7 = vld [vmem:[#allocation5 + $0x48] ss:$12 sps:$4 sm:$0xff]  }
  0x2c   :  { %212 = vmatpush1.bf16.msra.mxu0 %v7283_v3  ;;  %v7290_v8 = vld [vmem:[#allocation5 + $0x34] ss:$12 sps:$4 sm:$0xff]   ;;  %v7292_v10 = vld [vmem:[#allocation5 + $0x30] ss:$12 sps:$4 sm:$0xff]   ;;  %v7295_v13 = vld [vmem:[#allocation5 + $0x18] ss:$12 sps:$4 sm:$0xff]  }
  0x2d   :  { %213 = vmatprep.subr.bf16.mxu0 %v7284_v4  ;;  %v7299_v9 = vld [vmem:[#allocation5 + $0x80] ss:$12 sps:$4 sm:$0xff]   ;;  %v7300_v11 = vld [vmem:[#allocation5 + $0x68] ss:$12 sps:$4 sm:$0xff]   ;;  %v7296_v14 = vld [vmem:[#allocation5 + $0x4] ss:$12 sps:$4 sm:$0xff]  }
  0x2e   :  { %6879 = vmatpush3.bf16.msra.mxu1 %v7299_v9  ;;  %v7293_v12 = vld [vmem:[#allocation5 + $0x1c] ss:$12 sps:$4 sm:$0xff]   ;;  %v7298_v16 = vld [vmem:[#allocation5] ss:$12 sps:$4 sm:$0xff]   ;;  %v7302_v19 = vld [vmem:[#allocation5 + $0x38] ss:$12 sps:$4 sm:$0xff]  }
  0x2f   :  { %6880 = vmatprep.subr.bf16.mxu1 %v7509_v1  ;;  %v7301_v15 = vld [vmem:[#allocation5 + $0x50] ss:$12 sps:$4 sm:$0xff]   ;;  %vm203_vm1 = vcmask 785408   ;;  %v7303_v21 = vld [vmem:[#allocation5 + $0x20] ss:$12 sps:$4 sm:$0xff]   ;;  %v7587_v24 = vshrl.u32 %v92_v23, 7 }
  0x30   :  { %214 = vmatpush1.bf16.msra.mxu0 %v7286_v5  ;;  %v64_v18 = vld [vmem:[#allocation2 + $0x8] sm:$0xff]  ;;  %v7304_v22 = vld [vmem:[#allocation5 + $0x8] ss:$12 sps:$4 sm:$0xff]   ;;  %v7593_v26 = vld [vmem:[%s9363_s2] sm:$0x7]  ;;  %s7511_s13 = smov 104  }
  0x31   :  { %215 = vmatprep.subr.bf16.mxu0 %v7287_v6  ;;  %v65_v20 = vpack.c.bf16 %v64_v18, %v63_v17  ;;  %v98_v25 = vsub.s32 1, %v7587_v24  ;;  %v94_v27 = vsub.s32 0, %v7587_v24  ;;  %s7512_s14 = smov 120   ;;  %s7513_s2 = smov 112   ;;  %v102_v42 = vsub.s32 2, %v7587_v24 }
  0x32   :  { %6881 = vmatpush3.bf16.msra.mxu1 %v7300_v11  ;;  %s7514_s15 = smov 96   ;;  %s7515_s16 = smov 88   ;;  %v7521_v46 = vmov 1983009808   ;;  %v7522_v48 = vmov 1934713408  }
  0x33   :  { %6882 = vmatprep.subr.bf16.mxu1 %v7509_v1  ;;  %v99_v28 = vrot.slane %v7593_v26, %v98_v25  ;;  %v95_v31 = vrot.slane %v7593_v26, %v94_v27  ;;  %s7516_s17 = smov 80   ;;  %s7517_s18 = smov 72   ;;  %v103_v43 = vrot.slane %v7593_v26, %v102_v42  ;;  %v362_v47 = vunpack.c.l.s4 %v7521_v46 }
  0x34   :  { %216 = vmatpush1.bf16.msra.mxu0 %v7289_v7  ;;  %s7518_s19 = smov 56   ;;  %s7519_s20 = smov 48   ;;  %v426_v49 = vunpack.c.l.s4 %v7522_v48  ;;  %vm3015_vm2 = vcmask 64512   ;;  %vm4411_vm3 = vcmask 1043456   ;;  %vm6419_vm4 = vcmask 130048  }
  0x35   :  { %217 = vmatprep.subr.bf16.mxu0 %v7290_v8  ;;  %s7520_s21 = smov 40   ;;  %v363_v50 = vunpack.c.0.s8 %v362_v47  ;;  %s7523_s22 = smov 16   ;;  %vm6422_vm5 = vcmask 195584   ;;  %vm6425_vm6 = vcmask 261120   ;;  %vm6428_vm7 = vcmask 326656  }
  0x36   :  { %6883 = vmatpush3.bf16.msra.mxu1 %v7301_v15  ;;  %v427_v53 = vunpack.c.0.s8 %v426_v49  ;;  %s7524_s23 = smov 24   ;;  %s7525_s24 = smov 32   ;;  %vm6431_vm8 = vcmask 392192   ;;  %vm6434_vm9 = vcmask 457728   ;;  %vm6437_vm10 = vcmask 523264  }
  0x37   :  { %6884 = vmatprep.subr.bf16.mxu1 %v7509_v1  ;;  %v7729_v54 = vsub.s32 %v363_v50, %v7587_v24  ;;  %vm6440_vm11 = vcmask 588800   ;;  %vm6443_vm12 = vcmask 654336   ;;  %vm6446_vm13 = vcmask 719872   ;;  %s7526_s7 = smov [#allocation8]  }
  0x38   :  { %218 = vmatpush1.bf16.msra.mxu0 %v7292_v10  ;;  %v7734_v61 = vsub.s32 %v427_v53, %v7587_v24  ;;  %s6597_s8 = sshll.u32 %s7526_s7, 4  ;;  %s6598_s8 = int_to_ptr.vmem [resolvable:$true] %s6597_s8 }
  0x39   :  { %219 = vmatprep.subr.bf16.mxu0 %v7293_v12  ;;  %p7478_p2 = scmp.lt.s32.totalorder %s6598_s8, %s6598_s8 }
  0x3a   :  { %6885 = vmatpush3.bf16.msra.mxu1 %v7302_v19 }
  0x3b   :  { %6886 = vmatprep.subr.bf16.mxu1 %v7509_v1 }
  0x3c   :  { %220 = vmatpush1.bf16.msra.mxu0 %v7295_v13 }
  0x3d   :  { %221 = vmatprep.subr.bf16.mxu0 %v7296_v14 }
  0x3e   :  { %6887 = vmatpush3.bf16.msra.mxu1 %v7303_v21 }
  0x3f   :  { %6888 = vmatprep.subr.bf16.mxu1 %v7509_v1 }
  0x40   :  { %222 = vmatpush1.bf16.msra.mxu0 %v7298_v16 }
  0x41   :  { %6906 = vmatprep.subr.bf16.mxu0 %v7509_v1 }
  0x42   :  { %6889 = vmatpush3.bf16.msra.mxu1 %v7304_v22 }
  0x43   :  { %6628 = vmatmul.mubr.msk.bf16.vlgmr.msra.gmra.mxu0 %vm203_vm1, %v65_v20  ;;  %6894 = vmatprep.subr.bf16.mxu1 %v7509_v1 }
  0x44   :  { %6908 = vmatprep.mubr.msk.bf16.mxu0 %vm7510_vm0, %v7509_v1 }
  0x45   :  { %6891 = vmatmul.mubr.msk.bf16.vlgmr.msra.gmra.mxu1 %vm203_vm1, %v65_v20 }
  0x46   :  { %6896 = vmatprep.mubr.msk.bf16.mxu1 %vm7510_vm0, %v7509_v1 }
 0x103   :  { %v241_v29 = vpop.f32.mrf.mxu0 }
 0x104   :  { %v7604_v33 = vadd.f32 %v241_v29, %v95_v31 }
 0x105   :  { %v243_v30 = vpop.f32.mrf.mxu0  ;;  %v284_v37 = vpop.f32.mrf.mxu1 }
 0x106   :  { %v7598_v32 = vadd.f32 %v243_v30, %v99_v28  ;;  %v7696_v44 = vadd.f32 %v284_v37, %v103_v43 }
 0x107   :  { %v245_v34 = vpop.f32.mrf.mxu0  ;;  %v6892_v38 = vpop.f32.mrf.mxu1 }
 0x108   :  { %1213 = vrot.lane.b32.xlu1 %v7598_v32, %s7511_s13  ;;  %1201 = vrot.lane.b32.xlu0 %v7598_v32, %s7512_s14  ;;  %v7652_v39 = vadd.f32 %v245_v34, %v95_v31 }
 0x109   :  { %v247_v35 = vpop.f32.mrf.mxu0  ;;  %v287_v40 = vpop.f32.mrf.mxu1 }
 0x10a   :  { %v7646_v36 = vadd.f32 %v247_v35, %v99_v28  ;;  %v7718_v45 = vadd.f32 %v287_v40, %v103_v43 }
 0x10b   :  { %v6893_v41 = vpop.f32.mrf.mxu1 }
 0x10c   :  { %1207 = vrot.lane.b32.xlu0 %v7598_v32, %s7513_s2  ;;  %293 = vrot.lane.b32.xlu1 %v7604_v33, %s7512_s14 }
 0x110   :  { %299 = vrot.lane.b32.xlu0 %v7604_v33, %s7513_s2  ;;  %305 = vrot.lane.b32.xlu1 %v7604_v33, %s7511_s13 }
 0x114   :  { %1219 = vrot.lane.b32.xlu0 %v7598_v32, %s7514_s15  ;;  %1225 = vrot.lane.b32.xlu1 %v7598_v32, %s7515_s16 }
 0x118   :  { %1231 = vrot.lane.b32.xlu0 %v7598_v32, %s7516_s17  ;;  %1237 = vrot.lane.b32.xlu1 %v7598_v32, %s7517_s18 }
 0x11c   :  { %311 = vrot.lane.b32.xlu0 %v7604_v33, %s7514_s15  ;;  %317 = vrot.lane.b32.xlu1 %v7604_v33, %s7515_s16 }
 0x120   :  { %323 = vrot.lane.b32.xlu0 %v7604_v33, %s7516_s17  ;;  %329 = vrot.lane.b32.xlu1 %v7604_v33, %s7517_s18 }
 0x124   :  { %1243 = vrot.lane.b32.xlu0 %v7598_v32, %s7506_s9  ;;  %1249 = vrot.lane.b32.xlu1 %v7598_v32, %s7518_s19 }
 0x128   :  { %1255 = vrot.lane.b32.xlu0 %v7598_v32, %s7519_s20  ;;  %1261 = vrot.lane.b32.xlu1 %v7598_v32, %s7520_s21 }
 0x12c   :  { %335 = vrot.lane.b32.xlu0 %v7604_v33, %s7506_s9  ;;  %341 = vrot.lane.b32.xlu1 %v7604_v33, %s7518_s19 }
 0x130   :  { %347 = vrot.lane.b32.xlu0 %v7604_v33, %s7519_s20  ;;  %353 = vrot.lane.b32.xlu1 %v7604_v33, %s7520_s21 }
 0x134   :  { %1203 = vrot.lane.b32.xlu0 %v7646_v36, %s7512_s14  ;;  %1209 = vrot.lane.b32.xlu1 %v7646_v36, %s7513_s2 }
 0x138   :  { %1215 = vrot.lane.b32.xlu0 %v7646_v36, %s7511_s13  ;;  %295 = vrot.lane.b32.xlu1 %v7652_v39, %s7512_s14 }
 0x13c   :  { %301 = vrot.lane.b32.xlu0 %v7652_v39, %s7513_s2  ;;  %307 = vrot.lane.b32.xlu1 %v7652_v39, %s7511_s13 }
 0x140   :  { %1221 = vrot.lane.b32.xlu0 %v7646_v36, %s7514_s15  ;;  %1227 = vrot.lane.b32.xlu1 %v7646_v36, %s7515_s16 }
 0x144   :  { %1233 = vrot.lane.b32.xlu0 %v7646_v36, %s7516_s17  ;;  %1239 = vrot.lane.b32.xlu1 %v7646_v36, %s7517_s18 }
 0x148   :  { %313 = vrot.lane.b32.xlu0 %v7652_v39, %s7514_s15  ;;  %319 = vrot.lane.b32.xlu1 %v7652_v39, %s7515_s16 }
 0x14c   :  { %325 = vrot.lane.b32.xlu0 %v7652_v39, %s7516_s17  ;;  %331 = vrot.lane.b32.xlu1 %v7652_v39, %s7517_s18 }
 0x150   :  { %1245 = vrot.lane.b32.xlu0 %v7646_v36, %s7506_s9  ;;  %1251 = vrot.lane.b32.xlu1 %v7646_v36, %s7518_s19 }
 0x154   :  { %1257 = vrot.lane.b32.xlu0 %v7646_v36, %s7519_s20  ;;  %1263 = vrot.lane.b32.xlu1 %v7646_v36, %s7520_s21 }
 0x158   :  { %337 = vrot.lane.b32.xlu0 %v7652_v39, %s7506_s9  ;;  %343 = vrot.lane.b32.xlu1 %v7652_v39, %s7518_s19 }
 0x15c   :  { %349 = vrot.lane.b32.xlu0 %v7652_v39, %s7519_s20  ;;  %355 = vrot.lane.b32.xlu1 %v7652_v39, %s7520_s21 }
 0x160   :  { %2109 = vrot.lane.b32.xlu1 %v7696_v44, %s7512_s14  ;;  %2115 = vrot.lane.b32.xlu0 %v7696_v44, %s7513_s2 }
 0x164   :  { %2121 = vrot.lane.b32.xlu1 %v7696_v44, %s7511_s13  ;;  %2127 = vrot.lane.b32.xlu0 %v7696_v44, %s7514_s15 }
 0x168   :  { %2133 = vrot.lane.b32.xlu1 %v7696_v44, %s7515_s16  ;;  %2145 = vrot.lane.b32.xlu0 %v7696_v44, %s7517_s18 }
 0x16c   :  { %2139 = vrot.lane.b32.xlu1 %v7696_v44, %s7516_s17  ;;  %2151 = vrot.lane.b32.xlu0 %v7696_v44, %s7506_s9 }
 0x170   :  { %2157 = vrot.lane.b32.xlu1 %v7696_v44, %s7518_s19  ;;  %2169 = vrot.lane.b32.xlu0 %v7696_v44, %s7520_s21 }
 0x174   :  { %2163 = vrot.lane.b32.xlu1 %v7696_v44, %s7519_s20  ;;  %2111 = vrot.lane.b32.xlu0 %v7718_v45, %s7512_s14 }
 0x178   :  { %2117 = vrot.lane.b32.xlu1 %v7718_v45, %s7513_s2 }
 0x17a   :  { %v1214_v51 = vpop.permute.xlu1 %1213  ;;  %v1202_v52 = vpop.permute.xlu0 %1201 }
 0x17b   :  { %v1283_v55 = vcombine.low %v1202_v52, %v1214_v51  ;;  %v1284_v56 = vcombine.high %v1202_v52, %v1214_v51 }
 0x17c   :  { %2123 = vrot.lane.b32.xlu1 %v7718_v45, %s7511_s13 }
 0x17d   :  { %v1291_v62 = vrot.slane %v1283_v55, %v7729_v54  ;;  %v1298_v63 = vrot.slane %v1284_v56, %v7729_v54 }
 0x17e   :  { %v1208_v57 = vpop.permute.xlu0 %1207  ;;  %v294_v58 = vpop.permute.xlu1 %293 }
 0x17f   :  { %v1267_v59 = vcombine.low %v7598_v32, %v1208_v57  ;;  %v1268_v60 = vcombine.high %v7598_v32, %v1208_v57 }
 0x180   :  { %2129 = vrot.lane.b32.xlu1 %v7718_v45, %s7514_s15 }
 0x181   :  { %v1275_v0 = vrot.slane %v1267_v59, %v7729_v54  ;;  %v1282_v2 = vrot.slane %v1268_v60, %v7729_v54 }
 0x182   :  { %v300_v3 = vpop.permute.xlu0 %299  ;;  %v306_v4 = vpop.permute.xlu1 %305 }
 0x183   :  { %v1331_v5 = vcombine.low %v1275_v0, %v1291_v62  ;;  %v1332_v6 = vcombine.high %v1275_v0, %v1291_v62  ;;  %v1347_v7 = vcombine.low %v1282_v2, %v1298_v63  ;;  %v1348_v8 = vcombine.high %v1282_v2, %v1298_v63 }
 0x184   :  { %v359_v9 = vcombine.low %v7604_v33, %v300_v3  ;;  %v360_v10 = vcombine.high %v7604_v33, %v300_v3  ;;  %v375_v11 = vcombine.low %v294_v58, %v306_v4  ;;  %v376_v12 = vcombine.high %v294_v58, %v306_v4 }
 0x185   :  { %v1339_v13 = vrot.slane %v1331_v5, %v7734_v61  ;;  %v1346_v14 = vrot.slane %v1332_v6, %v7734_v61  ;;  %v1355_v15 = vrot.slane %v1347_v7, %v7734_v61  ;;  %v1362_v16 = vrot.slane %v1348_v8, %v7734_v61 }
 0x186   :  { %v367_v17 = vrot.slane %v359_v9, %v7729_v54  ;;  %v374_v18 = vrot.slane %v360_v10, %v7729_v54  ;;  %v383_v19 = vrot.slane %v375_v11, %v7729_v54  ;;  %v390_v20 = vrot.slane %v376_v12, %v7729_v54  ;;  %v1220_v21 = vpop.permute.xlu0 %1219  ;;  %v1226_v22 = vpop.permute.xlu1 %1225 }
 0x187   :  { %v6650_v23 = vcombine.low %v1339_v13, %v1346_v14  ;;  %v6652_v24 = vcombine.high %v1339_v13, %v1346_v14  ;;  %v6654_v25 = vcombine.low %v1355_v15, %v1362_v16  ;;  %v6656_v26 = vcombine.high %v1355_v15, %v1362_v16 }
 0x188   :  { %v423_v27 = vcombine.low %v367_v17, %v383_v19  ;;  %v424_v28 = vcombine.high %v367_v17, %v383_v19  ;;  %v439_v29 = vcombine.low %v374_v18, %v390_v20  ;;  %v440_v30 = vcombine.high %v374_v18, %v390_v20 }
 0x189   :  { %v1683_v31 = vrot.slane %v6650_v23, %v7729_v54  ;;  %v1699_v32 = vrot.slane %v6652_v24, %v7729_v54  ;;  %v1715_v33 = vrot.slane %v6654_v25, %v7729_v54  ;;  %v1731_v34 = vrot.slane %v6656_v26, %v7729_v54 }
 0x18a   :  { %v431_v35 = vrot.slane %v423_v27, %v7734_v61  ;;  %v438_v37 = vrot.slane %v424_v28, %v7734_v61  ;;  %v447_v38 = vrot.slane %v439_v29, %v7734_v61  ;;  %v454_v40 = vrot.slane %v440_v30, %v7734_v61  ;;  %v1232_v41 = vpop.permute.xlu0 %1231  ;;  %v1238_v42 = vpop.permute.xlu1 %1237 }
 0x18b   :  { %v1299_v43 = vcombine.low %v1220_v21, %v1232_v41  ;;  %v1300_v46 = vcombine.high %v1220_v21, %v1232_v41  ;;  %v1315_v47 = vcombine.low %v1226_v22, %v1238_v42  ;;  %v1316_v48 = vcombine.high %v1226_v22, %v1238_v42 }
 0x18c   :  { %v6630_v49 = vcombine.low %v431_v35, %v438_v37  ;;  %v6632_v50 = vcombine.high %v431_v35, %v438_v37  ;;  %v6634_v51 = vcombine.low %v447_v38, %v454_v40  ;;  %v6636_v52 = vcombine.high %v447_v38, %v454_v40 }
 0x18d   :  { %v1307_v53 = vrot.slane %v1299_v43, %v7729_v54  ;;  %v1314_v55 = vrot.slane %v1300_v46, %v7729_v54  ;;  %v1323_v56 = vrot.slane %v1315_v47, %v7729_v54  ;;  %v1330_v57 = vrot.slane %v1316_v48, %v7729_v54 }
 0x18e   :  { %v7765_v58 = vrot.slane %v6630_v49, %v7729_v54  ;;  %v7768_v59 = vrot.slane %v6632_v50, %v7729_v54  ;;  %v7771_v60 = vrot.slane %v6634_v51, %v7729_v54  ;;  %v7774_v62 = vrot.slane %v6636_v52, %v7729_v54  ;;  %v312_v63 = vpop.permute.xlu0 %311  ;;  %v318_v0 = vpop.permute.xlu1 %317 }
 0x18f   :  { %v1363_v2 = vcombine.low %v1307_v53, %v1323_v56  ;;  %v1364_v3 = vcombine.high %v1307_v53, %v1323_v56  ;;  %v1379_v4 = vcombine.low %v1314_v55, %v1330_v57  ;;  %v1380_v5 = vcombine.high %v1314_v55, %v1330_v57 }
 0x190   :  { %v831_v6 = vcombine.low %v7765_v58, %v7768_v59  ;;  %v832_v7 = vcombine.high %v7765_v58, %v7768_v59  ;;  %v863_v8 = vcombine.low %v7771_v60, %v7774_v62  ;;  %v864_v9 = vcombine.high %v7771_v60, %v7774_v62 }
 0x191   :  { %v7785_v10 = vrot.slane %v1363_v2, %v7734_v61  ;;  %v7788_v11 = vrot.slane %v1364_v3, %v7734_v61  ;;  %v1739_v14 = vcombine.low %v1683_v31, %v1699_v32  ;;  %v1771_v15 = vcombine.low %v1715_v33, %v1731_v34 }
 0x192   :  { %v324_v12 = vpop.permute.xlu0 %323  ;;  %v330_v13 = vpop.permute.xlu1 %329  ;;  %v1740_v16 = vcombine.high %v1683_v31, %v1699_v32  ;;  %v1772_v17 = vcombine.high %v1715_v33, %v1731_v34  ;;  %v7791_v18 = vrot.slane %v1379_v4, %v7734_v61  ;;  %v7794_v19 = vrot.slane %v1380_v5, %v7734_v61 }
 0x193   :  { %v6651_v20 = vcombine.low %v7785_v10, %v7788_v11  ;;  %v6653_v21 = vcombine.high %v7785_v10, %v7788_v11  ;;  %v391_v22 = vcombine.low %v312_v63, %v324_v12  ;;  %v392_v23 = vcombine.high %v312_v63, %v324_v12 }
 0x194   :  { %v407_v24 = vcombine.low %v318_v0, %v330_v13  ;;  %v408_v25 = vcombine.high %v318_v0, %v330_v13  ;;  %v7801_v26 = vrot.slane %v1739_v14, %v7734_v61  ;;  %v1779_v27 = vrot.slane %v1771_v15, %v7734_v61 }
 0x195   :  { %v7805_v28 = vrot.slane %v1740_v16, %v7734_v61  ;;  %v7808_v29 = vrot.slane %v1772_v17, %v7734_v61  ;;  %v399_v30 = vrot.slane %v391_v22, %v7729_v54  ;;  %v406_v31 = vrot.slane %v392_v23, %v7729_v54 }
 0x196   :  { %v415_v32 = vrot.slane %v407_v24, %v7729_v54  ;;  %v422_v33 = vrot.slane %v408_v25, %v7729_v54  ;;  %v1244_v34 = vpop.permute.xlu0 %1243  ;;  %v1250_v35 = vpop.permute.xlu1 %1249  ;;  %v1803_v37 = vcombine.low %v7801_v26, %v1779_v27  ;;  %v7818_v40 = vrot.slane %v831_v6, %v7734_v61 }
 0x197   :  { %v1805_v38 = vcombine.low %v7805_v28, %v7808_v29  ;;  %v7821_v41 = vrot.slane %v863_v8, %v7734_v61  ;;  %v6655_v48 = vcombine.low %v7791_v18, %v7794_v19  ;;  %v7849_v24 = vrot.slane %v832_v7, %v7734_v61 }
 0x198   :  { %v455_v42 = vcombine.low %v399_v30, %v415_v32  ;;  %v456_v43 = vcombine.high %v399_v30, %v415_v32  ;;  %v471_v46 = vcombine.low %v406_v31, %v422_v33  ;;  %v472_v47 = vcombine.high %v406_v31, %v422_v33 }
 0x199   :  { %v2083_v49 = vpack.c.bf16 %v1803_v37, %v1803_v37  ;;  %v2085_v50 = vpack.c.bf16 %v1805_v38, %v1805_v38  ;;  %v895_v51 = vcombine.low %v7818_v40, %v7821_v41  ;;  %v6657_v58 = vcombine.high %v7791_v18, %v7794_v19 }
 0x19a   :  { %v463_v52 = vrot.slane %v455_v42, %v7734_v61  ;;  %v470_v53 = vrot.slane %v456_v43, %v7734_v61  ;;  %v479_v55 = vrot.slane %v471_v46, %v7734_v61  ;;  %v486_v56 = vrot.slane %v472_v47, %v7734_v61  ;;  %v1256_v57 = vpop.permute.xlu0 %1255  ;;  %v1262_v63 = vpop.permute.xlu1 %1261 }
 0x19b   :  { %v3020_v0 = vsel %vm3015_vm2, %v2083_v49, 0  ;;  %v3112_v2 = vsel %vm3015_vm2, %v2085_v50, 0  ;;  %v1403_v3 = vcombine.low %v1244_v34, %v1256_v57  ;;  %v1404_v4 = vcombine.high %v1244_v34, %v1256_v57 }
 0x19c   :  { %v6631_v5 = vcombine.low %v463_v52, %v470_v53  ;;  %v6633_v6 = vcombine.high %v463_v52, %v470_v53  ;;  %v6635_v8 = vcombine.low %v479_v55, %v486_v56  ;;  %v6637_v12 = vcombine.high %v479_v55, %v486_v56  ;;  %6895 = vmatpush3.bf16.xpose.msra.mxu1 %v3020_v0 }
 0x19d   :  { %6907 = vmatpush3.bf16.xpose.msra.mxu0 %v3112_v2  ;;  %v1411_v13 = vrot.slane %v1403_v3, %v7729_v54  ;;  %v1418_v14 = vrot.slane %v1404_v4, %v7729_v54  ;;  %v1419_v15 = vcombine.low %v1250_v35, %v1262_v63  ;;  %v1420_v16 = vcombine.high %v1250_v35, %v1262_v63 }
 0x19e   :  { %v7836_v17 = vrot.slane %v6631_v5, %v7729_v54  ;;  %v7839_v22 = vrot.slane %v6633_v6, %v7729_v54  ;;  %v7842_v23 = vrot.slane %v6635_v8, %v7729_v54  ;;  %6900 = vmatprep.subr.bf16.mxu1 %v7509_v1  ;;  %v336_v25 = vpop.permute.xlu0 %335  ;;  %v342_v30 = vpop.permute.xlu1 %341  ;;  %v7852_v31 = vrot.slane %v6637_v12, %v7729_v54 }
 0x19f   :  { %v1427_v32 = vrot.slane %v1419_v15, %v7729_v54  ;;  %v1434_v33 = vrot.slane %v1420_v16, %v7729_v54  ;;  %v7860_v34 = vrot.slane %v864_v9, %v7734_v61  ;;  %6918 = vmatprep.subr.bf16.mxu0 %v7509_v1  ;;  %v1175_v35 = vpack.c.bf16 %v895_v51, %v895_v51 }
 0x1a0   :  { %v847_v59 = vcombine.low %v7836_v17, %v7839_v22  ;;  %v848_v7 = vcombine.high %v7836_v17, %v7839_v22  ;;  %v1804_v62 = vcombine.high %v7801_v26, %v1779_v27  ;;  %v7876_v9 = vrot.slane %v6651_v20, %v7729_v54 }
 0x1a1   :  { %v1435_v37 = vcombine.low %v1411_v13, %v1427_v32  ;;  %v1436_v38 = vcombine.high %v1411_v13, %v1427_v32  ;;  %v1451_v42 = vcombine.low %v1418_v14, %v1434_v33  ;;  %v1452_v43 = vcombine.high %v1418_v14, %v1434_v33 }
 0x1a2   :  { %v897_v60 = vcombine.low %v7849_v24, %v7860_v34  ;;  %v7882_v18 = vrot.slane %v6653_v21, %v7729_v54  ;;  %v348_v19 = vpop.permute.xlu0 %347  ;;  %v354_v46 = vpop.permute.xlu1 %353  ;;  %v879_v47 = vcombine.low %v7842_v23, %v7852_v31  ;;  %v880_v26 = vcombine.high %v7842_v23, %v7852_v31 }
 0x1a3   :  { %v7889_v27 = vrot.slane %v1435_v37, %v7734_v61  ;;  %v7892_v20 = vrot.slane %v1436_v38, %v7734_v61  ;;  %6897 = vmatmul.mubr.msk.bf16.vlgmr.msra.gmra.mxu1 %vm3015_vm2, %v1175_v35  ;;  %v2084_v10 = vpack.c.bf16 %v1804_v62, %v1804_v62  ;;  %v7896_v11 = vrot.slane %v6655_v48, %v7729_v54 }
 0x1a4   :  { %v1177_v49 = vpack.c.bf16 %v897_v60, %v897_v60  ;;  %v7899_v21 = vrot.slane %v6657_v58, %v7729_v54  ;;  %6902 = vmatprep.mubr.msk.bf16.mxu1 %vm7510_vm0, %v7509_v1  ;;  %v7904_v50 = vrot.slane %v1451_v42, %v7734_v61  ;;  %v7907_v51 = vrot.slane %v1452_v43, %v7734_v61 }
 0x1a5   :  { %v1811_v52 = vcombine.low %v7889_v27, %v7892_v20  ;;  %v6658_v53 = vcombine.high %v7889_v27, %v7892_v20  ;;  %v3066_v48 = vsel %vm3015_vm2, %v2084_v10, 0  ;;  %v1755_v55 = vcombine.low %v7876_v9, %v7882_v18 }
 0x1a6   :  { %6909 = vmatmul.mubr.msk.bf16.vlgmr.msra.gmra.mxu0 %vm3015_vm2, %v1177_v49  ;;  %v1787_v56 = vcombine.low %v7896_v11, %v7899_v21  ;;  %v495_v57 = vcombine.low %v336_v25, %v348_v19  ;;  %v7919_v63 = vpop.permute.xlu0 %1203  ;;  %v1210_v0 = vpop.permute.xlu1 %1209  ;;  %6901 = vmatpush3.bf16.xpose.msra.mxu1 %v3066_v48  ;;  %v496_v2 = vcombine.high %v336_v25, %v348_v19 }
 0x1a7   :  { %v511_v3 = vcombine.low %v342_v30, %v354_v46  ;;  %v512_v4 = vcombine.high %v342_v30, %v354_v46  ;;  %v896_v5 = vcombine.high %v7818_v40, %v7821_v41  ;;  %v7924_v6 = vrot.slane %v1755_v55, %v7734_v61  ;;  %6912 = vmatprep.subr.bf16.mxu1 %v7509_v1 }
 0x1a8   :  { %v1795_v8 = vrot.slane %v1787_v56, %v7734_v61  ;;  %v503_v12 = vrot.slane %v495_v57, %v7729_v54  ;;  %v1806_v13 = vcombine.high %v7805_v28, %v7808_v29  ;;  %v1827_v14 = vcombine.low %v7904_v50, %v7907_v51  ;;  %6920 = vmatprep.mubr.msk.bf16.mxu0 %vm7510_vm0, %v7509_v1 }
 0x1a9   :  { %v510_v15 = vrot.slane %v496_v2, %v7729_v54  ;;  %v519_v16 = vrot.slane %v511_v3, %v7729_v54  ;;  %v526_v40 = vrot.slane %v512_v4, %v7729_v54  ;;  %v6659_v41 = vcombine.high %v7904_v50, %v7907_v51 }
 0x1aa   :  { %v1807_v25 = vcombine.low %v7924_v6, %v1795_v8  ;;  %v1176_v30 = vpack.c.bf16 %v896_v5, %v896_v5  ;;  %v2086_v32 = vpack.c.bf16 %v1806_v13, %v1806_v13  ;;  %v1216_v28 = vpop.permute.xlu0 %1215  ;;  %v7941_v29 = vpop.permute.xlu1 %295  ;;  %v1471_v43 = vcombine.low %v7646_v36, %v1210_v0 }
 0x1ab   :  { %v527_v33 = vcombine.low %v503_v12, %v519_v16  ;;  %v528_v58 = vcombine.high %v503_v12, %v519_v16  ;;  %v543_v35 = vcombine.low %v510_v15, %v526_v40  ;;  %v544_v37 = vcombine.high %v510_v15, %v526_v40 }
 0x1ac   :  { %v2087_v38 = vpack.c.bf16 %v1807_v25, %v1807_v25  ;;  %v3158_v42 = vsel %vm3015_vm2, %v2086_v32, 0  ;;  %v1472_v60 = vcombine.high %v7646_v36, %v1210_v0  ;;  %v7956_v48 = vrot.slane %v847_v59, %v7734_v61 }
 0x1ad   :  { %v535_v62 = vrot.slane %v527_v33, %v7734_v61  ;;  %v542_v19 = vrot.slane %v528_v58, %v7734_v61  ;;  %v551_v46 = vrot.slane %v543_v35, %v7734_v61  ;;  %v558_v49 = vrot.slane %v544_v37, %v7734_v61  ;;  %6903 = vmatmul.mubr.msk.bf16.vlgmr.msra.gmra.mxu1 %vm3015_vm2, %v1176_v30 }
 0x1ae   :  { %v3204_v10 = vsel %vm3015_vm2, %v2087_v38, 0  ;;  %v7959_v36 = vrot.slane %v879_v47, %v7734_v61  ;;  %v1756_v55 = vcombine.high %v7876_v9, %v7882_v18  ;;  %v302_v3 = vpop.permute.xlu0 %301  ;;  %v308_v4 = vpop.permute.xlu1 %307  ;;  %6913 = vmatpush3.bf16.xpose.msra.mxu1 %v3158_v42  ;;  %v1788_v47 = vcombine.high %v7896_v11, %v7899_v21  ;;  %6914 = vmatprep.mubr.msk.bf16.mxu1 %vm7510_vm0, %v7509_v1 }
 0x1af   :  { %6919 = vmatpush3.bf16.xpose.msra.mxu0 %v3204_v10  ;;  %v903_v56 = vcombine.low %v535_v62, %v542_v19  ;;  %v6638_v57 = vcombine.high %v535_v62, %v542_v19  ;;  %v919_v0 = vcombine.low %v551_v46, %v558_v49  ;;  %v6639_v2 = vcombine.high %v551_v46, %v558_v49 }
 0x1b0   :  { %v899_v5 = vcombine.low %v7956_v48, %v7959_v36  ;;  %6930 = vmatprep.subr.bf16.mxu0 %v7509_v1  ;;  %v7967_v59 = vrot.slane %v1756_v55, %v7734_v61  ;;  %v1479_v12 = vrot.slane %v1471_v43, %v7729_v54  ;;  %v1486_v13 = vrot.slane %v1472_v60, %v7729_v54 }
 0x1b1   :  { %v7972_v9 = vrot.slane %v903_v56, %v7729_v54  ;;  %v7975_v18 = vrot.slane %v6638_v57, %v7729_v54  ;;  %v7982_v16 = vrot.slane %v1788_v47, %v7734_v61  ;;  %v1487_v40 = vcombine.low %v7919_v63, %v1216_v28  ;;  %6924 = vmatprep.subr.bf16.mxu1 %v7509_v1 }
 0x1b2   :  { %v1179_v15 = vpack.c.bf16 %v899_v5, %v899_v5  ;;  %v1488_v11 = vcombine.high %v7919_v63, %v1216_v28  ;;  %v7988_v21 = vrot.slane %v919_v0, %v7729_v54  ;;  %v7991_v25 = vrot.slane %v6639_v2, %v7729_v54  ;;  %v8007_v43 = vpop.permute.xlu0 %1221  ;;  %v8009_v60 = vpop.permute.xlu1 %1227 }
 0x1b3   :  { %v935_v30 = vcombine.low %v7972_v9, %v7975_v18  ;;  %v936_v32 = vcombine.high %v7972_v9, %v7975_v18  ;;  %v1809_v33 = vcombine.low %v7967_v59, %v7982_v16  ;;  %v1495_v58 = vrot.slane %v1487_v40, %v7729_v54 }
 0x1b4   :  { %v1502_v63 = vrot.slane %v1488_v11, %v7729_v54  ;;  %v898_v28 = vcombine.high %v7849_v24, %v7860_v34  ;;  %v1808_v35 = vcombine.high %v7924_v6, %v1795_v8  ;;  %v563_v37 = vcombine.low %v7652_v39, %v302_v3 }
 0x1b5   :  { %v564_v38 = vcombine.high %v7652_v39, %v302_v3  ;;  %v579_v42 = vcombine.low %v7941_v29, %v308_v4  ;;  %v2089_v62 = vpack.c.bf16 %v1809_v33, %v1809_v33  ;;  %v1535_v19 = vcombine.low %v1479_v12, %v1495_v58 }
 0x1b6   :  { %6921 = vmatmul.mubr.msk.bf16.vlgmr.msra.gmra.mxu0 %vm3015_vm2, %v1179_v15  ;;  %v1536_v46 = vcombine.high %v1479_v12, %v1495_v58  ;;  %v1551_v49 = vcombine.low %v1486_v13, %v1502_v63  ;;  %v951_v24 = vcombine.low %v7988_v21, %v7991_v25  ;;  %v1552_v34 = vcombine.high %v1486_v13, %v1502_v63  ;;  %v1234_v11 = vpop.permute.xlu0 %1233  ;;  %v8053_v33 = vpop.permute.xlu1 %1239 }
 0x1b7   :  { %v1178_v6 = vpack.c.bf16 %v898_v28, %v898_v28  ;;  %v2088_v8 = vpack.c.bf16 %v1808_v35, %v1808_v35  ;;  %6932 = vmatprep.mubr.msk.bf16.mxu0 %vm7510_vm0, %v7509_v1  ;;  %v3296_v39 = vsel %vm3015_vm2, %v2089_v62, 0  ;;  %v8018_v10 = vrot.slane %v1535_v19, %v7734_v61 }
 0x1b8   :  { %v8021_v55 = vrot.slane %v1536_v46, %v7734_v61  ;;  %v571_v56 = vrot.slane %v563_v37, %v7729_v54  ;;  %v952_v57 = vcombine.high %v7988_v21, %v7991_v25  ;;  %6931 = vmatpush3.bf16.xpose.msra.mxu0 %v3296_v39  ;;  %v578_v2 = vrot.slane %v564_v38, %v7729_v54 }
 0x1b9   :  { %6915 = vmatmul.mubr.msk.bf16.vlgmr.msra.gmra.mxu1 %vm3015_vm2, %v1178_v6  ;;  %v3250_v0 = vsel %vm3015_vm2, %v2088_v8, 0  ;;  %v580_v3 = vcombine.high %v7941_v29, %v308_v4  ;;  %v8031_v5 = vrot.slane %v1551_v49, %v7734_v61  ;;  %v8034_v47 = vrot.slane %v1552_v34, %v7734_v61  ;;  %6942 = vmatprep.subr.bf16.mxu0 %v7509_v1 }
 0x1ba   :  { %6925 = vmatpush3.bf16.xpose.msra.mxu1 %v3250_v0  ;;  %v587_v12 = vrot.slane %v579_v42, %v7729_v54  ;;  %v8041_v13 = vrot.slane %v848_v7, %v7734_v61  ;;  %v6660_v15 = vcombine.low %v8018_v10, %v8021_v55  ;;  %v6662_v29 = vcombine.high %v8018_v10, %v8021_v55  ;;  %v8093_v34 = vpop.permute.xlu1 %319 }
 0x1bb   :  { %v594_v4 = vrot.slane %v580_v3, %v7729_v54  ;;  %v894_v40 = vrot.slane %v880_v26, %v7734_v61  ;;  %v8059_v7 = vrot.slane %v1811_v52, %v7729_v54  ;;  %v8065_v58 = vrot.slane %v6658_v53, %v7729_v54  ;;  %6926 = vmatprep.mubr.msk.bf16.mxu1 %vm7510_vm0, %v7509_v1 }
 0x1bc   :  { %v627_v17 = vcombine.low %v571_v56, %v587_v12  ;;  %v628_v22 = vcombine.high %v571_v56, %v587_v12  ;;  %v1834_v63 = vrot.slane %v1827_v14, %v7729_v54  ;;  %6936 = vmatprep.subr.bf16.mxu1 %v7509_v1  ;;  %v1842_v20 = vrot.slane %v6659_v41, %v7729_v54  ;;  %v8091_v41 = vpop.permute.xlu0 %313 }
 0x1bd   :  { %v643_v23 = vcombine.low %v578_v2, %v594_v4  ;;  %v644_v31 = vcombine.high %v578_v2, %v594_v4  ;;  %v901_v26 = vcombine.low %v8041_v13, %v894_v40  ;;  %v1843_v53 = vcombine.low %v8059_v7, %v8065_v58 }
 0x1be   :  { %v635_v52 = vrot.slane %v627_v17, %v7734_v61  ;;  %v642_v27 = vrot.slane %v628_v22, %v7734_v61  ;;  %v900_v14 = vcombine.high %v7956_v48, %v7959_v36  ;;  %v1859_v19 = vcombine.low %v1834_v63, %v1842_v20 }
 0x1bf   :  { %v651_v28 = vrot.slane %v643_v23, %v7734_v61  ;;  %v658_v35 = vrot.slane %v644_v31, %v7734_v61  ;;  %v1181_v37 = vpack.c.bf16 %v901_v26, %v901_v26  ;;  %v1851_v62 = vrot.slane %v1843_v53, %v7734_v61 }
 0x1c0   :  { %v6640_v38 = vcombine.low %v635_v52, %v642_v27  ;;  %v6642_v42 = vcombine.high %v635_v52, %v642_v27  ;;  %v1180_v50 = vpack.c.bf16 %v900_v14, %v900_v14  ;;  %v1810_v51 = vcombine.high %v7967_v59, %v7982_v16 }
 0x1c1   :  { %v6644_v46 = vcombine.low %v651_v28, %v658_v35  ;;  %v6646_v49 = vcombine.high %v651_v28, %v658_v35  ;;  %6933 = vmatmul.mubr.msk.bf16.vlgmr.msra.gmra.mxu0 %vm3015_vm2, %v1181_v37  ;;  %v1867_v36 = vrot.slane %v1859_v19, %v7734_v61  ;;  %v1503_v8 = vcombine.low %v8007_v43, %v1234_v11 }
 0x1c2   :  { %v8096_v6 = vrot.slane %v6640_v38, %v7729_v54  ;;  %v8099_v48 = vrot.slane %v6642_v42, %v7729_v54  ;;  %6944 = vmatprep.mubr.msk.bf16.mxu0 %vm7510_vm0, %v7509_v1  ;;  %v6664_v59 = vcombine.low %v8031_v5, %v8034_v47  ;;  %v6666_v16 = vcombine.high %v8031_v5, %v8034_v47 }
 0x1c3   :  { %6927 = vmatmul.mubr.msk.bf16.vlgmr.msra.gmra.mxu1 %vm3015_vm2, %v1180_v50  ;;  %v2090_v39 = vpack.c.bf16 %v1810_v51, %v1810_v51  ;;  %v1504_v56 = vcombine.high %v8007_v43, %v1234_v11  ;;  %v8112_v0 = vrot.slane %v6644_v46, %v7729_v54  ;;  %v8115_v2 = vrot.slane %v6646_v49, %v7729_v54 }
 0x1c4   :  { %v1035_v3 = vcombine.low %v8096_v6, %v8099_v48  ;;  %v1875_v12 = vcombine.low %v1851_v62, %v1867_v36  ;;  %6938 = vmatprep.mubr.msk.bf16.mxu1 %vm7510_vm0, %v7509_v1  ;;  %v1036_v4 = vcombine.high %v8096_v6, %v8099_v48  ;;  %v1511_v43 = vrot.slane %v1503_v8, %v7729_v54 }
 0x1c5   :  { %v3342_v17 = vsel %vm3015_vm2, %v2090_v39, 0  ;;  %v1518_v11 = vrot.slane %v1504_v56, %v7729_v54  ;;  %v1519_v23 = vcombine.low %v8009_v60, %v8053_v33  ;;  %v1520_v31 = vcombine.high %v8009_v60, %v8053_v33  ;;  %v326_v60 = vpop.permute.xlu0 %325  ;;  %v332_v33 = vpop.permute.xlu1 %331 }
 0x1c6   :  { %v2091_v22 = vpack.c.bf16 %v1875_v12, %v1875_v12  ;;  %6937 = vmatpush3.bf16.xpose.msra.mxu1 %v3342_v17  ;;  %v8134_v26 = vrot.slane %v935_v30, %v7734_v61  ;;  %v8140_v52 = vrot.slane %v951_v24, %v7734_v61  ;;  %v1844_v27 = vcombine.high %v8059_v7, %v8065_v58 }
 0x1c7   :  { %v1860_v53 = vcombine.high %v1834_v63, %v1842_v20  ;;  %v902_v28 = vcombine.high %v8041_v13, %v894_v40  ;;  %6948 = vmatprep.subr.bf16.mxu1 %v7509_v1  ;;  %v1527_v30 = vrot.slane %v1519_v23, %v7729_v54  ;;  %v1534_v37 = vrot.slane %v1520_v31, %v7729_v54 }
 0x1c8   :  { %v3388_v35 = vsel %vm3015_vm2, %v2091_v22, 0  ;;  %v1876_v14 = vcombine.high %v1851_v62, %v1867_v36  ;;  %v967_v24 = vcombine.low %v8134_v26, %v8140_v52  ;;  %v8152_v7 = vrot.slane %v1844_v27, %v7734_v61 }
 0x1c9   :  { %6943 = vmatpush3.bf16.xpose.msra.mxu0 %v3388_v35  ;;  %v8155_v13 = vrot.slane %v1860_v53, %v7734_v61  ;;  %v1182_v40 = vpack.c.bf16 %v902_v28, %v902_v28  ;;  %v1567_v58 = vcombine.low %v1511_v43, %v1527_v30  ;;  %v1568_v63 = vcombine.high %v1511_v43, %v1527_v30  ;;  %v8178_v17 = vpop.permute.xlu0 %1245  ;;  %v8180_v43 = vpop.permute.xlu1 %1251 }
 0x1ca   :  { %v1583_v20 = vcombine.low %v1518_v11, %v1534_v37  ;;  %v1584_v38 = vcombine.high %v1518_v11, %v1534_v37  ;;  %6954 = vmatprep.subr.bf16.mxu0 %v7509_v1  ;;  %v1183_v42 = vpack.c.bf16 %v967_v24, %v967_v24  ;;  %v2092_v19 = vpack.c.bf16 %v1876_v14, %v1876_v14 }
 0x1cb   :  { %v1877_v62 = vcombine.low %v8152_v7, %v8155_v13  ;;  %v595_v46 = vcombine.low %v8091_v41, %v326_v60  ;;  %v8162_v49 = vrot.slane %v1567_v58, %v7734_v61  ;;  %v8165_v50 = vrot.slane %v1568_v63, %v7734_v61 }
 0x1cc   :  { %v8168_v51 = vrot.slane %v1583_v20, %v7734_v61  ;;  %v8171_v36 = vrot.slane %v1584_v38, %v7734_v61  ;;  %v1067_v8 = vcombine.low %v8112_v0, %v8115_v2  ;;  %v3434_v56 = vsel %vm3015_vm2, %v2092_v19, 0 }
 0x1cd   :  { %v2093_v39 = vpack.c.bf16 %v1877_v62, %v1877_v62  ;;  %6939 = vmatmul.mubr.msk.bf16.vlgmr.msra.gmra.mxu1 %vm3015_vm2, %v1182_v40  ;;  %v596_v12 = vcombine.high %v8091_v41, %v326_v60  ;;  %v1068_v11 = vcombine.high %v8112_v0, %v8115_v2  ;;  %v6661_v22 = vcombine.low %v8162_v49, %v8165_v50  ;;  %v1264_v58 = vpop.permute.xlu1 %1263 }
 0x1ce   :  { %v6663_v23 = vcombine.high %v8162_v49, %v8165_v50  ;;  %6949 = vmatpush3.bf16.xpose.msra.mxu1 %v3434_v56  ;;  %v603_v31 = vrot.slane %v595_v46, %v7729_v54  ;;  %v611_v41 = vcombine.low %v8093_v34, %v332_v33  ;;  %v612_v53 = vcombine.high %v8093_v34, %v332_v33 }
 0x1cf   :  { %v610_v27 = vrot.slane %v596_v12, %v7729_v54  ;;  %6950 = vmatprep.mubr.msk.bf16.mxu1 %vm7510_vm0, %v7509_v1  ;;  %6960 = vmatprep.subr.bf16.mxu1 %v7509_v1  ;;  %v8196_v28 = vrot.slane %v6661_v22, %v7729_v54  ;;  %v6665_v60 = vcombine.low %v8168_v51, %v8171_v36  ;;  %v3480_v30 = vsel %vm3015_vm2, %v2093_v39, 0 }
 0x1d0   :  { %v6667_v35 = vcombine.high %v8168_v51, %v8171_v36  ;;  %6945 = vmatmul.mubr.msk.bf16.vlgmr.msra.gmra.mxu0 %vm3015_vm2, %v1183_v42  ;;  %v619_v34 = vrot.slane %v611_v41, %v7729_v54  ;;  %v626_v33 = vrot.slane %v612_v53, %v7729_v54  ;;  %v950_v37 = vrot.slane %v936_v32, %v7734_v61 }
 0x1d1   :  { %6955 = vmatpush3.bf16.xpose.msra.mxu0 %v3480_v30  ;;  %6956 = vmatprep.mubr.msk.bf16.mxu0 %vm7510_vm0, %v7509_v1  ;;  %v966_v14 = vrot.slane %v952_v57, %v7734_v61  ;;  %v8221_v24 = vrot.slane %v6660_v15, %v7729_v54  ;;  %v8227_v40 = vrot.slane %v6662_v29, %v7729_v54  ;;  %v1258_v57 = vpop.permute.xlu0 %1257 }
 0x1d2   :  { %6966 = vmatprep.subr.bf16.mxu0 %v7509_v1  ;;  %v8233_v9 = vrot.slane %v6664_v59, %v7729_v54  ;;  %v659_v18 = vcombine.low %v603_v31, %v619_v34  ;;  %v660_v21 = vcombine.high %v603_v31, %v619_v34  ;;  %v675_v25 = vcombine.low %v610_v27, %v626_v33 }
 0x1d3   :  { %v676_v32 = vcombine.high %v610_v27, %v626_v33  ;;  %v969_v15 = vcombine.low %v950_v37, %v966_v14  ;;  %v1935_v10 = vrot.slane %v6666_v16, %v7729_v54  ;;  %v1943_v55 = vcombine.low %v8221_v24, %v8227_v40 }
 0x1d4   :  { %v968_v29 = vcombine.high %v8134_v26, %v8140_v52  ;;  %v667_v59 = vrot.slane %v659_v18, %v7734_v61  ;;  %v674_v63 = vrot.slane %v660_v21, %v7734_v61  ;;  %v683_v20 = vrot.slane %v675_v25, %v7734_v61 }
 0x1d5   :  { %v690_v38 = vrot.slane %v676_v32, %v7734_v61  ;;  %v1185_v42 = vpack.c.bf16 %v969_v15, %v969_v15  ;;  %v1951_v62 = vrot.slane %v1943_v55, %v7734_v61  ;;  %v1975_v5 = vcombine.low %v8233_v9, %v1935_v10  ;;  %v8269_v12 = vpop.permute.xlu0 %337 }
 0x1d6   :  { %v1184_v47 = vpack.c.bf16 %v968_v29, %v968_v29  ;;  %v6641_v16 = vcombine.low %v667_v59, %v674_v63  ;;  %v6643_v19 = vcombine.high %v667_v59, %v674_v63  ;;  %v1878_v52 = vcombine.high %v8152_v7, %v8155_v13  ;;  %v8271_v7 = vpop.permute.xlu1 %343 }
 0x1d7   :  { %v6645_v46 = vcombine.low %v683_v20, %v690_v38  ;;  %v6647_v49 = vcombine.high %v683_v20, %v690_v38  ;;  %v1983_v26 = vrot.slane %v1975_v5, %v7734_v61  ;;  %v1607_v50 = vcombine.low %v8178_v17, %v1258_v57 }
 0x1d8   :  { %6957 = vmatmul.mubr.msk.bf16.vlgmr.msra.gmra.mxu0 %vm3015_vm2, %v1185_v42  ;;  %6951 = vmatmul.mubr.msk.bf16.vlgmr.msra.gmra.mxu1 %vm3015_vm2, %v1184_v47  ;;  %v8256_v51 = vrot.slane %v6663_v23, %v7729_v54  ;;  %v8259_v36 = vrot.slane %v6665_v60, %v7729_v54  ;;  %v8262_v39 = vrot.slane %v6641_v16, %v7729_v54 }
 0x1d9   :  { %v8265_v56 = vrot.slane %v6643_v19, %v7729_v54  ;;  %6968 = vmatprep.mubr.msk.bf16.mxu0 %vm7510_vm0, %v7509_v1  ;;  %v8274_v13 = vrot.slane %v6667_v35, %v7729_v54  ;;  %v2007_v22 = vcombine.low %v1951_v62, %v1983_v26  ;;  %v2094_v23 = vpack.c.bf16 %v1878_v52, %v1878_v52  ;;  %v350_v29 = vpop.permute.xlu0 %349 }
 0x1da   :  { %v1608_v31 = vcombine.high %v8178_v17, %v1258_v57  ;;  %6962 = vmatprep.mubr.msk.bf16.mxu1 %vm7510_vm0, %v7509_v1  ;;  %v8280_v27 = vrot.slane %v6645_v46, %v7729_v54  ;;  %v8283_v41 = vrot.slane %v6647_v49, %v7729_v54  ;;  %v1615_v60 = vrot.slane %v1607_v50, %v7729_v54  ;;  %v356_v59 = vpop.permute.xlu1 %355 }
 0x1db   :  { %v1051_v53 = vcombine.low %v8262_v39, %v8265_v56  ;;  %v2095_v35 = vpack.c.bf16 %v2007_v22, %v2007_v22  ;;  %v3526_v30 = vsel %vm3015_vm2, %v2094_v23, 0  ;;  %v1623_v17 = vcombine.low %v8180_v43, %v1264_v58 }
 0x1dc   :  { %v1622_v34 = vrot.slane %v1608_v31, %v7729_v54  ;;  %6961 = vmatpush3.bf16.xpose.msra.mxu1 %v3526_v30  ;;  %v1624_v33 = vcombine.high %v8180_v43, %v1264_v58  ;;  %v1043_v18 = vrot.slane %v1035_v3, %v7734_v61  ;;  %v1075_v21 = vrot.slane %v1067_v8, %v7734_v61 }
 0x1dd   :  { %v1944_v25 = vcombine.high %v8221_v24, %v8227_v40  ;;  %v3572_v32 = vsel %vm3015_vm2, %v2095_v35, 0  ;;  %v1631_v57 = vrot.slane %v1623_v17, %v7729_v54  ;;  %v1976_v15 = vcombine.high %v8233_v9, %v1935_v10  ;;  %6972 = vmatprep.subr.bf16.mxu1 %v7509_v1 }
 0x1de   :  { %v970_v43 = vcombine.high %v950_v37, %v966_v14  ;;  %6967 = vmatpush3.bf16.xpose.msra.mxu0 %v3572_v32  ;;  %v1638_v3 = vrot.slane %v1624_v33, %v7729_v54  ;;  %v1099_v58 = vcombine.low %v1043_v18, %v1075_v21  ;;  %v2008_v8 = vcombine.high %v1951_v62, %v1983_v26  ;;  %v8325_v49 = vpop.permute.xlu1 %2109 }
 0x1df   :  { %v8308_v55 = vrot.slane %v1944_v25, %v7734_v61  ;;  %v1083_v24 = vcombine.low %v8280_v27, %v8283_v41  ;;  %v1639_v40 = vcombine.low %v1615_v60, %v1631_v57  ;;  %v1640_v63 = vcombine.high %v1615_v60, %v1631_v57  ;;  %6978 = vmatprep.subr.bf16.mxu0 %v7509_v1 }
 0x1e0   :  { %v1990_v37 = vrot.slane %v1976_v15, %v7734_v61  ;;  %v1655_v14 = vcombine.low %v1622_v34, %v1638_v3  ;;  %v1656_v9 = vcombine.high %v1622_v34, %v1638_v3  ;;  %v1186_v10 = vpack.c.bf16 %v970_v43, %v970_v43 }
 0x1e1   :  { %v2096_v20 = vpack.c.bf16 %v2008_v8, %v2008_v8  ;;  %v1647_v38 = vrot.slane %v1639_v40, %v7734_v61  ;;  %v1654_v42 = vrot.slane %v1640_v63, %v7734_v61  ;;  %v699_v5 = vcombine.low %v8269_v12, %v350_v29 }
 0x1e2   :  { %v2009_v62 = vcombine.low %v8308_v55, %v1990_v37  ;;  %v8319_v47 = vrot.slane %v1655_v14, %v7734_v61  ;;  %v8322_v16 = vrot.slane %v1656_v9, %v7734_v61  ;;  %v1187_v19 = vpack.c.bf16 %v1099_v58, %v1099_v58  ;;  %v8368_v6 = vpop.permute.xlu1 %2121 }
 0x1e3   :  { %v700_v46 = vcombine.high %v8269_v12, %v350_v29  ;;  %v2015_v26 = vcombine.low %v1647_v38, %v1654_v42  ;;  %v6668_v52 = vcombine.high %v1647_v38, %v1654_v42  ;;  %6963 = vmatmul.mubr.msk.bf16.vlgmr.msra.gmra.mxu1 %vm3015_vm2, %v1186_v10  ;;  %v3618_v22 = vsel %vm3015_vm2, %v2096_v20, 0 }
 0x1e4   :  { %v2097_v50 = vpack.c.bf16 %v2009_v62, %v2009_v62  ;;  %v2031_v23 = vcombine.low %v8319_v47, %v8322_v16  ;;  %v6669_v31 = vcombine.high %v8319_v47, %v8322_v16  ;;  %6973 = vmatpush3.bf16.xpose.msra.mxu1 %v3618_v22  ;;  %v707_v60 = vrot.slane %v699_v5, %v7729_v54 }
 0x1e5   :  { %v715_v12 = vcombine.low %v8271_v7, %v356_v59  ;;  %v8336_v35 = vrot.slane %v2015_v26, %v7729_v54  ;;  %6969 = vmatmul.mubr.msk.bf16.vlgmr.msra.gmra.mxu0 %vm3015_vm2, %v1187_v19  ;;  %v714_v34 = vrot.slane %v700_v46, %v7729_v54  ;;  %v716_v17 = vcombine.high %v8271_v7, %v356_v59  ;;  %v8397_v46 = vpop.permute.xlu0 %2115 }
 0x1e6   :  { %v3664_v30 = vsel %vm3015_vm2, %v2097_v50, 0  ;;  %6974 = vmatprep.mubr.msk.bf16.mxu1 %vm7510_vm0, %v7509_v1  ;;  %v8345_v33 = vrot.slane %v6668_v52, %v7729_v54  ;;  %v8348_v25 = vrot.slane %v2031_v23, %v7729_v54  ;;  %6980 = vmatprep.mubr.msk.bf16.mxu0 %vm7510_vm0, %v7509_v1  ;;  %v1050_v7 = vrot.slane %v1036_v4, %v7734_v61  ;;  %v8399_v26 = vpop.permute.xlu1 %2133 }
 0x1e7   :  { %6979 = vmatpush3.bf16.xpose.msra.mxu0 %v3664_v30  ;;  %v723_v32 = vrot.slane %v715_v12, %v7729_v54  ;;  %v730_v57 = vrot.slane %v716_v17, %v7729_v54  ;;  %v1082_v15 = vrot.slane %v1068_v11, %v7734_v61  ;;  %v1959_v43 = vcombine.low %v8196_v28, %v8256_v51 }
 0x1e8   :  { %6990 = vmatprep.subr.bf16.mxu0 %v7509_v1  ;;  %v1991_v8 = vcombine.low %v8259_v36, %v8274_v13  ;;  %v1100_v29 = vcombine.high %v1043_v18, %v1075_v21  ;;  %6984 = vmatprep.subr.bf16.mxu1 %v7509_v1  ;;  %v2010_v9 = vcombine.high %v8308_v55, %v1990_v37 }
 0x1e9   :  { %v731_v3 = vcombine.low %v707_v60, %v723_v32  ;;  %v732_v58 = vcombine.high %v707_v60, %v723_v32  ;;  %v747_v48 = vcombine.low %v714_v34, %v730_v57  ;;  %v748_v4 = vcombine.high %v714_v34, %v730_v57 }
 0x1ea   :  { %v1101_v59 = vcombine.low %v1050_v7, %v1082_v15  ;;  %v1967_v0 = vrot.slane %v1959_v43, %v7734_v61  ;;  %v1999_v40 = vrot.slane %v1991_v8, %v7734_v61  ;;  %v1188_v63 = vpack.c.bf16 %v1100_v29, %v1100_v29 }
 0x1eb   :  { %v739_v2 = vrot.slane %v731_v3, %v7734_v61  ;;  %v746_v11 = vrot.slane %v732_v58, %v7734_v61  ;;  %v755_v14 = vrot.slane %v747_v48, %v7734_v61  ;;  %v762_v18 = vrot.slane %v748_v4, %v7734_v61 }
 0x1ec   :  { %v1189_v21 = vpack.c.bf16 %v1101_v59, %v1101_v59  ;;  %v2011_v38 = vcombine.low %v1967_v0, %v1999_v40  ;;  %6975 = vmatmul.mubr.msk.bf16.vlgmr.msra.gmra.mxu1 %vm3015_vm2, %v1188_v63  ;;  %v1059_v42 = vrot.slane %v1051_v53, %v7734_v61  ;;  %v2098_v47 = vpack.c.bf16 %v2010_v9, %v2010_v9 }
 0x1ed   :  { %v1107_v10 = vcombine.low %v739_v2, %v746_v11  ;;  %v6648_v20 = vcombine.high %v739_v2, %v746_v11  ;;  %v1123_v62 = vcombine.low %v755_v14, %v762_v18  ;;  %v6649_v5 = vcombine.high %v755_v14, %v762_v18  ;;  %6986 = vmatprep.mubr.msk.bf16.mxu1 %vm7510_vm0, %v7509_v1 }
 0x1ee   :  { %6981 = vmatmul.mubr.msk.bf16.vlgmr.msra.gmra.mxu0 %vm3015_vm2, %v1189_v21  ;;  %v1091_v55 = vrot.slane %v1083_v24, %v7734_v61  ;;  %v2099_v19 = vpack.c.bf16 %v2011_v38, %v2011_v38  ;;  %v1960_v53 = vcombine.high %v8196_v28, %v8256_v51  ;;  %v2046_v52 = vrot.slane %v6669_v31, %v7729_v54 }
 0x1ef   :  { %v8388_v37 = vrot.slane %v1107_v10, %v7729_v54  ;;  %v8391_v16 = vrot.slane %v6648_v20, %v7729_v54  ;;  %6992 = vmatprep.mubr.msk.bf16.mxu0 %vm7510_vm0, %v7509_v1  ;;  %v1130_v24 = vrot.slane %v1123_v62, %v7729_v54  ;;  %v1138_v50 = vrot.slane %v6649_v5, %v7729_v54 }
 0x1f0   :  { %v3710_v22 = vsel %vm3015_vm2, %v2098_v47, 0  ;;  %v1052_v23 = vcombine.high %v8262_v39, %v8265_v56  ;;  %v1084_v28 = vcombine.high %v8280_v27, %v8283_v41  ;;  %v3756_v51 = vsel %vm3015_vm2, %v2099_v19, 0 }
 0x1f1   :  { %6985 = vmatpush3.bf16.xpose.msra.mxu1 %v3710_v22  ;;  %v1139_v31 = vcombine.low %v8388_v37, %v8391_v16  ;;  %6991 = vmatpush3.bf16.xpose.msra.mxu0 %v3756_v51  ;;  %v1103_v60 = vcombine.low %v1059_v42, %v1091_v55  ;;  %v1974_v12 = vrot.slane %v1960_v53, %v7734_v61 }
 0x1f2   :  { %v1992_v30 = vcombine.high %v8259_v36, %v8274_v13  ;;  %v1155_v34 = vcombine.low %v1130_v24, %v1138_v50  ;;  %7002 = vmatprep.subr.bf16.mxu0 %v7509_v1  ;;  %v1102_v39 = vcombine.high %v1050_v7, %v1082_v15  ;;  %6996 = vmatprep.subr.bf16.mxu1 %v7509_v1  ;;  %v8427_v7 = vpop.permute.xlu0 %2127  ;;  %v8429_v15 = vpop.permute.xlu1 %2139 }
 0x1f3   :  { %v2012_v56 = vcombine.high %v1967_v0, %v1999_v40  ;;  %v1140_v27 = vcombine.high %v8388_v37, %v8391_v16  ;;  %v2047_v17 = vcombine.low %v8336_v35, %v8345_v33  ;;  %v2063_v32 = vcombine.low %v8348_v25, %v2046_v52 }
 0x1f4   :  { %v2006_v41 = vrot.slane %v1992_v30, %v7734_v61  ;;  %v1190_v57 = vpack.c.bf16 %v1102_v39, %v1102_v39  ;;  %v1066_v36 = vrot.slane %v1052_v23, %v7734_v61  ;;  %v1098_v13 = vrot.slane %v1084_v28, %v7734_v61 }
 0x1f5   :  { %v2100_v43 = vpack.c.bf16 %v2012_v56, %v2012_v56  ;;  %v2055_v58 = vrot.slane %v2047_v17, %v7734_v61  ;;  %v2071_v8 = vrot.slane %v2063_v32, %v7734_v61  ;;  %v1147_v29 = vrot.slane %v1139_v31, %v7734_v61 }
 0x1f6   :  { %v2013_v3 = vcombine.low %v1974_v12, %v2006_v41  ;;  %v1156_v48 = vcombine.high %v1130_v24, %v1138_v50  ;;  %v1191_v4 = vpack.c.bf16 %v1103_v60, %v1103_v60  ;;  %v2014_v59 = vcombine.high %v1974_v12, %v2006_v41  ;;  %v8453_v62 = vpop.permute.xlu1 %2157 }
 0x1f7   :  { %v1163_v0 = vrot.slane %v1155_v34, %v7734_v61  ;;  %v3802_v11 = vsel %vm3015_vm2, %v2100_v43, 0  ;;  %v1104_v40 = vcombine.high %v1059_v42, %v1091_v55  ;;  %v2048_v63 = vcombine.high %v8336_v35, %v8345_v33  ;;  %v2146_v42 = vpop.permute.xlu0 %2145 }
 0x1f8   :  { %v2101_v2 = vpack.c.bf16 %v2013_v3, %v2013_v3  ;;  %6987 = vmatmul.mubr.msk.bf16.vlgmr.msra.gmra.mxu1 %vm3015_vm2, %v1190_v57  ;;  %6993 = vmatmul.mubr.msk.bf16.vlgmr.msra.gmra.mxu0 %vm3015_vm2, %v1191_v4  ;;  %v1105_v14 = vcombine.low %v1066_v36, %v1098_v13  ;;  %v2079_v18 = vcombine.low %v2055_v58, %v2071_v8 }
 0x1f9   :  { %6997 = vmatpush3.bf16.xpose.msra.mxu1 %v3802_v11  ;;  %v2064_v21 = vcombine.high %v8348_v25, %v2046_v52  ;;  %7004 = vmatprep.mubr.msk.bf16.mxu0 %vm7510_vm0, %v7509_v1  ;;  %v2102_v10 = vpack.c.bf16 %v2014_v59, %v2014_v59  ;;  %v8446_v20 = vcombine.low %v1147_v29, %v1163_v0 }
 0x1fa   :  { %v3848_v9 = vsel %vm3015_vm2, %v2101_v2, 0  ;;  %6998 = vmatprep.mubr.msk.bf16.mxu1 %vm7510_vm0, %v7509_v1  ;;  %v2062_v35 = vrot.slane %v2048_v63, %v7734_v61  ;;  %7008 = vmatprep.subr.bf16.mxu1 %v7509_v1  ;;  %v8451_v38 = vcombine.high %v1066_v36, %v1098_v13  ;;  %v2080_v25 = vcombine.high %v2055_v58, %v2071_v8  ;;  %v8490_v56 = vpop.permute.xlu1 %2163 }
 0x1fb   :  { %7003 = vmatpush3.bf16.xpose.msra.mxu0 %v3848_v9  ;;  %v2078_v33 = vrot.slane %v2064_v21, %v7734_v61  ;;  %v1154_v5 = vrot.slane %v1140_v27, %v7734_v61  ;;  %v1170_v47 = vrot.slane %v1156_v48, %v7734_v61  ;;  %v1193_v55 = vpack.c.bf16 %v1105_v14, %v1105_v14  ;;  %v8488_v39 = vpop.permute.xlu0 %2151 }
 0x1fc   :  { %7014 = vmatprep.subr.bf16.mxu0 %v7509_v1  ;;  %v2103_v37 = vpack.c.bf16 %v2079_v18, %v2079_v18  ;;  %v1192_v16 = vpack.c.bf16 %v1104_v40, %v1104_v40  ;;  %v3894_v53 = vsel %vm3015_vm2, %v2102_v10, 0  ;;  %v1195_v52 = vpack.c.bf16 %v8446_v20, %v8446_v20 }
 0x1fd   :  { %v8458_v19 = vcombine.low %v2062_v35, %v2078_v33  ;;  %v2191_v24 = vcombine.low %v8325_v49, %v8368_v6  ;;  %v2192_v50 = vcombine.high %v8325_v49, %v8368_v6  ;;  %v1194_v22 = vpack.c.bf16 %v8451_v38, %v8451_v38 }
 0x1fe   :  { %v2104_v23 = vpack.c.bf16 %v2080_v25, %v2080_v25  ;;  %v8469_v28 = vcombine.high %v1147_v29, %v1163_v0  ;;  %v8471_v51 = vcombine.high %v2062_v35, %v2078_v33  ;;  %v8476_v60 = vcombine.low %v1154_v5, %v1170_v47  ;;  %v2118_v14 = vpop.permute.xlu1 %2117 }
 0x1ff   :  { %v2105_v31 = vpack.c.bf16 %v8458_v19, %v8458_v19  ;;  %v8478_v12 = vcombine.high %v1154_v5, %v1170_v47  ;;  %v2199_v30 = vrot.slane %v2191_v24, %v7729_v54  ;;  %v2206_v49 = vrot.slane %v2192_v50, %v7729_v54  ;;  %v2170_v63 = vpop.permute.xlu0 %2169 }
 0x200   :  { %6999 = vmatmul.mubr.msk.bf16.vlgmr.msra.gmra.mxu1 %vm3015_vm2, %v1192_v16  ;;  %v2175_v6 = vcombine.low %v7696_v44, %v8397_v46  ;;  %v2176_v34 = vcombine.high %v7696_v44, %v8397_v46  ;;  %v3940_v27 = vsel %vm3015_vm2, %v2103_v37, 0  ;;  %v2207_v41 = vcombine.low %v8427_v7, %v8429_v15 }
 0x201   :  { %7009 = vmatpush3.bf16.xpose.msra.mxu1 %v3894_v53  ;;  %7010 = vmatprep.mubr.msk.bf16.mxu1 %vm7510_vm0, %v7509_v1  ;;  %v2208_v17 = vcombine.high %v8427_v7, %v8429_v15  ;;  %v2223_v32 = vcombine.low %v8399_v26, %v2146_v42  ;;  %v3986_v44 = vsel %vm3015_vm2, %v2104_v23, 0  ;;  %v2224_v43 = vcombine.high %v8399_v26, %v2146_v42 }
 0x202   :  { %7005 = vmatmul.mubr.msk.bf16.vlgmr.msra.gmra.mxu0 %vm3015_vm2, %v1193_v55  ;;  %7020 = vmatprep.subr.bf16.mxu1 %v7509_v1  ;;  %v2183_v46 = vrot.slane %v2175_v6, %v7729_v54  ;;  %v2190_v57 = vrot.slane %v2176_v34, %v7729_v54  ;;  %v2215_v36 = vrot.slane %v2207_v41, %v7729_v54  ;;  %v4032_v38 = vsel %vm3015_vm2, %v2105_v31, 0 }
 0x203   :  { %7015 = vmatpush3.bf16.xpose.msra.mxu0 %v3940_v27  ;;  %7016 = vmatprep.mubr.msk.bf16.mxu0 %vm7510_vm0, %v7509_v1  ;;  %v2222_v13 = vrot.slane %v2208_v17, %v7729_v54  ;;  %v2231_v7 = vrot.slane %v2223_v32, %v7729_v54  ;;  %v2311_v15 = vcombine.low %v8488_v39, %v8490_v56 }
 0x204   :  { %7026 = vmatprep.subr.bf16.mxu0 %v7509_v1  ;;  %v2239_v3 = vcombine.low %v2183_v46, %v2199_v30  ;;  %v2240_v58 = vcombine.high %v2183_v46, %v2199_v30  ;;  %v2255_v8 = vcombine.low %v2190_v57, %v2206_v49  ;;  %v2256_v29 = vcombine.high %v2190_v57, %v2206_v49 }
 0x205   :  { %v2238_v48 = vrot.slane %v2224_v43, %v7729_v54  ;;  %v2271_v4 = vcombine.low %v2215_v36, %v2231_v7  ;;  %v2272_v59 = vcombine.high %v2215_v36, %v2231_v7  ;;  %v2312_v26 = vcombine.high %v8488_v39, %v8490_v56 }
 0x206   :  { %v2247_v0 = vrot.slane %v2239_v3, %v7734_v61  ;;  %v2254_v2 = vrot.slane %v2240_v58, %v7734_v61  ;;  %v2263_v11 = vrot.slane %v2255_v8, %v7734_v61  ;;  %v2270_v40 = vrot.slane %v2256_v29, %v7734_v61 }
 0x207   :  { %v8521_v18 = vrot.slane %v2271_v4, %v7734_v61  ;;  %v8524_v21 = vrot.slane %v2272_v59, %v7734_v61  ;;  %v2287_v9 = vcombine.low %v2222_v13, %v2238_v48  ;;  %v2288_v10 = vcombine.high %v2222_v13, %v2238_v48 }
 0x208   :  { %7011 = vmatmul.mubr.msk.bf16.vlgmr.msra.gmra.mxu1 %vm3015_vm2, %v1194_v22  ;;  %v1196_v20 = vpack.c.bf16 %v8469_v28, %v8469_v28  ;;  %v2106_v35 = vpack.c.bf16 %v8471_v51, %v8471_v51  ;;  %v6670_v33 = vcombine.low %v2247_v0, %v2254_v2  ;;  %v6672_v25 = vcombine.high %v2247_v0, %v2254_v2  ;;  %v2112_v28 = vpop.permute.xlu0 %2111  ;;  %v2124_v51 = vpop.permute.xlu1 %2123 }
 0x209   :  { %7021 = vmatpush3.bf16.xpose.msra.mxu1 %v3986_v44  ;;  %7022 = vmatprep.mubr.msk.bf16.mxu1 %vm7510_vm0, %v7509_v1  ;;  %v8536_v42 = vrot.slane %v2287_v9, %v7734_v61  ;;  %v8539_v5 = vrot.slane %v2288_v10, %v7734_v61  ;;  %v1197_v47 = vpack.c.bf16 %v8476_v60, %v8476_v60 }
 0x20a   :  { %7017 = vmatmul.mubr.msk.bf16.vlgmr.msra.gmra.mxu0 %vm3015_vm2, %v1195_v52  ;;  %7032 = vmatprep.subr.bf16.mxu1 %v7509_v1  ;;  %v1198_v55 = vpack.c.bf16 %v8478_v12, %v8478_v12  ;;  %v6674_v37 = vcombine.low %v2263_v11, %v2270_v40  ;;  %v6676_v16 = vcombine.high %v2263_v11, %v2270_v40  ;;  %v4078_v24 = vsel %vm3015_vm2, %v2106_v35, 0 }
 0x20b   :  { %7027 = vmatpush3.bf16.xpose.msra.mxu0 %v4032_v38  ;;  %7028 = vmatprep.mubr.msk.bf16.mxu0 %vm7510_vm0, %v7509_v1  ;;  %v6671_v19 = vcombine.low %v8521_v18, %v8524_v21  ;;  %v6673_v53 = vcombine.high %v8521_v18, %v8524_v21  ;;  %v6675_v52 = vcombine.low %v8536_v42, %v8539_v5 }
 0x20c   :  { %7038 = vmatprep.subr.bf16.mxu0 %v7509_v1  ;;  %v6677_v50 = vcombine.high %v8536_v42, %v8539_v5  ;;  %v2319_v22 = vrot.slane %v2311_v15, %v7729_v54  ;;  %v2327_v23 = vcombine.low %v8453_v62, %v2170_v63  ;;  %v2591_v31 = vrot.slane %v6670_v33, %v7729_v54 }
 0x20d   :  { %v2607_v60 = vrot.slane %v6672_v25, %v7729_v54  ;;  %v2326_v12 = vrot.slane %v2312_v26, %v7729_v54  ;;  %v2328_v30 = vcombine.high %v8453_v62, %v2170_v63  ;;  %v2623_v49 = vrot.slane %v6674_v37, %v7729_v54 }
 0x20e   :  { %v2335_v6 = vrot.slane %v2327_v23, %v7729_v54  ;;  %v2379_v34 = vcombine.low %v7718_v45, %v2118_v14  ;;  %v2380_v39 = vcombine.high %v7718_v45, %v2118_v14  ;;  %v2639_v56 = vrot.slane %v6676_v16, %v7729_v54 }
 0x20f   :  { %v2342_v27 = vrot.slane %v2328_v30, %v7729_v54  ;;  %v2395_v41 = vcombine.low %v2112_v28, %v2124_v51  ;;  %v2396_v17 = vcombine.high %v2112_v28, %v2124_v51  ;;  %v2647_v3 = vcombine.low %v2591_v31, %v2607_v60 }
 0x210   :  { %7023 = vmatmul.mubr.msk.bf16.vlgmr.msra.gmra.mxu1 %vm3015_vm2, %v1196_v20  ;;  %v2343_v62 = vcombine.low %v2319_v22, %v2335_v6  ;;  %v2344_v32 = vcombine.high %v2319_v22, %v2335_v6  ;;  %v2387_v44 = vrot.slane %v2379_v34, %v7729_v54  ;;  %v2394_v43 = vrot.slane %v2380_v39, %v7729_v54 }
 0x211   :  { %7033 = vmatpush3.bf16.xpose.msra.mxu1 %v4078_v24  ;;  %7034 = vmatprep.mubr.msk.bf16.mxu1 %vm7510_vm0, %v7509_v1  ;;  %v2359_v46 = vcombine.low %v2326_v12, %v2342_v27  ;;  %v2360_v57 = vcombine.high %v2326_v12, %v2342_v27  ;;  %v2403_v36 = vrot.slane %v2395_v41, %v7729_v54 }
 0x212   :  { %7029 = vmatmul.mubr.msk.bf16.vlgmr.msra.gmra.mxu0 %vm3015_vm2, %v1197_v47  ;;  %v8577_v13 = vrot.slane %v2343_v62, %v7734_v61  ;;  %v8580_v7 = vrot.slane %v2344_v32, %v7734_v61  ;;  %v2410_v15 = vrot.slane %v2396_v17, %v7729_v54  ;;  %7044 = vmatprep.subr.bf16.mxu1 %v7509_v1 }
 0x213   :  { %v8585_v58 = vrot.slane %v2359_v46, %v7734_v61  ;;  %v8588_v8 = vrot.slane %v2360_v57, %v7734_v61  ;;  %v2443_v29 = vcombine.low %v2387_v44, %v2403_v36  ;;  %v2444_v48 = vcombine.high %v2387_v44, %v2403_v36  ;;  %7040 = vmatprep.mubr.msk.bf16.mxu0 %vm7510_vm0, %v7509_v1 }
 0x214   :  { %v2719_v4 = vcombine.low %v8577_v13, %v8580_v7  ;;  %v6678_v59 = vcombine.high %v8577_v13, %v8580_v7  ;;  %v2459_v26 = vcombine.low %v2394_v43, %v2410_v15  ;;  %v2460_v0 = vcombine.high %v2394_v43, %v2410_v15 }
 0x215   :  { %v2735_v2 = vcombine.low %v8585_v58, %v8588_v8  ;;  %v6679_v11 = vcombine.high %v8585_v58, %v8588_v8  ;;  %v2451_v40 = vrot.slane %v2443_v29, %v7734_v61  ;;  %v2458_v63 = vrot.slane %v2444_v48, %v7734_v61 }
 0x216   :  { %v2467_v14 = vrot.slane %v2459_v26, %v7734_v61  ;;  %v2474_v9 = vrot.slane %v2460_v0, %v7734_v61  ;;  %v2655_v35 = vrot.slane %v2647_v3, %v7734_v61  ;;  %v2679_v25 = vcombine.low %v2623_v49, %v2639_v56 }
 0x217   :  { %v6680_v10 = vcombine.low %v2451_v40, %v2458_v63  ;;  %v6682_v20 = vcombine.high %v2451_v40, %v2458_v63  ;;  %v2648_v47 = vcombine.high %v2591_v31, %v2607_v60  ;;  %v2680_v24 = vcombine.high %v2623_v49, %v2639_v56 }
 0x218   :  { %7035 = vmatmul.mubr.msk.bf16.vlgmr.msra.gmra.mxu1 %vm3015_vm2, %v1198_v55  ;;  %v6684_v33 = vcombine.low %v2467_v14, %v2474_v9  ;;  %v6686_v38 = vcombine.high %v2467_v14, %v2474_v9  ;;  %v2687_v23 = vrot.slane %v2679_v25, %v7734_v61  ;;  %v2598_v7 = vrot.slane %v6671_v19, %v7729_v54 }
 0x219   :  { %7046 = vmatprep.mubr.msk.bf16.mxu1 %vm7510_vm0, %v7509_v1  ;;  %v2795_v37 = vrot.slane %v6680_v10, %v7729_v54  ;;  %v2811_v16 = vrot.slane %v6682_v20, %v7729_v54  ;;  %v2662_v28 = vrot.slane %v2648_v47, %v7734_v61  ;;  %v2694_v51 = vrot.slane %v2680_v24, %v7734_v61 }
 0x21a   :  { %v2827_v22 = vrot.slane %v6684_v33, %v7729_v54  ;;  %v2843_v55 = vrot.slane %v6686_v38, %v7729_v54  ;;  %v2711_v6 = vcombine.low %v2655_v35, %v2687_v23  ;;  %v2712_v31 = vcombine.high %v2655_v35, %v2687_v23 }
 0x21b   :  { %v2851_v12 = vcombine.low %v2795_v37, %v2811_v16  ;;  %v2852_v30 = vcombine.high %v2795_v37, %v2811_v16  ;;  %v8615_v39 = vcombine.high %v2662_v28, %v2694_v51  ;;  %v8617_v49 = vcombine.low %v2662_v28, %v2694_v51 }
 0x21c   :  { %v2883_v60 = vcombine.low %v2827_v22, %v2843_v55  ;;  %v2884_v34 = vcombine.high %v2827_v22, %v2843_v55  ;;  %v2991_v41 = vpack.c.bf16 %v2711_v6, %v2711_v6  ;;  %v2992_v17 = vpack.c.bf16 %v2712_v31, %v2712_v31 }
 0x21d   :  { %v2859_v56 = vrot.slane %v2851_v12, %v7734_v61  ;;  %v2866_v27 = vrot.slane %v2852_v30, %v7734_v61  ;;  %v2614_v3 = vrot.slane %v6673_v53, %v7729_v54  ;;  %v2630_v58 = vrot.slane %v6675_v52, %v7729_v54 }
 0x21e   :  { %v2891_v62 = vrot.slane %v2883_v60, %v7734_v61  ;;  %v2898_v32 = vrot.slane %v2884_v34, %v7734_v61  ;;  %v4413_v44 = vsel %vm4411_vm3, %v2991_v41, 0  ;;  %v4459_v46 = vsel %vm4411_vm3, %v2992_v17, 0 }
 0x21f   :  { %7039 = vmatpush3.bf16.msra.mxu0 %v4413_v44  ;;  %7045 = vmatpush3.bf16.msra.mxu1 %v4459_v46  ;;  %v2646_v8 = vrot.slane %v6677_v50, %v7729_v54  ;;  %v2726_v29 = vrot.slane %v2719_v4, %v7729_v54  ;;  %v2734_v48 = vrot.slane %v6678_v59, %v7729_v54 }
 0x220   :  { %v8625_v57 = vcombine.high %v2859_v56, %v2891_v62  ;;  %v8627_v43 = vcombine.low %v2859_v56, %v2891_v62  ;;  %v8629_v36 = vcombine.high %v2866_v27, %v2898_v32  ;;  %v8631_v13 = vcombine.low %v2866_v27, %v2898_v32  ;;  %7056 = vmatprep.subr.bf16.mxu1 %v7509_v1 }
 0x221   :  { %7050 = vmatprep.subr.bf16.mxu0 %v7509_v1  ;;  %v2742_v18 = vrot.slane %v2735_v2, %v7729_v54  ;;  %v2750_v21 = vrot.slane %v6679_v11, %v7729_v54  ;;  %v2663_v50 = vcombine.low %v2598_v7, %v2614_v3  ;;  %v2695_v0 = vcombine.low %v2630_v58, %v2646_v8 }
 0x222   :  { %v2664_v40 = vcombine.high %v2598_v7, %v2614_v3  ;;  %v2696_v63 = vcombine.high %v2630_v58, %v2646_v8  ;;  %v2751_v59 = vcombine.low %v2726_v29, %v2734_v48  ;;  %v2752_v2 = vcombine.high %v2726_v29, %v2734_v48 }
 0x223   :  { %v2767_v14 = vcombine.low %v2742_v18, %v2750_v21  ;;  %v2768_v9 = vcombine.high %v2742_v18, %v2750_v21  ;;  %v2671_v10 = vrot.slane %v2663_v50, %v7734_v61  ;;  %v2703_v20 = vrot.slane %v2695_v0, %v7734_v61 }
 0x224   :  { %v2678_v35 = vrot.slane %v2664_v40, %v7734_v61  ;;  %v2710_v33 = vrot.slane %v2696_v63, %v7734_v61  ;;  %v2759_v38 = vrot.slane %v2751_v59, %v7734_v61  ;;  %v2766_v47 = vrot.slane %v2752_v2, %v7734_v61 }
 0x225   :  { %v2775_v25 = vrot.slane %v2767_v14, %v7734_v61  ;;  %v2782_v37 = vrot.slane %v2768_v9, %v7734_v61  ;;  %v8671_v24 = vcombine.high %v2671_v10, %v2703_v20  ;;  %v8673_v22 = vcombine.low %v2671_v10, %v2703_v20 }
 0x226   :  { %v8675_v55 = vcombine.high %v2678_v35, %v2710_v33  ;;  %v8677_v23 = vcombine.low %v2678_v35, %v2710_v33 }
 0x227   :  { %v8679_v28 = vcombine.high %v2759_v38, %v2775_v25  ;;  %v8681_v51 = vcombine.low %v2759_v38, %v2775_v25  ;;  %v8683_v12 = vcombine.high %v2766_v47, %v2782_v37  ;;  %v8685_v30 = vcombine.low %v2766_v47, %v2782_v37 }
 0x263   :  { %v8639_v15 = vpop.f32.mrf.mxu1 }
 0x264   :  { %v4120_v19 = vsel %vm3015_vm2, %v8639_v15, -inf }
 0x265   :  { %4121 = vmax.xlane.f32.xlu0 %v4120_v19  ;;  %v6898_v53 = vpop.f32.mrf.mxu1 }
 0x266   :  { %v8659_v26 = vpop.f32.mrf.mxu0 }
 0x267   :  { %v3059_v52 = vpop.f32.mrf.mxu1  ;;  %v4126_v42 = vsel %vm3015_vm2, %v8659_v26, -inf }
 0x268   :  { %v6910_v5 = vpop.f32.mrf.mxu0 }
 0x269   :  { %4127 = vmax.xlane.f32.xlu0 %v4126_v42  ;;  %v6899_v4 = vpop.f32.mrf.mxu1 }
 0x26a   :  { %v3151_v11 = vpop.f32.mrf.mxu0 }
 0x26c   :  { %v6911_v16 = vpop.f32.mrf.mxu0 }
 0x26d   :  { %v8687_v6 = vpop.f32.mrf.mxu1 }
 0x26e   :  { %v4123_v31 = vsel %vm3015_vm2, %v8687_v6, -inf }
 0x26f   :  { %4124 = vmax.xlane.f32.xlu1 %v4123_v31  ;;  %v6904_v60 = vpop.f32.mrf.mxu1 }
 0x271   :  { %v3105_v34 = vpop.f32.mrf.mxu1 }
 0x273   :  { %v6905_v56 = vpop.f32.mrf.mxu1 }
 0x276   :  { %v8691_v27 = vpop.f32.mrf.mxu0 }
 0x277   :  { %v4132_v41 = vsel %vm3015_vm2, %v8691_v27, -inf }
 0x278   :  { %4133 = vmax.xlane.f32.xlu1 %v4132_v41  ;;  %v6922_v17 = vpop.f32.mrf.mxu0 }
 0x279   :  { %v8695_v62 = vpop.f32.mrf.mxu1 }
 0x27a   :  { %v3243_v32 = vpop.f32.mrf.mxu0  ;;  %v4129_v44 = vsel %vm3015_vm2, %v8695_v62, -inf }
 0x27b   :  { %4130 = vmax.xlane.f32.xlu0 %v4129_v44  ;;  %v6916_v46 = vpop.f32.mrf.mxu1 }
 0x27c   :  { %v6923_v7 = vpop.f32.mrf.mxu0 }
 0x27d   :  { %v3197_v3 = vpop.f32.mrf.mxu1 }
 0x27f   :  { %v6917_v58 = vpop.f32.mrf.mxu1 }
 0x281   :  { %v8699_v8 = vpop.f32.mrf.mxu0 }
 0x282   :  { %v4138_v19 = vsel %vm3015_vm2, %v8699_v8, -inf }
 0x283   :  { %4139 = vmax.xlane.f32.xlu1 %v4138_v19  ;;  %v6934_v29 = vpop.f32.mrf.mxu0  ;;  %v8703_v48 = vpop.f32.mrf.mxu1 }
 0x284   :  { %v4135_v18 = vsel %vm3015_vm2, %v8703_v48, -inf }
 0x285   :  { %v3335_v21 = vpop.f32.mrf.mxu0  ;;  %4136 = vmax.xlane.f32.xlu0 %v4135_v18  ;;  %v6928_v53 = vpop.f32.mrf.mxu1 }
 0x287   :  { %v6935_v52 = vpop.f32.mrf.mxu0  ;;  %v3289_v42 = vpop.f32.mrf.mxu1 }
 0x289   :  { %v6929_v5 = vpop.f32.mrf.mxu1 }
 0x28d   :  { %v8707_v50 = vpop.f32.mrf.mxu1 }
 0x28e   :  { %v4141_v0 = vsel %vm3015_vm2, %v8707_v50, -inf }
 0x28f   :  { %4142 = vmax.xlane.f32.xlu0 %v4141_v0  ;;  %v6940_v40 = vpop.f32.mrf.mxu1 }
 0x290   :  { %v8711_v63 = vpop.f32.mrf.mxu0 }
 0x291   :  { %v4144_v4 = vsel %vm3015_vm2, %v8711_v63, -inf  ;;  %v3381_v59 = vpop.f32.mrf.mxu1 }
 0x292   :  { %4145 = vmax.xlane.f32.xlu1 %v4144_v4  ;;  %v6946_v14 = vpop.f32.mrf.mxu0 }
 0x293   :  { %v6941_v2 = vpop.f32.mrf.mxu1 }
 0x294   :  { %v3427_v9 = vpop.f32.mrf.mxu0 }
 0x296   :  { %v6947_v11 = vpop.f32.mrf.mxu0 }
 0x298   :  { %v8715_v10 = vpop.f32.mrf.mxu0  ;;  %v8717_v20 = vpop.f32.mrf.mxu1 }
 0x299   :  { %v4150_v35 = vsel %vm3015_vm2, %v8715_v10, -inf  ;;  %v4147_v33 = vsel %vm3015_vm2, %v8717_v20, -inf }
 0x29a   :  { %4151 = vmax.xlane.f32.xlu1 %v4150_v35  ;;  %v6958_v38 = vpop.f32.mrf.mxu0  ;;  %4148 = vmax.xlane.f32.xlu0 %v4147_v33  ;;  %v6952_v25 = vpop.f32.mrf.mxu1 }
 0x29c   :  { %v3519_v47 = vpop.f32.mrf.mxu0  ;;  %v3473_v37 = vpop.f32.mrf.mxu1 }
 0x29e   :  { %v6959_v16 = vpop.f32.mrf.mxu0  ;;  %v6953_v31 = vpop.f32.mrf.mxu1 }
 0x2a3   :  { %v8723_v60 = vpop.f32.mrf.mxu1 }
 0x2a4   :  { %v4153_v34 = vsel %vm3015_vm2, %v8723_v60, -inf }
 0x2a5   :  { %v8727_v56 = vpop.f32.mrf.mxu0  ;;  %4154 = vmax.xlane.f32.xlu0 %v4153_v34  ;;  %v6964_v41 = vpop.f32.mrf.mxu1 }
 0x2a6   :  { %v4156_v17 = vsel %vm3015_vm2, %v8727_v56, -inf }
 0x2a7   :  { %4157 = vmax.xlane.f32.xlu1 %v4156_v17  ;;  %v6970_v32 = vpop.f32.mrf.mxu0  ;;  %v3565_v44 = vpop.f32.mrf.mxu1 }
 0x2a9   :  { %v3611_v46 = vpop.f32.mrf.mxu0  ;;  %v6965_v7 = vpop.f32.mrf.mxu1 }
 0x2ab   :  { %v6971_v3 = vpop.f32.mrf.mxu0 }
 0x2ac   :  { %v8731_v58 = vpop.f32.mrf.mxu1 }
 0x2ad   :  { %v4159_v29 = vsel %vm3015_vm2, %v8731_v58, -inf }
 0x2ae   :  { %v8733_v19 = vpop.f32.mrf.mxu0  ;;  %4160 = vmax.xlane.f32.xlu0 %v4159_v29  ;;  %v6976_v21 = vpop.f32.mrf.mxu1 }
 0x2af   :  { %v4162_v18 = vsel %vm3015_vm2, %v8733_v19, -inf }
 0x2b0   :  { %4163 = vmax.xlane.f32.xlu1 %v4162_v18  ;;  %v6982_v53 = vpop.f32.mrf.mxu0  ;;  %v3657_v52 = vpop.f32.mrf.mxu1 }
 0x2b2   :  { %v3703_v42 = vpop.f32.mrf.mxu0  ;;  %v6977_v5 = vpop.f32.mrf.mxu1 }
 0x2b4   :  { %v6983_v0 = vpop.f32.mrf.mxu0 }
 0x2b8   :  { %v8739_v40 = vpop.f32.mrf.mxu1  ;;  %v8741_v4 = vpop.f32.mrf.mxu0 }
 0x2ba   :  { %v6988_v59 = vpop.f32.mrf.mxu1  ;;  %v6994_v14 = vpop.f32.mrf.mxu0 }
 0x2bc   :  { %v3749_v2 = vpop.f32.mrf.mxu1  ;;  %v3795_v9 = vpop.f32.mrf.mxu0 }
 0x2be   :  { %v6989_v11 = vpop.f32.mrf.mxu1  ;;  %v6995_v35 = vpop.f32.mrf.mxu0 }
 0x2bf   :  { %v4165_v35 = vsel %vm3015_vm2, %v8739_v40, -inf }
 0x2c0   :  { %v8743_v33 = vpop.f32.mrf.mxu1 }
 0x2c1   :  { %2141 = vrot.lane.b32.xlu1 %v7718_v45, %s7516_s17 }
 0x2c2   :  { %v8747_v38 = vpop.f32.mrf.mxu0  ;;  %v7000_v25 = vpop.f32.mrf.mxu1 }
 0x2c3   :  { %v4171_v25 = vsel %vm3015_vm2, %v8743_v33, -inf }
 0x2c4   :  { %v7006_v47 = vpop.f32.mrf.mxu0  ;;  %v3841_v37 = vpop.f32.mrf.mxu1  ;;  %2135 = vrot.lane.b32.xlu0 %v7718_v45, %s7515_s16 }
 0x2c5   :  { %2147 = vrot.lane.b32.xlu1 %v7718_v45, %s7517_s18  ;;  %v4168_v47 = vsel %vm3015_vm2, %v8741_v4, -inf }
 0x2c6   :  { %v3887_v16 = vpop.f32.mrf.mxu0  ;;  %v7001_v31 = vpop.f32.mrf.mxu1 }
 0x2c7   :  { %v4174_v16 = vsel %vm3015_vm2, %v8747_v38, -inf }
 0x2c8   :  { %v7007_v34 = vpop.f32.mrf.mxu0  ;;  %v8753_v41 = vpop.f32.mrf.mxu1 }
 0x2c9   :  { %v4177_v37 = vsel %vm3015_vm2, %v8753_v41, -inf }
 0x2ca   :  { %v8755_v17 = vpop.f32.mrf.mxu0  ;;  %v7012_v32 = vpop.f32.mrf.mxu1 }
 0x2cb   :  { %v8777_v32 = vpop.permute.xlu1 %2129 }
 0x2cc   :  { %v7018_v44 = vpop.f32.mrf.mxu0  ;;  %v3933_v46 = vpop.f32.mrf.mxu1 }
 0x2ce   :  { %v3979_v7 = vpop.f32.mrf.mxu0  ;;  %v7013_v3 = vpop.f32.mrf.mxu1 }
 0x2d0   :  { %v7019_v29 = vpop.f32.mrf.mxu0  ;;  %v8757_v18 = vpop.f32.mrf.mxu1 }
 0x2d1   :  { %v4183_v31 = vsel %vm3015_vm2, %v8757_v18, -inf }
 0x2d2   :  { %v8759_v21 = vpop.f32.mrf.mxu0  ;;  %v7024_v53 = vpop.f32.mrf.mxu1 }
 0x2d4   :  { %v7030_v52 = vpop.f32.mrf.mxu0  ;;  %v4025_v42 = vpop.f32.mrf.mxu1 }
 0x2d6   :  { %v4071_v5 = vpop.f32.mrf.mxu0  ;;  %v7025_v0 = vpop.f32.mrf.mxu1 }
 0x2d8   :  { %v7031_v59 = vpop.f32.mrf.mxu0  ;;  %v8761_v14 = vpop.f32.mrf.mxu1 }
 0x2d9   :  { %v4189_v34 = vsel %vm3015_vm2, %v8761_v14, -inf }
 0x2da   :  { %v7036_v2 = vpop.f32.mrf.mxu1 }
 0x2dc   :  { %v4117_v9 = vpop.f32.mrf.mxu1 }
 0x2de   :  { %v7037_v11 = vpop.f32.mrf.mxu1 }
 0x2e3   :  { %4166 = vmax.xlane.f32.xlu0 %v4165_v35 }
 0x2e7   :  { %4172 = vmax.xlane.f32.xlu0 %v4171_v25 }
 0x2e9   :  { %4169 = vmax.xlane.f32.xlu1 %v4168_v47 }
 0x2eb   :  { %4178 = vmax.xlane.f32.xlu0 %v4177_v37 }
 0x2ed   :  { %4175 = vmax.xlane.f32.xlu1 %v4174_v16 }
 0x2ee   :  { %v4122_v46 = vpop.xlane.xlu0 %4121 }
 0x2ef   :  { %4184 = vmax.xlane.f32.xlu0 %v4183_v31  ;;  %v4192_v9 = vsub.f32 %v8639_v15, %v4122_v46 }
 0x2f1   :  { %v4216_v25 = vmul.f32 1.442695, %v4192_v9 }
 0x2f2   :  { %v4128_v29 = vpop.xlane.xlu0 %4127 }
 0x2f3   :  { %4190 = vmax.xlane.f32.xlu0 %v4189_v34 }
 0x2f8   :  { %v4125_v44 = vpop.xlane.xlu1 %4124 }
 0x2f9   :  { %v4193_v7 = vsub.f32 %v8687_v6, %v4125_v44 }
 0x2fb   :  { %v4218_v3 = vmul.f32 1.442695, %v4193_v7 }
 0x2fd   :  { %7311 = vpow2.f32 %v4218_v3 }
 0x2fe   :  { %2153 = vrot.lane.b32.xlu1 %v7718_v45, %s7506_s9 }
 0x301   :  { %v4134_v53 = vpop.xlane.xlu1 %4133 }
 0x302   :  { %v4196_v52 = vsub.f32 %v8691_v27, %v4134_v53 }
 0x304   :  { %v4224_v42 = vmul.f32 1.442695, %v4196_v52  ;;  %v4131_v5 = vpop.xlane.xlu0 %4130 }
 0x305   :  { %v4195_v0 = vsub.f32 %v8695_v62, %v4131_v5  ;;  %v4194_v62 = vsub.f32 %v8659_v26, %v4128_v29 }
 0x306   :  { %7313 = vpow2.f32 %v4224_v42  ;;  %v4180_v42 = vsel %vm3015_vm2, %v8755_v17, -inf }
 0x307   :  { %v4222_v59 = vmul.f32 1.442695, %v4195_v0  ;;  %v4220_v34 = vmul.f32 1.442695, %v4194_v62 }
 0x309   :  { %7315 = vpow2.f32 %v4222_v59 }
 0x30a   :  { %v8784_v2 = vpop.eup %7311  ;;  %7317 = vpow2.f32 %v4216_v25 }
 0x30b   :  { %v4267_v6 = vsel %vm3015_vm2, %v8784_v2, 0.0  ;;  %7319 = vpow2.f32 %v4220_v34 }
 0x30c   :  { %4268 = vadd.xlane.f32.xlu0 %v4267_v6  ;;  %v4140_v37 = vpop.xlane.xlu1 %4139 }
 0x30d   :  { %v4198_v15 = vsub.f32 %v8699_v8, %v4140_v37 }
 0x30e   :  { %v4137_v35 = vpop.xlane.xlu0 %4136 }
 0x30f   :  { %v4228_v26 = vmul.f32 1.442695, %v4198_v15  ;;  %v4197_v29 = vsub.f32 %v8703_v48, %v4137_v35 }
 0x311   :  { %v4226_v52 = vmul.f32 1.442695, %v4197_v29 }
 0x313   :  { %v8789_v11 = vpop.eup %7313 }
 0x314   :  { %v4276_v27 = vsel %vm3015_vm2, %v8789_v11, 0.0 }
 0x315   :  { %4277 = vadd.xlane.f32.xlu0 %v4276_v27 }
 0x316   :  { %v8794_v47 = vpop.eup %7315 }
 0x317   :  { %v4273_v16 = vsel %vm3015_vm2, %v8794_v47, 0.0  ;;  %v8808_v48 = vpop.eup %7317 }
 0x318   :  { %v4143_v31 = vpop.xlane.xlu0 %4142  ;;  %v4264_v9 = vsel %vm3015_vm2, %v8808_v48, 0.0  ;;  %v8812_v35 = vpop.eup %7319 }
 0x319   :  { %v4199_v44 = vsub.f32 %v8707_v50, %v4143_v31  ;;  %4274 = vadd.xlane.f32.xlu0 %v4273_v16  ;;  %v4270_v27 = vsel %vm3015_vm2, %v8812_v35, 0.0 }
 0x31b   :  { %v4146_v46 = vpop.xlane.xlu1 %4145  ;;  %v4230_v7 = vmul.f32 1.442695, %v4199_v44 }
 0x31c   :  { %v4200_v3 = vsub.f32 %v8711_v63, %v4146_v46  ;;  %v4186_v63 = vsel %vm3015_vm2, %v8759_v21, -inf }
 0x31d   :  { %7321 = vpow2.f32 %v4230_v7 }
 0x31e   :  { %v4232_v53 = vmul.f32 1.442695, %v4200_v3 }
 0x320   :  { %7323 = vpow2.f32 %v4232_v53 }
 0x321   :  { %7325 = vpow2.f32 %v4228_v26 }
 0x322   :  { %4181 = vmax.xlane.f32.xlu1 %v4180_v42  ;;  %7327 = vpow2.f32 %v4226_v52 }
 0x323   :  { %v4152_v8 = vpop.xlane.xlu1 %4151  ;;  %v4149_v50 = vpop.xlane.xlu0 %4148 }
 0x324   :  { %v4202_v5 = vsub.f32 %v8715_v10, %v4152_v8  ;;  %v4201_v0 = vsub.f32 %v8717_v20, %v4149_v50 }
 0x326   :  { %4187 = vmax.xlane.f32.xlu1 %v4186_v63  ;;  %v4236_v59 = vmul.f32 1.442695, %v4202_v5  ;;  %v4234_v6 = vmul.f32 1.442695, %v4201_v0 }
 0x328   :  { %7329 = vpow2.f32 %v4236_v59 }
 0x329   :  { %7331 = vpow2.f32 %v4234_v6 }
 0x32a   :  { %4265 = vadd.xlane.f32.xlu1 %v4264_v9  ;;  %v8814_v10 = vpop.eup %7321 }
 0x32b   :  { %v4285_v31 = vsel %vm3015_vm2, %v8814_v10, 0.0 }
 0x32d   :  { %v8816_v20 = vpop.eup %7323 }
 0x32e   :  { %v8820_v25 = vpop.eup %7325  ;;  %4271 = vadd.xlane.f32.xlu1 %v4270_v27  ;;  %v4288_v62 = vsel %vm3015_vm2, %v8816_v20, 0.0  ;;  %v4155_v37 = vpop.xlane.xlu0 %4154 }
 0x32f   :  { %4289 = vadd.xlane.f32.xlu0 %v4288_v62  ;;  %v4203_v16 = vsub.f32 %v8723_v60, %v4155_v37  ;;  %v4282_v15 = vsel %vm3015_vm2, %v8820_v25, 0.0  ;;  %v8829_v44 = vpop.eup %7327 }
 0x330   :  { %v4158_v34 = vpop.xlane.xlu1 %4157  ;;  %v4279_v60 = vsel %vm3015_vm2, %v8829_v44, 0.0 }
 0x331   :  { %v4204_v46 = vsub.f32 %v8727_v56, %v4158_v34  ;;  %v4238_v7 = vmul.f32 1.442695, %v4203_v16 }
 0x332   :  { %4283 = vadd.xlane.f32.xlu1 %v4282_v15 }
 0x333   :  { %4286 = vadd.xlane.f32.xlu0 %v4285_v31  ;;  %v4240_v3 = vmul.f32 1.442695, %v4204_v46  ;;  %7333 = vpow2.f32 %v4238_v7 }
 0x335   :  { %v8832_v26 = vpop.eup %7329  ;;  %7335 = vpow2.f32 %v4240_v3 }
 0x336   :  { %4280 = vadd.xlane.f32.xlu1 %v4279_v60  ;;  %v4294_v29 = vsel %vm3015_vm2, %v8832_v26, 0.0  ;;  %v8838_v53 = vpop.eup %7331 }
 0x337   :  { %v4161_v52 = vpop.xlane.xlu0 %4160  ;;  %v4291_v5 = vsel %vm3015_vm2, %v8838_v53, 0.0 }
 0x338   :  { %v4205_v56 = vsub.f32 %v8731_v58, %v4161_v52 }
 0x339   :  { %v4164_v42 = vpop.xlane.xlu1 %4163 }
 0x33a   :  { %v4206_v8 = vsub.f32 %v8733_v19, %v4164_v42  ;;  %4295 = vadd.xlane.f32.xlu1 %v4294_v29  ;;  %v4242_v50 = vmul.f32 1.442695, %v4205_v56 }
 0x33b   :  { %v2136_v6 = vpop.permute.xlu0 %2135 }
 0x33c   :  { %v4244_v0 = vmul.f32 1.442695, %v4206_v8  ;;  %7337 = vpow2.f32 %v4242_v50 }
 0x33d   :  { %v2142_v63 = vpop.permute.xlu1 %2141 }
 0x33e   :  { %7339 = vpow2.f32 %v4244_v0  ;;  %4292 = vadd.xlane.f32.xlu1 %v4291_v5  ;;  %v2411_v59 = vcombine.low %v8777_v32, %v2142_v63  ;;  %v2412_v9 = vcombine.high %v8777_v32, %v2142_v63 }
 0x340   :  { %v8846_v62 = vpop.eup %7333  ;;  %v2419_v16 = vrot.slane %v2411_v59, %v7729_v54  ;;  %v2426_v31 = vrot.slane %v2412_v9, %v7729_v54 }
 0x341   :  { %v2148_v27 = vpop.permute.xlu1 %2147  ;;  %v4297_v32 = vsel %vm3015_vm2, %v8846_v62, 0.0 }
 0x342   :  { %v2427_v58 = vcombine.low %v2136_v6, %v2148_v27  ;;  %v2428_v19 = vcombine.high %v2136_v6, %v2148_v27  ;;  %v8848_v37 = vpop.eup %7335 }
 0x343   :  { %v4300_v46 = vsel %vm3015_vm2, %v8848_v37, 0.0 }
 0x344   :  { %v2435_v34 = vrot.slane %v2427_v58, %v7729_v54  ;;  %v2442_v15 = vrot.slane %v2428_v19, %v7729_v54  ;;  %4301 = vadd.xlane.f32.xlu0 %v4300_v46 }
 0x346   :  { %v2475_v7 = vcombine.low %v2419_v16, %v2435_v34  ;;  %v2476_v3 = vcombine.high %v2419_v16, %v2435_v34  ;;  %v2491_v60 = vcombine.low %v2426_v31, %v2442_v15  ;;  %v2492_v29 = vcombine.high %v2426_v31, %v2442_v15 }
 0x348   :  { %v2483_v52 = vrot.slane %v2475_v7, %v7734_v61  ;;  %v2490_v42 = vrot.slane %v2476_v3, %v7734_v61  ;;  %v2499_v56 = vrot.slane %v2491_v60, %v7734_v61  ;;  %v2506_v8 = vrot.slane %v2492_v29, %v7734_v61  ;;  %4298 = vadd.xlane.f32.xlu0 %v4297_v32 }
 0x349   :  { %v8862_v50 = vpop.eup %7337 }
 0x34a   :  { %v6681_v5 = vcombine.low %v2483_v52, %v2490_v42  ;;  %v6683_v0 = vcombine.high %v2483_v52, %v2490_v42  ;;  %v6685_v63 = vcombine.low %v2499_v56, %v2506_v8  ;;  %v6687_v59 = vcombine.high %v2499_v56, %v2506_v8 }
 0x34b   :  { %v8864_v6 = vpop.eup %7339  ;;  %v4303_v9 = vsel %vm3015_vm2, %v8862_v50, 0.0 }
 0x34c   :  { %v2802_v27 = vrot.slane %v6681_v5, %v7729_v54  ;;  %v2818_v58 = vrot.slane %v6683_v0, %v7729_v54  ;;  %v2834_v19 = vrot.slane %v6685_v63, %v7729_v54  ;;  %v2850_v16 = vrot.slane %v6687_v59, %v7729_v54  ;;  %4304 = vadd.xlane.f32.xlu1 %v4303_v9 }
 0x34d   :  { %v4306_v31 = vsel %vm3015_vm2, %v8864_v6, 0.0 }
 0x34e   :  { %4307 = vadd.xlane.f32.xlu0 %v4306_v31  ;;  %v2867_v34 = vcombine.low %v2802_v27, %v2818_v58  ;;  %v2899_v15 = vcombine.low %v2834_v19, %v2850_v16  ;;  %v2868_v46 = vcombine.high %v2802_v27, %v2818_v58  ;;  %v2900_v32 = vcombine.high %v2834_v19, %v2850_v16 }
 0x350   :  { %v2875_v7 = vrot.slane %v2867_v34, %v7734_v61  ;;  %v2907_v3 = vrot.slane %v2899_v15, %v7734_v61  ;;  %v2882_v60 = vrot.slane %v2868_v46, %v7734_v61  ;;  %v2914_v29 = vrot.slane %v2900_v32, %v7734_v61 }
 0x352   :  { %v8878_v52 = vcombine.low %v2875_v7, %v2907_v3  ;;  %v8880_v42 = vcombine.high %v2875_v7, %v2907_v3  ;;  %v8882_v56 = vcombine.low %v2882_v60, %v2914_v29  ;;  %v8884_v8 = vcombine.high %v2882_v60, %v2914_v29 }
 0x36c   :  { %v4167_v5 = vpop.xlane.xlu0 %4166 }
 0x36d   :  { %v4207_v0 = vsub.f32 %v8739_v40, %v4167_v5 }
 0x36f   :  { %v4246_v63 = vmul.f32 1.442695, %v4207_v0 }
 0x370   :  { %v4173_v59 = vpop.xlane.xlu0 %4172 }
 0x371   :  { %7341 = vpow2.f32 %v4246_v63  ;;  %v4209_v19 = vsub.f32 %v8743_v33, %v4173_v59 }
 0x372   :  { %v4170_v9 = vpop.xlane.xlu1 %4169 }
 0x373   :  { %v4208_v27 = vsub.f32 %v8741_v4, %v4170_v9  ;;  %v4250_v32 = vmul.f32 1.442695, %v4209_v19 }
 0x374   :  { %v4179_v16 = vpop.xlane.xlu0 %4178 }
 0x375   :  { %v4248_v58 = vmul.f32 1.442695, %v4208_v27  ;;  %v4211_v34 = vsub.f32 %v8753_v41, %v4179_v16 }
 0x376   :  { %v4176_v31 = vpop.xlane.xlu1 %4175 }
 0x377   :  { %7343 = vpow2.f32 %v4248_v58  ;;  %v4210_v15 = vsub.f32 %v8747_v38, %v4176_v31  ;;  %v4254_v46 = vmul.f32 1.442695, %v4211_v34  ;;  %v2994_v31 = vpack.c.bf16 %v8615_v39, %v8615_v39 }
 0x378   :  { %v4185_v0 = vpop.xlane.xlu0 %4184 }
 0x379   :  { %v4252_v7 = vmul.f32 1.442695, %v4210_v15  ;;  %7345 = vpow2.f32 %v4254_v46 }
 0x37a   :  { %v8918_v34 = vpop.permute.xlu1 %2153 }
 0x37b   :  { %7347 = vpow2.f32 %v4252_v7  ;;  %v4213_v7 = vsub.f32 %v8757_v18, %v4185_v0  ;;  %v2996_v18 = vpack.c.bf16 %v8671_v24, %v8671_v24 }
 0x37c   :  { %7349 = vpow2.f32 %v4250_v32  ;;  %v4191_v59 = vpop.xlane.xlu0 %4190  ;;  %v4551_v32 = vsel %vm4411_vm3, %v2994_v31, 0 }
 0x37d   :  { %v4215_v46 = vsub.f32 %v8761_v14, %v4191_v59 }
 0x37e   :  { %v8891_v40 = vpop.eup %7341 }
 0x37f   :  { %v4309_v4 = vsel %vm3015_vm2, %v8891_v40, 0.0 }
 0x380   :  { %4310 = vadd.xlane.f32.xlu1 %v4309_v4 }
 0x384   :  { %v8895_v33 = vpop.eup %7343 }
 0x385   :  { %v4312_v41 = vsel %vm3015_vm2, %v8895_v33, 0.0 }
 0x386   :  { %4313 = vadd.xlane.f32.xlu0 %v4312_v41  ;;  %v8899_v3 = vpop.eup %7345  ;;  %v4258_v41 = vmul.f32 1.442695, %v4213_v7 }
 0x387   :  { %v4321_v60 = vsel %vm3015_vm2, %v8899_v3, 0.0 }
 0x388   :  { %v8901_v38 = vpop.eup %7347  ;;  %4322 = vadd.xlane.f32.xlu1 %v4321_v60 }
 0x389   :  { %v4318_v29 = vsel %vm3015_vm2, %v8901_v38, 0.0  ;;  %v8907_v5 = vpop.eup %7349 }
 0x38a   :  { %4319 = vadd.xlane.f32.xlu0 %v4318_v29  ;;  %v4315_v63 = vsel %vm3015_vm2, %v8907_v5, 0.0 }
 0x38e   :  { %4316 = vadd.xlane.f32.xlu0 %v4315_v63 }
 0x395   :  { %v4269_v9 = vpop.xlane.xlu0 %4268 }
 0x396   :  { %7351 = vrcp.f32 %v4269_v9 }
 0x399   :  { %2165 = vrot.lane.b32.xlu1 %v7718_v45, %s7519_s20 }
 0x39d   :  { %2171 = vrot.lane.b32.xlu1 %v7718_v45, %s7520_s21 }
 0x39e   :  { %v4278_v27 = vpop.xlane.xlu0 %4277 }
 0x3a2   :  { %v4275_v58 = vpop.xlane.xlu0 %4274 }
 0x3a3   :  { %7353 = vrcp.f32 %v4275_v58  ;;  %v7352_v19 = vpop.eup %7351 }
 0x3a4   :  { %v4361_v16 = vmul.f32 %v7352_v19, %v8784_v2  ;;  %v4262_v2 = vmul.f32 1.442695, %v4215_v46 }
 0x3a6   :  { %v4385_v15 = vpack.c.bf16 %v4361_v16, %v4361_v16 }
 0x3a8   :  { %7047 = vmatmul.mubr.msk.bf16.vlgmr.msra.gmra.mxu1 %vm3015_vm2, %v4385_v15 }
 0x3a9   :  { %7057 = vmatpush3.bf16.msra.mxu1 %v4551_v32  ;;  %7058 = vmatprep.mubr.msk.bf16.mxu1 %vm7510_vm0, %v7509_v1 }
 0x3aa   :  { %7068 = vmatprep.subr.bf16.mxu1 %v7509_v1 }
 0x3ab   :  { %v4182_v4 = vpop.xlane.xlu1 %4181 }
 0x3ac   :  { %v4212_v39 = vsub.f32 %v8755_v17, %v4182_v4  ;;  %v4643_v17 = vsel %vm4411_vm3, %v2996_v18, 0 }
 0x3ae   :  { %v4256_v60 = vmul.f32 1.442695, %v4212_v39 }
 0x3af   :  { %v8928_v29 = vpop.xlane.xlu1 %4187 }
 0x3b0   :  { %v7354_v14 = vpop.eup %7353  ;;  %7355 = vpow2.f32 %v4256_v60 }
 0x3b1   :  { %7357 = vpow2.f32 %v4262_v2  ;;  %v4363_v63 = vmul.f32 %v7354_v14, %v8794_v47  ;;  %v2993_v2 = vpack.c.bf16 %v8617_v49, %v8617_v49  ;;  %v2995_v49 = vpack.c.bf16 %v8673_v22, %v8673_v22 }
 0x3b2   :  { %7359 = vpow2.f32 %v4258_v41 }
 0x3b3   :  { %v4266_v0 = vpop.xlane.xlu1 %4265  ;;  %v4387_v59 = vpack.c.bf16 %v4363_v63, %v4363_v63 }
 0x3b4   :  { %7361 = vrcp.f32 %v4266_v0 }
 0x3b5   :  { %7059 = vmatmul.mubr.msk.bf16.vlgmr.msra.gmra.mxu1 %vm3015_vm2, %v4387_v59 }
 0x3b6   :  { %7069 = vmatpush3.bf16.msra.mxu1 %v4643_v17  ;;  %7070 = vmatprep.mubr.msk.bf16.mxu1 %vm7510_vm0, %v7509_v1 }
 0x3b7   :  { %v4272_v9 = vpop.xlane.xlu1 %4271  ;;  %7080 = vmatprep.subr.bf16.mxu1 %v7509_v1 }
 0x3b8   :  { %7363 = vrcp.f32 %v4272_v9  ;;  %v4290_v58 = vpop.xlane.xlu0 %4289 }
 0x3bb   :  { %v4284_v47 = vpop.xlane.xlu1 %4283 }
 0x3bc   :  { %v4287_v46 = vpop.xlane.xlu0 %4286 }
 0x3bd   :  { %v8938_v19 = vpop.eup %7355 }
 0x3be   :  { %v8940_v24 = vpop.eup %7357  ;;  %v4324_v16 = vsel %vm3015_vm2, %v8938_v19, 0.0 }
 0x3bf   :  { %v8944_v31 = vpop.eup %7359  ;;  %4325 = vadd.xlane.f32.xlu0 %v4324_v16  ;;  %v4281_v15 = vpop.xlane.xlu1 %4280  ;;  %v4333_v32 = vsel %vm3015_vm2, %v8940_v24, 0.0  ;;  %v2998_v16 = vpack.c.bf16 %v8675_v55, %v8675_v55 }
 0x3c0   :  { %7365 = vrcp.f32 %v4281_v15  ;;  %v4327_v4 = vsel %vm3015_vm2, %v8944_v31, 0.0 }
 0x3c1   :  { %7367 = vrcp.f32 %v4278_v27  ;;  %v7362_v7 = vpop.eup %7361  ;;  %4334 = vadd.xlane.f32.xlu1 %v4333_v32  ;;  %v4505_v27 = vsel %vm4411_vm3, %v2993_v2, 0  ;;  %v4735_v55 = vsel %vm4411_vm3, %v2998_v16, 0  ;;  %v3003_v16 = vpack.c.bf16 %v8627_v43, %v8627_v43 }
 0x3c2   :  { %v4360_v39 = vmul.f32 %v7362_v7, %v8808_v48  ;;  %7369 = vrcp.f32 %v4287_v46 }
 0x3c3   :  { %4328 = vadd.xlane.f32.xlu0 %v4327_v4  ;;  %v4296_v41 = vpop.xlane.xlu1 %4295  ;;  %7371 = vrcp.f32 %v4284_v47  ;;  %v4597_v47 = vsel %vm4411_vm3, %v2995_v49, 0 }
 0x3c4   :  { %v4384_v60 = vpack.c.bf16 %v4360_v39, %v4360_v39 }
 0x3c5   :  { %v7364_v14 = vpop.eup %7363 }
 0x3c6   :  { %7041 = vmatmul.mubr.msk.bf16.vlgmr.msra.gmra.mxu0 %vm3015_vm2, %v4384_v60  ;;  %v4362_v48 = vmul.f32 %v7364_v14, %v8812_v35  ;;  %v2999_v60 = vpack.c.bf16 %v8681_v51, %v8681_v51 }
 0x3c7   :  { %7051 = vmatpush3.bf16.msra.mxu0 %v4505_v27  ;;  %7052 = vmatprep.mubr.msk.bf16.mxu0 %vm7510_vm0, %v7509_v1  ;;  %v4293_v63 = vpop.xlane.xlu1 %4292  ;;  %v4214_v27 = vsub.f32 %v8759_v21, %v8928_v29  ;;  %v3001_v29 = vpack.c.bf16 %v8685_v30, %v8685_v30 }
 0x3c8   :  { %7062 = vmatprep.subr.bf16.mxu0 %v7509_v1  ;;  %7373 = vrcp.f32 %v4293_v63  ;;  %v4386_v0 = vpack.c.bf16 %v4362_v48, %v4362_v48  ;;  %v4781_v51 = vsel %vm4411_vm3, %v2999_v60, 0  ;;  %v3008_v60 = vpack.c.bf16 %v8880_v42, %v8880_v42 }
 0x3c9   :  { %7375 = vrcp.f32 %v4290_v58  ;;  %v4260_v21 = vmul.f32 1.442695, %v4214_v27  ;;  %v3009_v27 = vpack.c.bf16 %v8882_v56, %v8882_v56 }
 0x3cd   :  { %v7366_v18 = vpop.eup %7365  ;;  %v4302_v17 = vpop.xlane.xlu0 %4301 }
 0x3ce   :  { %v7368_v59 = vpop.eup %7367  ;;  %v4365_v9 = vmul.f32 %v7366_v18, %v8829_v44  ;;  %7053 = vmatmul.mubr.msk.bf16.vlgmr.msra.gmra.mxu0 %vm3015_vm2, %v4386_v0  ;;  %v2997_v44 = vpack.c.bf16 %v8677_v23, %v8677_v23 }
 0x3cf   :  { %7063 = vmatpush3.bf16.msra.mxu0 %v4597_v47  ;;  %7064 = vmatprep.mubr.msk.bf16.mxu0 %vm7510_vm0, %v7509_v1  ;;  %v7370_v22 = vpop.eup %7369  ;;  %v4364_v35 = vmul.f32 %v7368_v59, %v8789_v11  ;;  %v3000_v11 = vpack.c.bf16 %v8679_v28, %v8679_v28 }
 0x3d0   :  { %v4389_v15 = vpack.c.bf16 %v4365_v9, %v4365_v9  ;;  %7074 = vmatprep.subr.bf16.mxu0 %v7509_v1  ;;  %v4367_v58 = vmul.f32 %v7370_v22, %v8814_v10  ;;  %v7372_v7 = vpop.eup %7371  ;;  %v4689_v4 = vsel %vm4411_vm3, %v2997_v44, 0 }
 0x3d1   :  { %v4299_v46 = vpop.xlane.xlu0 %4298  ;;  %v4388_v32 = vpack.c.bf16 %v4364_v35, %v4364_v35  ;;  %v4366_v2 = vmul.f32 %v7372_v7, %v8820_v25  ;;  %v4827_v28 = vsel %vm4411_vm3, %v3000_v11, 0  ;;  %v3002_v25 = vpack.c.bf16 %v8683_v12, %v8683_v12 }
 0x3d2   :  { %7071 = vmatmul.mubr.msk.bf16.vlgmr.msra.gmra.mxu1 %vm3015_vm2, %v4389_v15  ;;  %7377 = vrcp.f32 %v4299_v46  ;;  %v4391_v39 = vpack.c.bf16 %v4367_v58, %v4367_v58  ;;  %v4965_v35 = vsel %vm4411_vm3, %v3003_v16, 0  ;;  %v3007_v7 = vpack.c.bf16 %v8878_v52, %v8878_v52 }
 0x3d3   :  { %7081 = vmatpush3.bf16.msra.mxu1 %v4735_v55  ;;  %7082 = vmatprep.mubr.msk.bf16.mxu1 %vm7510_vm0, %v7509_v1  ;;  %7379 = vrcp.f32 %v4296_v41  ;;  %v4390_v41 = vpack.c.bf16 %v4366_v2, %v4366_v2  ;;  %v4919_v12 = vsel %vm4411_vm3, %v3002_v25, 0 }
 0x3d4   :  { %7092 = vmatprep.subr.bf16.mxu1 %v7509_v1 }
 0x3d5   :  { %v7374_v23 = vpop.eup %7373  ;;  %v4305_v10 = vpop.xlane.xlu1 %4304 }
 0x3d6   :  { %7065 = vmatmul.mubr.msk.bf16.vlgmr.msra.gmra.mxu0 %vm3015_vm2, %v4388_v32  ;;  %7381 = vrcp.f32 %v4305_v10  ;;  %v7376_v14 = vpop.eup %7375 }
 0x3d7   :  { %7075 = vmatpush3.bf16.msra.mxu0 %v4689_v4  ;;  %7076 = vmatprep.mubr.msk.bf16.mxu0 %vm7510_vm0, %v7509_v1  ;;  %7383 = vrcp.f32 %v4302_v17  ;;  %v4308_v59 = vpop.xlane.xlu0 %4307  ;;  %v4873_v17 = vsel %vm4411_vm3, %v3001_v29, 0  ;;  %v5149_v4 = vsel %vm4411_vm3, %v3007_v7, 0 }
 0x3d8   :  { %7086 = vmatprep.subr.bf16.mxu0 %v7509_v1  ;;  %7385 = vpow2.f32 %v4260_v21 }
 0x3d9   :  { %2159 = vrot.lane.b32.xlu0 %v7718_v45, %s7518_s19  ;;  %v4369_v45 = vmul.f32 %v7374_v23, %v8838_v53  ;;  %v4368_v53 = vmul.f32 %v7376_v14, %v8816_v20  ;;  %v3004_v20 = vpack.c.bf16 %v8625_v57, %v8625_v57  ;;  %7387 = vrcp.f32 %v4308_v59 }
 0x3da   :  { %7083 = vmatmul.mubr.msk.bf16.vlgmr.msra.gmra.mxu1 %vm3015_vm2, %v4391_v39  ;;  %v5195_v14 = vsel %vm4411_vm3, %v3008_v60, 0 }
 0x3db   :  { %7093 = vmatpush3.bf16.msra.mxu1 %v4827_v28  ;;  %7094 = vmatprep.mubr.msk.bf16.mxu1 %vm7510_vm0, %v7509_v1  ;;  %v4393_v63 = vpack.c.bf16 %v4369_v45, %v4369_v45  ;;  %v4392_v18 = vpack.c.bf16 %v4368_v53, %v4368_v53  ;;  %v5011_v57 = vsel %vm4411_vm3, %v3004_v20, 0 }
 0x3dc   :  { %7104 = vmatprep.subr.bf16.mxu1 %v7509_v1 }
 0x3de   :  { %7077 = vmatmul.mubr.msk.bf16.vlgmr.msra.gmra.mxu0 %vm3015_vm2, %v4390_v41 }
 0x3df   :  { %7087 = vmatpush3.bf16.msra.mxu0 %v4781_v51  ;;  %7088 = vmatprep.mubr.msk.bf16.mxu0 %vm7510_vm0, %v7509_v1  ;;  %v7378_v48 = vpop.eup %7377  ;;  %v5241_v51 = vsel %vm4411_vm3, %v3009_v27, 0 }
 0x3e0   :  { %7098 = vmatprep.subr.bf16.mxu0 %v7509_v1  ;;  %v4371_v49 = vmul.f32 %v7378_v48, %v8846_v62  ;;  %v7380_v0 = vpop.eup %7379  ;;  %v3010_v48 = vpack.c.bf16 %v8884_v8, %v8884_v8 }
 0x3e1   :  { %v4370_v62 = vmul.f32 %v7380_v0, %v8832_v26  ;;  %v3006_v26 = vpack.c.bf16 %v8629_v36, %v8629_v36  ;;  %v3005_v36 = vpack.c.bf16 %v8631_v13, %v8631_v13 }
 0x3e2   :  { %7095 = vmatmul.mubr.msk.bf16.vlgmr.msra.gmra.mxu1 %vm3015_vm2, %v4393_v63  ;;  %v4395_v30 = vpack.c.bf16 %v4371_v49, %v4371_v49  ;;  %v5287_v29 = vsel %vm4411_vm3, %v3010_v48, 0 }
 0x3e3   :  { %7105 = vmatpush3.bf16.msra.mxu1 %v4919_v12  ;;  %7106 = vmatprep.mubr.msk.bf16.mxu1 %vm7510_vm0, %v7509_v1  ;;  %v7382_v9 = vpop.eup %7381  ;;  %v4394_v15 = vpack.c.bf16 %v4370_v62, %v4370_v62 }
 0x3e4   :  { %7116 = vmatprep.subr.bf16.mxu1 %v7509_v1  ;;  %v4373_v47 = vmul.f32 %v7382_v9, %v8862_v50  ;;  %v7384_v22 = vpop.eup %7383  ;;  %v5103_v50 = vsel %vm4411_vm3, %v3006_v26, 0 }
 0x3e5   :  { %v4372_v43 = vmul.f32 %v7384_v22, %v8848_v37  ;;  %v9044_v55 = vpop.eup %7385  ;;  %v5057_v37 = vsel %vm4411_vm3, %v3005_v36, 0 }
 0x3e6   :  { %7089 = vmatmul.mubr.msk.bf16.vlgmr.msra.gmra.mxu0 %vm3015_vm2, %v4392_v18  ;;  %v4397_v46 = vpack.c.bf16 %v4373_v47, %v4373_v47  ;;  %v7388_v58 = vpop.eup %7387  ;;  %v4330_v32 = vsel %vm3015_vm2, %v9044_v55, 0.0 }
 0x3e7   :  { %7099 = vmatpush3.bf16.msra.mxu0 %v4873_v17  ;;  %7100 = vmatprep.mubr.msk.bf16.mxu0 %vm7510_vm0, %v7509_v1  ;;  %v4396_v44 = vpack.c.bf16 %v4372_v43, %v4372_v43  ;;  %v4374_v13 = vmul.f32 %v7388_v58, %v8864_v6 }
 0x3e8   :  { %7110 = vmatprep.subr.bf16.mxu0 %v7509_v1 }
 0x3e9   :  { %v4398_v11 = vpack.c.bf16 %v4374_v13, %v4374_v13 }
 0x3ea   :  { %7107 = vmatmul.mubr.msk.bf16.vlgmr.msra.gmra.mxu1 %vm3015_vm2, %v4395_v30 }
 0x3eb   :  { %7117 = vmatpush3.bf16.msra.mxu1 %v5011_v57  ;;  %7118 = vmatprep.mubr.msk.bf16.mxu1 %vm7510_vm0, %v7509_v1 }
 0x3ec   :  { %7128 = vmatprep.subr.bf16.mxu1 %v7509_v1 }
 0x3ee   :  { %7101 = vmatmul.mubr.msk.bf16.vlgmr.msra.gmra.mxu0 %vm3015_vm2, %v4394_v15 }
 0x3ef   :  { %7111 = vmatpush3.bf16.msra.mxu0 %v4965_v35  ;;  %7112 = vmatprep.mubr.msk.bf16.mxu0 %vm7510_vm0, %v7509_v1 }
 0x3f0   :  { %7122 = vmatprep.subr.bf16.mxu0 %v7509_v1 }
 0x3f2   :  { %7119 = vmatmul.mubr.msk.bf16.vlgmr.msra.gmra.mxu1 %vm3015_vm2, %v4397_v46 }
 0x3f3   :  { %7129 = vmatpush3.bf16.msra.mxu1 %v5103_v50  ;;  %7130 = vmatprep.mubr.msk.bf16.mxu1 %vm7510_vm0, %v7509_v1 }
 0x3f4   :  { %7140 = vmatprep.subr.bf16.mxu1 %v7509_v1 }
 0x3f6   :  { %7113 = vmatmul.mubr.msk.bf16.vlgmr.msra.gmra.mxu0 %vm3015_vm2, %v4396_v44 }
 0x3f7   :  { %7123 = vmatpush3.bf16.msra.mxu0 %v5057_v37  ;;  %7124 = vmatprep.mubr.msk.bf16.mxu0 %vm7510_vm0, %v7509_v1 }
 0x3f8   :  { %4331 = vadd.xlane.f32.xlu0 %v4330_v32  ;;  %7134 = vmatprep.subr.bf16.mxu0 %v7509_v1 }
 0x3fe   :  { %7125 = vmatmul.mubr.msk.bf16.vlgmr.msra.gmra.mxu0 %vm3015_vm2, %v4398_v11 }
 0x3ff   :  { %7135 = vmatpush3.bf16.msra.mxu0 %v5149_v4  ;;  %7136 = vmatprep.mubr.msk.bf16.mxu0 %vm7510_vm0, %v7509_v1 }
 0x400   :  { %7146 = vmatprep.subr.bf16.mxu0 %v7509_v1 }
 0x409   :  { %v4311_v39 = vpop.xlane.xlu1 %4310 }
 0x40a   :  { %7389 = vrcp.f32 %v4311_v39 }
 0x40f   :  { %v4314_v23 = vpop.xlane.xlu0 %4313 }
 0x410   :  { %7391 = vrcp.f32 %v4314_v23 }
 0x411   :  { %v4323_v52 = vpop.xlane.xlu1 %4322 }
 0x413   :  { %v4320_v10 = vpop.xlane.xlu0 %4319 }
 0x414   :  { %7393 = vrcp.f32 %v4320_v10 }
 0x415   :  { %v2166_v49 = vpop.permute.xlu1 %2165 }
 0x416   :  { %v2515_v0 = vcombine.low %v8918_v34, %v2166_v49  ;;  %v2516_v59 = vcombine.high %v8918_v34, %v2166_v49 }
 0x417   :  { %v4317_v6 = vpop.xlane.xlu0 %4316  ;;  %v7390_v2 = vpop.eup %7389 }
 0x418   :  { %7395 = vrcp.f32 %v4317_v6  ;;  %v4375_v28 = vmul.f32 %v7390_v2, %v8891_v40  ;;  %v2523_v9 = vrot.slane %v2515_v0, %v7729_v54  ;;  %v2530_v62 = vrot.slane %v2516_v59, %v7729_v54 }
 0x419   :  { %7397 = vrcp.f32 %v4323_v52  ;;  %v2172_v20 = vpop.permute.xlu1 %2171 }
 0x41a   :  { %v4399_v45 = vpack.c.bf16 %v4375_v28, %v4375_v28 }
 0x41c   :  { %7131 = vmatmul.mubr.msk.bf16.vlgmr.msra.gmra.mxu1 %vm3015_vm2, %v4399_v45 }
 0x41d   :  { %v7392_v41 = vpop.eup %7391  ;;  %7141 = vmatpush3.bf16.msra.mxu1 %v5195_v14  ;;  %7142 = vmatprep.mubr.msk.bf16.mxu1 %vm7510_vm0, %v7509_v1 }
 0x41e   :  { %v4376_v25 = vmul.f32 %v7392_v41, %v8895_v33  ;;  %7152 = vmatprep.subr.bf16.mxu1 %v7509_v1 }
 0x420   :  { %v4400_v40 = vpack.c.bf16 %v4376_v25, %v4376_v25 }
 0x421   :  { %v7394_v42 = vpop.eup %7393 }
 0x422   :  { %7137 = vmatmul.mubr.msk.bf16.vlgmr.msra.gmra.mxu0 %vm3015_vm2, %v4400_v40  ;;  %v4378_v33 = vmul.f32 %v7394_v42, %v8901_v38 }
 0x423   :  { %7147 = vmatpush3.bf16.msra.mxu0 %v5241_v51  ;;  %7148 = vmatprep.mubr.msk.bf16.mxu0 %vm7510_vm0, %v7509_v1 }
 0x424   :  { %7158 = vmatprep.subr.bf16.mxu0 %v7509_v1  ;;  %v4402_v12 = vpack.c.bf16 %v4378_v33, %v4378_v33 }
 0x425   :  { %v7396_v56 = vpop.eup %7395 }
 0x426   :  { %v4377_v63 = vmul.f32 %v7396_v56, %v8907_v5  ;;  %v7398_v21 = vpop.eup %7397 }
 0x427   :  { %v4379_v38 = vmul.f32 %v7398_v21, %v8899_v3 }
 0x428   :  { %v4401_v53 = vpack.c.bf16 %v4377_v63, %v4377_v63 }
 0x429   :  { %v4403_v8 = vpack.c.bf16 %v4379_v38, %v4379_v38 }
 0x42a   :  { %7143 = vmatmul.mubr.msk.bf16.vlgmr.msra.gmra.mxu1 %vm3015_vm2, %v4401_v53  ;;  %7149 = vmatmul.mubr.msk.bf16.vlgmr.msra.gmra.mxu0 %vm3015_vm2, %v4402_v12 }
 0x42b   :  { %7153 = vmatpush3.bf16.msra.mxu1 %v5287_v29  ;;  %7154 = vmatprep.mubr.msk.bf16.mxu1 %vm7510_vm0, %v7509_v1 }
 0x42c   :  { %7164 = vmatprep.subr.bf16.mxu1 %v7509_v1  ;;  %7160 = vmatprep.mubr.msk.bf16.mxu0 %vm7510_vm0, %v7509_v1 }
 0x432   :  { %7155 = vmatmul.mubr.msk.bf16.vlgmr.msra.gmra.mxu1 %vm3015_vm2, %v4403_v8 }
 0x433   :  { %7166 = vmatprep.mubr.msk.bf16.mxu1 %vm7510_vm0, %v7509_v1 }
 0x448   :  { %v4326_v5 = vpop.xlane.xlu0 %4325 }
 0x449   :  { %7399 = vrcp.f32 %v4326_v5 }
 0x44a   :  { %v4335_v50 = vpop.xlane.xlu1 %4334 }
 0x44c   :  { %v4329_v18 = vpop.xlane.xlu0 %4328 }
 0x44d   :  { %7401 = vrcp.f32 %v4329_v18 }
 0x44e   :  { %7403 = vrcp.f32 %v4335_v50 }
 0x450   :  { %v2160_v3 = vpop.permute.xlu0 %2159 }
 0x451   :  { %v2531_v17 = vcombine.low %v2160_v3, %v2172_v20  ;;  %v2532_v30 = vcombine.high %v2160_v3, %v2172_v20 }
 0x453   :  { %v2539_v57 = vrot.slane %v2531_v17, %v7729_v54  ;;  %v2546_v16 = vrot.slane %v2532_v30, %v7729_v54 }
 0x455   :  { %v2547_v47 = vcombine.low %v2523_v9, %v2539_v57  ;;  %v2548_v15 = vcombine.high %v2523_v9, %v2539_v57  ;;  %v2563_v22 = vcombine.low %v2530_v62, %v2546_v16  ;;  %v2564_v26 = vcombine.high %v2530_v62, %v2546_v16 }
 0x456   :  { %v7400_v6 = vpop.eup %7399 }
 0x457   :  { %v2555_v34 = vrot.slane %v2547_v47, %v7734_v61  ;;  %v2562_v35 = vrot.slane %v2548_v15, %v7734_v61  ;;  %v2571_v46 = vrot.slane %v2563_v22, %v7734_v61  ;;  %v2578_v43 = vrot.slane %v2564_v26, %v7734_v61 }
 0x458   :  { %v4380_v51 = vmul.f32 %v7400_v6, %v8938_v19 }
 0x459   :  { %v2923_v36 = vcombine.low %v2555_v34, %v2562_v35  ;;  %v6688_v44 = vcombine.high %v2555_v34, %v2562_v35  ;;  %v2939_v58 = vcombine.low %v2571_v46, %v2578_v43  ;;  %v6689_v37 = vcombine.high %v2571_v46, %v2578_v43 }
 0x45a   :  { %v7402_v45 = vpop.eup %7401  ;;  %v4404_v21 = vpack.c.bf16 %v4380_v51, %v4380_v51 }
 0x45b   :  { %v2930_v32 = vrot.slane %v2923_v36, %v7729_v54  ;;  %v2938_v13 = vrot.slane %v6688_v44, %v7729_v54  ;;  %v2946_v7 = vrot.slane %v2939_v58, %v7729_v54  ;;  %v2954_v11 = vrot.slane %v6689_v37, %v7729_v54  ;;  %v7404_v12 = vpop.eup %7403 }
 0x45c   :  { %v4381_v33 = vmul.f32 %v7402_v45, %v8944_v31  ;;  %v4383_v8 = vmul.f32 %v7404_v12, %v8940_v24 }
 0x45d   :  { %v2955_v4 = vcombine.low %v2930_v32, %v2938_v13  ;;  %v2971_v39 = vcombine.low %v2946_v7, %v2954_v11  ;;  %v2956_v23 = vcombine.high %v2930_v32, %v2938_v13  ;;  %v2972_v10 = vcombine.high %v2946_v7, %v2954_v11 }
 0x45e   :  { %v4405_v29 = vpack.c.bf16 %v4381_v33, %v4381_v33  ;;  %v4407_v18 = vpack.c.bf16 %v4383_v8, %v4383_v8 }
 0x45f   :  { %v2963_v2 = vrot.slane %v2955_v4, %v7734_v61  ;;  %v2979_v52 = vrot.slane %v2971_v39, %v7734_v61  ;;  %v2970_v28 = vrot.slane %v2956_v23, %v7734_v61  ;;  %v2986_v60 = vrot.slane %v2972_v10, %v7734_v61 }
 0x461   :  { %v2987_v41 = vcombine.low %v2963_v2, %v2979_v52  ;;  %v2988_v14 = vcombine.high %v2963_v2, %v2979_v52  ;;  %v2989_v25 = vcombine.low %v2970_v28, %v2986_v60  ;;  %v2990_v27 = vcombine.high %v2970_v28, %v2986_v60 }
 0x463   :  { %v3011_v40 = vpack.c.bf16 %v2987_v41, %v2987_v41  ;;  %v3012_v42 = vpack.c.bf16 %v2988_v14, %v2988_v14  ;;  %v3013_v48 = vpack.c.bf16 %v2989_v25, %v2989_v25  ;;  %v3014_v53 = vpack.c.bf16 %v2990_v27, %v2990_v27 }
 0x465   :  { %v5333_v56 = vsel %vm4411_vm3, %v3011_v40, 0  ;;  %v5379_v63 = vsel %vm4411_vm3, %v3012_v42, 0  ;;  %v5425_v19 = vsel %vm4411_vm3, %v3013_v48, 0  ;;  %v5471_v31 = vsel %vm4411_vm3, %v3014_v53, 0 }
 0x466   :  { %7159 = vmatpush3.bf16.msra.mxu0 %v5333_v56  ;;  %7165 = vmatpush3.bf16.msra.mxu1 %v5379_v63 }
 0x467   :  { %7170 = vmatprep.subr.bf16.mxu0 %v7509_v1  ;;  %7176 = vmatprep.subr.bf16.mxu1 %v7509_v1 }
 0x468   :  { %v4495_v38 = vpop.f32.mrf.mxu1 }
 0x469   :  { %7161 = vmatmul.mubr.msk.bf16.vlgmr.msra.gmra.mxu0 %vm3015_vm2, %v4404_v21  ;;  %7167 = vmatmul.mubr.msk.bf16.vlgmr.msra.gmra.mxu1 %vm3015_vm2, %v4405_v29 }
 0x46a   :  { %7171 = vmatpush3.bf16.msra.mxu0 %v5425_v19  ;;  %7177 = vmatpush3.bf16.msra.mxu1 %v5471_v31  ;;  %v7048_v5 = vpop.f32.mrf.mxu1 }
 0x46b   :  { %7178 = vmatprep.mubr.msk.bf16.mxu1 %vm7510_vm0, %v7509_v1  ;;  %7172 = vmatprep.mubr.msk.bf16.mxu0 %vm7510_vm0, %v7509_v1 }
 0x46c   :  { %7182 = vmatprep.subr.bf16.mxu0 %v7509_v1  ;;  %v4498_v49 = vpop.f32.mrf.mxu1 }
 0x46e   :  { %v7049_v0 = vpop.f32.mrf.mxu1 }
 0x471   :  { %7179 = vmatmul.mubr.msk.bf16.vlgmr.msra.gmra.mxu1 %vm3015_vm2, %v4407_v18 }
 0x475   :  { %v4587_v59 = vpop.f32.mrf.mxu1 }
 0x476   :  { %v5529_v20 = vcombine.low %v4495_v38, %v4587_v59  ;;  %v5530_v3 = vcombine.high %v4495_v38, %v4587_v59 }
 0x477   :  { %v7060_v17 = vpop.f32.mrf.mxu1 }
 0x478   :  { %v5537_v46 = vrot.slane %v5529_v20, %v7729_v54  ;;  %v5544_v50 = vrot.slane %v5530_v3, %v7729_v54 }
 0x479   :  { %v4590_v30 = vpop.f32.mrf.mxu1 }
 0x47b   :  { %v7061_v9 = vpop.f32.mrf.mxu1 }
 0x481   :  { %v4332_v62 = vpop.xlane.xlu0 %4331 }
 0x482   :  { %7405 = vrcp.f32 %v4332_v62 }
 0x486   :  { %v4449_v24 = vpop.f32.mrf.mxu0 }
 0x488   :  { %v7042_v57 = vpop.f32.mrf.mxu0 }
 0x48a   :  { %v4452_v16 = vpop.f32.mrf.mxu0 }
 0x48c   :  { %v7043_v47 = vpop.f32.mrf.mxu0 }
 0x48e   :  { %v4541_v22 = vpop.f32.mrf.mxu0 }
 0x48f   :  { %v7406_v15 = vpop.eup %7405  ;;  %v5513_v26 = vcombine.low %v4449_v24, %v4541_v22  ;;  %v5514_v34 = vcombine.high %v4449_v24, %v4541_v22 }
 0x490   :  { %v4382_v35 = vmul.f32 %v7406_v15, %v9044_v55  ;;  %v7054_v43 = vpop.f32.mrf.mxu0 }
 0x491   :  { %v5521_v36 = vrot.slane %v5513_v26, %v7729_v54  ;;  %v5528_v44 = vrot.slane %v5514_v34, %v7729_v54 }
 0x492   :  { %v4679_v58 = vpop.f32.mrf.mxu1  ;;  %v4406_v37 = vpack.c.bf16 %v4382_v35, %v4382_v35  ;;  %v4544_v32 = vpop.f32.mrf.mxu0 }
 0x493   :  { %v5577_v13 = vcombine.low %v5521_v36, %v5537_v46  ;;  %v5578_v7 = vcombine.high %v5521_v36, %v5537_v46  ;;  %v5593_v11 = vcombine.low %v5528_v44, %v5544_v50  ;;  %v5594_v4 = vcombine.high %v5528_v44, %v5544_v50 }
 0x494   :  { %v7072_v39 = vpop.f32.mrf.mxu1  ;;  %7173 = vmatmul.mubr.msk.bf16.vlgmr.msra.gmra.mxu0 %vm3015_vm2, %v4406_v37  ;;  %v7055_v55 = vpop.f32.mrf.mxu0 }
 0x495   :  { %7194 = vmatprep.mubr.msk.bf16.mxu0 %vm7510_vm0, %v7509_v1  ;;  %v5585_v23 = vrot.slane %v5577_v13, %v7734_v61  ;;  %v5592_v10 = vrot.slane %v5578_v7, %v7734_v61  ;;  %v5601_v6 = vrot.slane %v5593_v11, %v7734_v61  ;;  %v5608_v2 = vrot.slane %v5594_v4, %v7734_v61 }
 0x496   :  { %v4682_v52 = vpop.f32.mrf.mxu1  ;;  %v4633_v28 = vpop.f32.mrf.mxu0 }
 0x497   :  { %v6738_v60 = vcombine.low %v5585_v23, %v5592_v10  ;;  %v6740_v45 = vcombine.high %v5585_v23, %v5592_v10  ;;  %v6742_v41 = vcombine.low %v5601_v6, %v5608_v2  ;;  %v6744_v14 = vcombine.high %v5601_v6, %v5608_v2 }
 0x498   :  { %v7073_v25 = vpop.f32.mrf.mxu1  ;;  %v7066_v27 = vpop.f32.mrf.mxu0 }
 0x499   :  { %v5929_v40 = vrot.slane %v6738_v60, %v7729_v54  ;;  %v5945_v42 = vrot.slane %v6740_v45, %v7729_v54  ;;  %v5961_v51 = vrot.slane %v6742_v41, %v7729_v54  ;;  %v5977_v33 = vrot.slane %v6744_v14, %v7729_v54 }
 0x49a   :  { %v4771_v56 = vpop.f32.mrf.mxu1  ;;  %v4636_v63 = vpop.f32.mrf.mxu0 }
 0x49b   :  { %v5561_v48 = vcombine.low %v4679_v58, %v4771_v56  ;;  %v5562_v53 = vcombine.high %v4679_v58, %v4771_v56  ;;  %v5986_v21 = vcombine.high %v5929_v40, %v5945_v42  ;;  %v6018_v29 = vcombine.high %v5961_v51, %v5977_v33 }
 0x49c   :  { %v7084_v12 = vpop.f32.mrf.mxu1  ;;  %v5985_v19 = vcombine.low %v5929_v40, %v5945_v42  ;;  %v6017_v31 = vcombine.low %v5961_v51, %v5977_v33  ;;  %v7067_v38 = vpop.f32.mrf.mxu0 }
 0x49d   :  { %v9146_v5 = vrot.slane %v5986_v21, %v7734_v61  ;;  %v9149_v49 = vrot.slane %v6018_v29, %v7734_v61  ;;  %v5569_v16 = vrot.slane %v5561_v48, %v7729_v54  ;;  %v5576_v47 = vrot.slane %v5562_v53, %v7729_v54 }
 0x49e   :  { %v4774_v8 = vpop.f32.mrf.mxu1  ;;  %v9152_v18 = vrot.slane %v5985_v19, %v7734_v61  ;;  %v9155_v0 = vrot.slane %v6017_v31, %v7734_v61  ;;  %v4725_v59 = vpop.f32.mrf.mxu0 }
 0x49f   :  { %v5545_v20 = vcombine.low %v4633_v28, %v4725_v59  ;;  %v5546_v3 = vcombine.high %v4633_v28, %v4725_v59  ;;  %v6051_v30 = vcombine.low %v9146_v5, %v9149_v49  ;;  %v6052_v57 = vcombine.high %v9146_v5, %v9149_v49 }
 0x4a0   :  { %v7085_v17 = vpop.f32.mrf.mxu1  ;;  %v6049_v9 = vcombine.low %v9152_v18, %v9155_v0  ;;  %v7078_v62 = vpop.f32.mrf.mxu0  ;;  %v6050_v24 = vcombine.high %v9152_v18, %v9155_v0 }
 0x4a1   :  { %v5553_v15 = vrot.slane %v5545_v20, %v7729_v54  ;;  %v5560_v22 = vrot.slane %v5546_v3, %v7729_v54 }
 0x4a2   :  { %v4863_v26 = vpop.f32.mrf.mxu1  ;;  %v4728_v34 = vpop.f32.mrf.mxu0 }
 0x4a3   :  { %v5609_v35 = vcombine.low %v5553_v15, %v5569_v16  ;;  %v5610_v46 = vcombine.high %v5553_v15, %v5569_v16  ;;  %v5625_v43 = vcombine.low %v5560_v22, %v5576_v47  ;;  %v5626_v50 = vcombine.high %v5560_v22, %v5576_v47 }
 0x4a4   :  { %v7096_v36 = vpop.f32.mrf.mxu1  ;;  %v7079_v44 = vpop.f32.mrf.mxu0 }
 0x4a5   :  { %v5617_v58 = vrot.slane %v5609_v35, %v7734_v61  ;;  %v5624_v37 = vrot.slane %v5610_v46, %v7734_v61  ;;  %v5633_v32 = vrot.slane %v5625_v43, %v7734_v61  ;;  %v5640_v13 = vrot.slane %v5626_v50, %v7734_v61 }
 0x4a6   :  { %v4866_v7 = vpop.f32.mrf.mxu1  ;;  %v4817_v11 = vpop.f32.mrf.mxu0 }
 0x4a7   :  { %v6739_v4 = vcombine.low %v5617_v58, %v5624_v37  ;;  %v6741_v39 = vcombine.high %v5617_v58, %v5624_v37  ;;  %v6743_v55 = vcombine.low %v5633_v32, %v5640_v13  ;;  %v6745_v23 = vcombine.high %v5633_v32, %v5640_v13 }
 0x4a8   :  { %v7097_v10 = vpop.f32.mrf.mxu1  ;;  %v7090_v6 = vpop.f32.mrf.mxu0 }
 0x4a9   :  { %v5936_v2 = vrot.slane %v6739_v4, %v7729_v54  ;;  %v5952_v52 = vrot.slane %v6741_v39, %v7729_v54  ;;  %v5968_v28 = vrot.slane %v6743_v55, %v7729_v54  ;;  %v5984_v60 = vrot.slane %v6745_v23, %v7729_v54 }
 0x4aa   :  { %v4955_v45 = vpop.f32.mrf.mxu1  ;;  %v4820_v41 = vpop.f32.mrf.mxu0 }
 0x4ab   :  { %v5665_v14 = vcombine.low %v4863_v26, %v4955_v45  ;;  %v5666_v25 = vcombine.high %v4863_v26, %v4955_v45  ;;  %v6001_v40 = vcombine.low %v5936_v2, %v5952_v52  ;;  %v6033_v42 = vcombine.low %v5968_v28, %v5984_v60 }
 0x4ac   :  { %v7108_v27 = vpop.f32.mrf.mxu1  ;;  %v6002_v51 = vcombine.high %v5936_v2, %v5952_v52  ;;  %v6034_v33 = vcombine.high %v5968_v28, %v5984_v60  ;;  %v7091_v56 = vpop.f32.mrf.mxu0 }
 0x4ad   :  { %v9178_v48 = vrot.slane %v6001_v40, %v7734_v61  ;;  %v9181_v53 = vrot.slane %v6033_v42, %v7734_v61  ;;  %v5673_v62 = vrot.slane %v5665_v14, %v7729_v54  ;;  %v5680_v16 = vrot.slane %v5666_v25, %v7729_v54 }
 0x4ae   :  { %v4958_v63 = vpop.f32.mrf.mxu1  ;;  %v9184_v12 = vrot.slane %v6002_v51, %v7734_v61  ;;  %v9187_v21 = vrot.slane %v6034_v33, %v7734_v61  ;;  %v4909_v29 = vpop.f32.mrf.mxu0 }
 0x4af   :  { %v5649_v19 = vcombine.low %v4817_v11, %v4909_v29  ;;  %v5650_v31 = vcombine.high %v4817_v11, %v4909_v29  ;;  %v6054_v8 = vcombine.high %v9178_v48, %v9181_v53  ;;  %v6053_v59 = vcombine.low %v9178_v48, %v9181_v53  ;;  %v7308_v48 = vld [vmem:[#allocation7 + $0x10] sm:$0xff]  }
 0x4b0   :  { %v7109_v38 = vpop.f32.mrf.mxu1  ;;  %v7102_v20 = vpop.f32.mrf.mxu0  ;;  %v6056_v3 = vcombine.high %v9184_v12, %v9187_v21  ;;  %v6055_v17 = vcombine.low %v9184_v12, %v9187_v21 }
 0x4b1   :  { %v5657_v47 = vrot.slane %v5649_v19, %v7729_v54  ;;  %v5664_v15 = vrot.slane %v5650_v31, %v7729_v54 }
 0x4b2   :  { %v5047_v22 = vpop.f32.mrf.mxu1  ;;  %v4912_v26 = vpop.f32.mrf.mxu0 }
 0x4b3   :  { %v5681_v34 = vcombine.low %v5657_v47, %v5673_v62  ;;  %v5682_v35 = vcombine.high %v5657_v47, %v5673_v62  ;;  %v5697_v46 = vcombine.low %v5664_v15, %v5680_v16  ;;  %v5698_v43 = vcombine.high %v5664_v15, %v5680_v16 }
 0x4b4   :  { %v7120_v50 = vpop.f32.mrf.mxu1  ;;  %v7103_v36 = vpop.f32.mrf.mxu0 }
 0x4b5   :  { %v5689_v44 = vrot.slane %v5681_v34, %v7734_v61  ;;  %v5696_v58 = vrot.slane %v5682_v35, %v7734_v61  ;;  %v5705_v37 = vrot.slane %v5697_v46, %v7734_v61  ;;  %v5712_v32 = vrot.slane %v5698_v43, %v7734_v61 }
 0x4b6   :  { %v5050_v13 = vpop.f32.mrf.mxu1  ;;  %v5001_v7 = vpop.f32.mrf.mxu0 }
 0x4b7   :  { %v6193_v11 = vcombine.low %v5689_v44, %v5696_v58  ;;  %v6754_v4 = vcombine.high %v5689_v44, %v5696_v58  ;;  %v6209_v39 = vcombine.low %v5705_v37, %v5712_v32  ;;  %v6755_v55 = vcombine.high %v5705_v37, %v5712_v32 }
 0x4b8   :  { %v7121_v23 = vpop.f32.mrf.mxu1  ;;  %v7114_v10 = vpop.f32.mrf.mxu0 }
 0x4b9   :  { %v6200_v6 = vrot.slane %v6193_v11, %v7729_v54  ;;  %v6208_v2 = vrot.slane %v6754_v4, %v7729_v54  ;;  %v6216_v52 = vrot.slane %v6209_v39, %v7729_v54  ;;  %v6224_v28 = vrot.slane %v6755_v55, %v7729_v54 }
 0x4ba   :  { %v5004_v60 = vpop.f32.mrf.mxu0 }
 0x4bb   :  { %v6225_v45 = vcombine.low %v6200_v6, %v6208_v2  ;;  %v6241_v41 = vcombine.low %v6216_v52, %v6224_v28  ;;  %v6226_v14 = vcombine.high %v6200_v6, %v6208_v2  ;;  %v6242_v25 = vcombine.high %v6216_v52, %v6224_v28 }
 0x4bc   :  { %v7115_v27 = vpop.f32.mrf.mxu0 }
 0x4bd   :  { %v9210_v40 = vrot.slane %v6225_v45, %v7734_v61  ;;  %v9213_v42 = vrot.slane %v6241_v41, %v7734_v61  ;;  %v9216_v51 = vrot.slane %v6226_v14, %v7734_v61  ;;  %v9219_v33 = vrot.slane %v6242_v25, %v7734_v61 }
 0x4be   :  { %v5093_v56 = vpop.f32.mrf.mxu0 }
 0x4bf   :  { %v6258_v63 = vcombine.high %v9210_v40, %v9213_v42  ;;  %v6257_v29 = vcombine.low %v9210_v40, %v9213_v42  ;;  %v6260_v31 = vcombine.high %v9216_v51, %v9219_v33  ;;  %v6259_v38 = vcombine.low %v9216_v51, %v9219_v33 }
 0x4c0   :  { %v7126_v19 = vpop.f32.mrf.mxu0  ;;  %v5717_v16 = vcombine.low %v5001_v7, %v5093_v56  ;;  %v5718_v47 = vcombine.high %v5001_v7, %v5093_v56 }
 0x4c2   :  { %v5096_v20 = vpop.f32.mrf.mxu0  ;;  %v5725_v46 = vrot.slane %v5717_v16, %v7729_v54  ;;  %v5732_v43 = vrot.slane %v5718_v47, %v7729_v54 }
 0x4c4   :  { %v7127_v62 = vpop.f32.mrf.mxu0 }
 0x4dc   :  { %v5139_v15 = vpop.f32.mrf.mxu1 }
 0x4dd   :  { %v5733_v26 = vcombine.low %v5047_v22, %v5139_v15  ;;  %v5734_v34 = vcombine.high %v5047_v22, %v5139_v15 }
 0x4de   :  { %v7132_v35 = vpop.f32.mrf.mxu1 }
 0x4df   :  { %v5741_v50 = vrot.slane %v5733_v26, %v7729_v54  ;;  %v5748_v36 = vrot.slane %v5734_v34, %v7729_v54 }
 0x4e0   :  { %v5142_v44 = vpop.f32.mrf.mxu1 }
 0x4e1   :  { %v5781_v58 = vcombine.low %v5725_v46, %v5741_v50  ;;  %v5782_v37 = vcombine.high %v5725_v46, %v5741_v50  ;;  %v5797_v32 = vcombine.low %v5732_v43, %v5748_v36  ;;  %v5798_v13 = vcombine.high %v5732_v43, %v5748_v36 }
 0x4e2   :  { %v5185_v11 = vpop.f32.mrf.mxu0  ;;  %v7133_v4 = vpop.f32.mrf.mxu1 }
 0x4e3   :  { %v5789_v7 = vrot.slane %v5781_v58, %v7734_v61  ;;  %v5796_v22 = vrot.slane %v5782_v37, %v7734_v61  ;;  %v5805_v39 = vrot.slane %v5797_v32, %v7734_v61  ;;  %v5812_v55 = vrot.slane %v5798_v13, %v7734_v61 }
 0x4e4   :  { %v7138_v23 = vpop.f32.mrf.mxu0 }
 0x4e5   :  { %v6746_v10 = vcombine.low %v5789_v7, %v5796_v22  ;;  %v6748_v6 = vcombine.high %v5789_v7, %v5796_v22  ;;  %v6750_v2 = vcombine.low %v5805_v39, %v5812_v55  ;;  %v6752_v52 = vcombine.high %v5805_v39, %v5812_v55 }
 0x4e6   :  { %v5188_v28 = vpop.f32.mrf.mxu0 }
 0x4e7   :  { %v6065_v60 = vrot.slane %v6746_v10, %v7729_v54  ;;  %v6081_v45 = vrot.slane %v6748_v6, %v7729_v54  ;;  %v6097_v41 = vrot.slane %v6750_v2, %v7729_v54  ;;  %v6113_v14 = vrot.slane %v6752_v52, %v7729_v54 }
 0x4e8   :  { %v7139_v25 = vpop.f32.mrf.mxu0 }
 0x4e9   :  { %v6122_v19 = vcombine.high %v6065_v60, %v6081_v45  ;;  %v6154_v20 = vcombine.high %v6097_v41, %v6113_v14  ;;  %v6121_v62 = vcombine.low %v6065_v60, %v6081_v45  ;;  %v6153_v16 = vcombine.low %v6097_v41, %v6113_v14 }
 0x4ea   :  { %v5231_v27 = vpop.f32.mrf.mxu1  ;;  %v5277_v56 = vpop.f32.mrf.mxu0 }
 0x4eb   :  { %v6136_v26 = vrot.slane %v6122_v19, %v7734_v61  ;;  %v6168_v34 = vrot.slane %v6154_v20, %v7734_v61  ;;  %v9244_v35 = vrot.slane %v6121_v62, %v7734_v61  ;;  %v9247_v46 = vrot.slane %v6153_v16, %v7734_v61 }
 0x4ec   :  { %v7144_v47 = vpop.f32.mrf.mxu1  ;;  %v7150_v15 = vpop.f32.mrf.mxu0  ;;  %v5749_v22 = vcombine.low %v5185_v11, %v5277_v56  ;;  %v5750_v39 = vcombine.high %v5185_v11, %v5277_v56 }
 0x4ed   :  { %v6187_v36 = vcombine.low %v6136_v26, %v6168_v34  ;;  %v6186_v44 = vcombine.high %v9244_v35, %v9247_v46  ;;  %v6185_v58 = vcombine.low %v9244_v35, %v9247_v46  ;;  %v6188_v7 = vcombine.high %v6136_v26, %v6168_v34 }
 0x4ee   :  { %v5234_v43 = vpop.f32.mrf.mxu1  ;;  %v5280_v50 = vpop.f32.mrf.mxu0  ;;  %v5764_v52 = vrot.slane %v5750_v39, %v7729_v54 }
 0x4ef   :  { %v7231_v13 = vpack.i.bf16 %v6187_v36, %v6051_v30  ;;  %v7226_v4 = vpack.i.bf16 %v6186_v44, %v6050_v24  ;;  %v7236_v2 = vpack.i.bf16 %v6188_v7, %v6052_v57  ;;  %v5757_v30 = vrot.slane %v5749_v22, %v7729_v54  ;;  %v7305_v44 = vld [vmem:[#allocation7 + $0x28] sm:$0xff]   ;;  %v7306_v7 = vld [vmem:[#allocation7 + $0x20] sm:$0xff]  }
 0x4f0   :  { %v7145_v37 = vpop.f32.mrf.mxu1  ;;  %v7151_v32 = vpop.f32.mrf.mxu0  ;;  %7183 = vmatpush3.bf16.msra.mxu0 %v7305_v44 }
 0x4f1   :  { %7232 = vrot.lane.b32.xlu1 %v7231_v13, %s7523_s22  ;;  %7227 = vrot.lane.b32.xlu0 %v7226_v4, %s7504_s29 }
 0x4f2   :  { %v5323_v55 = vpop.f32.mrf.mxu1  ;;  %7184 = vmatprep.subr.bf16.mxu0 %v7509_v1 }
 0x4f3   :  { %v5765_v23 = vcombine.low %v5231_v27, %v5323_v55  ;;  %v5766_v10 = vcombine.high %v5231_v27, %v5323_v55 }
 0x4f4   :  { %v7156_v6 = vpop.f32.mrf.mxu1  ;;  %7185 = vmatpush3.bf16.msra.mxu0 %v7306_v7  ;;  %v7309_v7 = vld [vmem:[#allocation7 + $0x8] sm:$0xff]  }
 0x4f5   :  { %v5773_v24 = vrot.slane %v5765_v23, %v7729_v54  ;;  %v5780_v11 = vrot.slane %v5766_v10, %v7729_v54  ;;  %7237 = vrot.lane.b32.xlu0 %v7236_v2, %s7524_s23  ;;  %v7307_v2 = vld [vmem:[#allocation7 + $0x18] sm:$0xff]   ;;  %7186 = vmatprep.subr.bf16.mxu0 %v7509_v1 }
 0x4f6   :  { %v5326_v28 = vpop.f32.mrf.mxu1 }
 0x4f7   :  { %v5813_v60 = vcombine.low %v5757_v30, %v5773_v24  ;;  %v5814_v45 = vcombine.high %v5757_v30, %v5773_v24  ;;  %v5829_v41 = vcombine.low %v5764_v52, %v5780_v11  ;;  %v5830_v14 = vcombine.high %v5764_v52, %v5780_v11 }
 0x4f8   :  { %v7157_v25 = vpop.f32.mrf.mxu1  ;;  %7187 = vmatpush3.bf16.msra.mxu0 %v7307_v2 }
 0x4f9   :  { %v5821_v27 = vrot.slane %v5813_v60, %v7734_v61  ;;  %v5828_v5 = vrot.slane %v5814_v45, %v7734_v61  ;;  %v5837_v49 = vrot.slane %v5829_v41, %v7734_v61  ;;  %v5844_v57 = vrot.slane %v5830_v14, %v7734_v61  ;;  %7188 = vmatprep.subr.bf16.mxu0 %v7509_v1 }
 0x4fb   :  { %v6747_v56 = vcombine.low %v5821_v27, %v5828_v5  ;;  %v6749_v19 = vcombine.high %v5821_v27, %v5828_v5  ;;  %v6751_v20 = vcombine.low %v5837_v49, %v5844_v57  ;;  %v6753_v62 = vcombine.high %v5837_v49, %v5844_v57 }
 0x4fc   :  { %7189 = vmatpush3.bf16.msra.mxu0 %v7308_v48 }
 0x4fd   :  { %v6072_v16 = vrot.slane %v6747_v56, %v7729_v54  ;;  %v6088_v47 = vrot.slane %v6749_v19, %v7729_v54  ;;  %v6104_v15 = vrot.slane %v6751_v20, %v7729_v54  ;;  %v6120_v26 = vrot.slane %v6753_v62, %v7729_v54  ;;  %7190 = vmatprep.subr.bf16.mxu0 %v7509_v1 }
 0x4ff   :  { %v6137_v34 = vcombine.low %v6072_v16, %v6088_v47  ;;  %v6169_v43 = vcombine.low %v6104_v15, %v6120_v26  ;;  %v6138_v50 = vcombine.high %v6072_v16, %v6088_v47  ;;  %v6170_v36 = vcombine.high %v6104_v15, %v6120_v26 }
 0x500   :  { %7191 = vmatpush3.bf16.msra.mxu0 %v7309_v7 }
 0x501   :  { %v6145_v37 = vrot.slane %v6137_v34, %v7734_v61  ;;  %v6177_v32 = vrot.slane %v6169_v43, %v7734_v61  ;;  %v6152_v13 = vrot.slane %v6138_v50, %v7734_v61  ;;  %v6184_v4 = vrot.slane %v6170_v36, %v7734_v61  ;;  %7192 = vmatprep.subr.bf16.mxu0 %v7509_v1 }
 0x503   :  { %v6190_v22 = vcombine.high %v6145_v37, %v6177_v32  ;;  %v6189_v39 = vcombine.low %v6145_v37, %v6177_v32  ;;  %v6192_v10 = vcombine.high %v6152_v13, %v6184_v4  ;;  %v6191_v6 = vcombine.low %v6152_v13, %v6184_v4 }
 0x505   :  { %v7246_v55 = vpack.i.bf16 %v6190_v22, %v6054_v8  ;;  %v7241_v23 = vpack.i.bf16 %v6189_v39, %v6053_v59  ;;  %v7256_v30 = vpack.i.bf16 %v6192_v10, %v6056_v3  ;;  %v7251_v8 = vpack.i.bf16 %v6191_v6, %v6055_v17 }
 0x507   :  { %7247 = vrot.lane.b32.xlu0 %v7246_v55, %s7520_s21  ;;  %7242 = vrot.lane.b32.xlu1 %v7241_v23, %s7525_s24 }
 0x50b   :  { %7257 = vrot.lane.b32.xlu0 %v7256_v30, %s7518_s19  ;;  %7252 = vrot.lane.b32.xlu1 %v7251_v8, %s7519_s20 }
 0x529   :  { %v5369_v53 = vpop.f32.mrf.mxu0  ;;  %v5415_v59 = vpop.f32.mrf.mxu1 }
 0x52b   :  { %v7162_v52 = vpop.f32.mrf.mxu0  ;;  %v7168_v24 = vpop.f32.mrf.mxu1 }
 0x52c   :  { %v7310_v52 = vld [vmem:[#allocation7] sm:$0xff]  }
 0x52d   :  { %v5372_v3 = vpop.f32.mrf.mxu0  ;;  %v5418_v11 = vpop.f32.mrf.mxu1  ;;  %7193 = vmatpush3.bf16.msra.mxu0 %v7310_v52 }
 0x52f   :  { %v7163_v28 = vpop.f32.mrf.mxu0  ;;  %v7169_v12 = vpop.f32.mrf.mxu1 }
 0x531   :  { %v5507_v21 = vpop.f32.mrf.mxu1 }
 0x532   :  { %v5869_v41 = vcombine.low %v5415_v59, %v5507_v21  ;;  %v5870_v14 = vcombine.high %v5415_v59, %v5507_v21 }
 0x533   :  { %v7180_v17 = vpop.f32.mrf.mxu1 }
 0x534   :  { %v5877_v57 = vrot.slane %v5869_v41, %v7729_v54  ;;  %v5884_v56 = vrot.slane %v5870_v14, %v7729_v54 }
 0x535   :  { %v5510_v60 = vpop.f32.mrf.mxu1 }
 0x537   :  { %v7181_v45 = vpop.f32.mrf.mxu1 }
 0x554   :  { %v5461_v25 = vpop.f32.mrf.mxu0 }
 0x555   :  { %v5853_v27 = vcombine.low %v5369_v53, %v5461_v25  ;;  %v5854_v5 = vcombine.high %v5369_v53, %v5461_v25 }
 0x556   :  { %v7174_v49 = vpop.f32.mrf.mxu0 }
 0x557   :  { %v5861_v19 = vrot.slane %v5853_v27, %v7729_v54  ;;  %v5868_v20 = vrot.slane %v5854_v5, %v7729_v54 }
 0x558   :  { %v5464_v62 = vpop.f32.mrf.mxu0 }
 0x559   :  { %v5885_v16 = vcombine.low %v5861_v19, %v5877_v57  ;;  %v5886_v47 = vcombine.high %v5861_v19, %v5877_v57  ;;  %v5901_v15 = vcombine.low %v5868_v20, %v5884_v56  ;;  %v5902_v26 = vcombine.high %v5868_v20, %v5884_v56 }
 0x55a   :  { %v7175_v34 = vpop.f32.mrf.mxu0 }
 0x55b   :  { %v5893_v43 = vrot.slane %v5885_v16, %v7734_v61  ;;  %v5900_v50 = vrot.slane %v5886_v47, %v7734_v61  ;;  %v5909_v36 = vrot.slane %v5901_v15, %v7734_v61  ;;  %v5916_v44 = vrot.slane %v5902_v26, %v7734_v61 }
 0x55d   :  { %v6261_v37 = vcombine.low %v5893_v43, %v5900_v50  ;;  %v6756_v32 = vcombine.high %v5893_v43, %v5900_v50  ;;  %v6277_v13 = vcombine.low %v5909_v36, %v5916_v44  ;;  %v6757_v4 = vcombine.high %v5909_v36, %v5916_v44 }
 0x55f   :  { %v6268_v22 = vrot.slane %v6261_v37, %v7729_v54  ;;  %v6276_v39 = vrot.slane %v6756_v32, %v7729_v54  ;;  %v6284_v55 = vrot.slane %v6277_v13, %v7729_v54  ;;  %v6292_v23 = vrot.slane %v6757_v4, %v7729_v54 }
 0x561   :  { %v6293_v10 = vcombine.low %v6268_v22, %v6276_v39  ;;  %v6309_v6 = vcombine.low %v6284_v55, %v6292_v23  ;;  %v6294_v2 = vcombine.high %v6268_v22, %v6276_v39  ;;  %v6310_v30 = vcombine.high %v6284_v55, %v6292_v23 }
 0x563   :  { %v6301_v8 = vrot.slane %v6293_v10, %v7734_v61  ;;  %v6317_v48 = vrot.slane %v6309_v6, %v7734_v61  ;;  %v6308_v53 = vrot.slane %v6294_v2, %v7734_v61  ;;  %v6324_v59 = vrot.slane %v6310_v30, %v7734_v61  ;;  %v7228_v40 = vpop.permute.xlu0 %7227  ;;  %v7233_v42 = vpop.permute.xlu1 %7232 }
 0x564   :  { %v7229_v21 = vunpack.i.l.bf16 %v7228_v40  ;;  %v7235_v60 = vunpack.i.h.bf16 %v7233_v42  ;;  %v7234_v45 = vunpack.i.l.bf16 %v7233_v42 }
 0x565   :  { %v6326_v24 = vcombine.high %v6301_v8, %v6317_v48  ;;  %v6325_v3 = vcombine.low %v6301_v8, %v6317_v48  ;;  %v6328_v11 = vcombine.high %v6308_v53, %v6324_v59  ;;  %v6327_v28 = vcombine.low %v6308_v53, %v6324_v59 }
 0x566   :  { %v6417_v51 = vsel %vm3015_vm2, %v6049_v9, %v7229_v21 }
 0x567   :  { %v7266_v54 = vpack.i.bf16 %v6326_v24, %v6258_v63  ;;  %v7261_v1 = vpack.i.bf16 %v6325_v3, %v6257_v29  ;;  %v7276_v61 = vpack.i.bf16 %v6328_v11, %v6260_v31  ;;  %v7271_v12 = vpack.i.bf16 %v6327_v28, %v6259_v38  ;;  %v7238_v63 = vpop.permute.xlu0 %7237  ;;  %v6758_v24 = vld [vmem:[%s9365_s4] ss:$0 sm:$0xff] }
 0x568   :  { %v7230_v29 = vunpack.i.h.bf16 %v7228_v40  ;;  %v7240_v31 = vunpack.i.h.bf16 %v7238_v63  ;;  %v7239_v38 = vunpack.i.l.bf16 %v7238_v63  ;;  %v6420_v49 = vsel %vm6419_vm4, %v6417_v51, %v7234_v45  ;;  %v7411_v11 = vld [vmem:[#allocation2] sm:$0xff]  ;;  %v7412_v63 = vld [vmem:[#allocation2 + $0x8] sm:$0xff] }
 0x569   :  { %7267 = vrot.lane.b32.xlu0 %v7266_v54, %s7517_s18  ;;  %7262 = vrot.lane.b32.xlu1 %v7261_v1, %s7506_s9  ;;  %s7473_s9 = scalar_lea.vmem %s6598_s8, 256 }
 0x56a   :  { %v6418_v33 = vsel %vm3015_vm2, %v6185_v58, %v7230_v29  ;;  %v6423_v57 = vsel %vm6422_vm5, %v6420_v49, %v7239_v38  ;;  %p7474_p1 = scmp.ne.s32.totalorder %s6598_s8, %s7473_s9  ;;  %p7479_p3 = scmp.lt.s32.totalorder %s7473_s9, %s7473_s9 }
 0x56b   :  { %v6421_v5 = vsel %vm6419_vm4, %v6418_v33, %v7235_v60 }
 0x56c   :  { %v6424_v56 = vsel %vm6422_vm5, %v6421_v5, %v7240_v31  ;;  %p7480_p4 = por %p7479_p3, %p7478_p2 }
 0x56d   :  { %7277 = vrot.lane.b32.xlu0 %v7276_v61, %s7515_s16  ;;  %7272 = vrot.lane.b32.xlu1 %v7271_v12, %s7516_s17 }
 0x56e   :  { %p7481_p5 = pnand %p7480_p4, %p7474_p1 }
 0x579   :  { %v7243_v17 = vpop.permute.xlu1 %7242  ;;  %v7248_v41 = vpop.permute.xlu0 %7247 }
 0x57a   :  { %v7245_v14 = vunpack.i.h.bf16 %v7243_v17  ;;  %v7244_v25 = vunpack.i.l.bf16 %v7243_v17  ;;  %v7250_v18 = vunpack.i.h.bf16 %v7248_v41  ;;  %v7249_v0 = vunpack.i.l.bf16 %v7248_v41 }
 0x57c   :  { %v6426_v9 = vsel %vm6425_vm6, %v6423_v57, %v7244_v25  ;;  %v6427_v19 = vsel %vm6425_vm6, %v6424_v56, %v7245_v14 }
 0x57d   :  { %v7253_v27 = vpop.permute.xlu1 %7252  ;;  %v7258_v20 = vpop.permute.xlu0 %7257  ;;  %v6429_v16 = vsel %vm6428_vm7, %v6426_v9, %v7249_v0  ;;  %v6430_v47 = vsel %vm6428_vm7, %v6427_v19, %v7250_v18  ;;  %v6766_v9 = vld [vmem:[%s9365_s4 + $0x1] ss:$0 sm:$0xff] }
 0x57e   :  { %v7255_v35 = vunpack.i.h.bf16 %v7253_v27  ;;  %v7254_v46 = vunpack.i.l.bf16 %v7253_v27  ;;  %v7260_v58 = vunpack.i.h.bf16 %v7258_v20  ;;  %v7259_v62 = vunpack.i.l.bf16 %v7258_v20  ;;  %v6767_v20 = vld [vmem:[%s9365_s4 + $0x2] ss:$0 sm:$0xff] }
 0x580   :  { %v6432_v15 = vsel %vm6431_vm8, %v6429_v16, %v7254_v46  ;;  %v6433_v26 = vsel %vm6431_vm8, %v6430_v47, %v7255_v35 }
 0x581   :  { %v6435_v32 = vsel %vm6434_vm9, %v6432_v15, %v7259_v62  ;;  %v6436_v13 = vsel %vm6434_vm9, %v6433_v26, %v7260_v58 }
 0x5db   :  { %v7268_v34 = vpop.permute.xlu0 %7267  ;;  %v7263_v43 = vpop.permute.xlu1 %7262 }
 0x5dc   :  { %v7265_v50 = vunpack.i.h.bf16 %v7263_v43  ;;  %v7264_v36 = vunpack.i.l.bf16 %v7263_v43  ;;  %v7270_v44 = vunpack.i.h.bf16 %v7268_v34  ;;  %v7269_v37 = vunpack.i.l.bf16 %v7268_v34 }
 0x5de   :  { %v6438_v4 = vsel %vm6437_vm10, %v6435_v32, %v7264_v36  ;;  %v6439_v7 = vsel %vm6437_vm10, %v6436_v13, %v7265_v50 }
 0x5df   :  { %v7278_v22 = vpop.permute.xlu0 %7277  ;;  %v7273_v39 = vpop.permute.xlu1 %7272  ;;  %v6441_v2 = vsel %vm6440_vm11, %v6438_v4, %v7269_v37  ;;  %v6442_v30 = vsel %vm6440_vm11, %v6439_v7, %v7270_v44 }
 0x5e0   :  { %v7280_v55 = vunpack.i.h.bf16 %v7278_v22  ;;  %v7279_v23 = vunpack.i.l.bf16 %v7278_v22  ;;  %v7275_v10 = vunpack.i.h.bf16 %v7273_v39  ;;  %v7274_v6 = vunpack.i.l.bf16 %v7273_v39 }
 0x5e2   :  { %v6444_v8 = vsel %vm6443_vm12, %v6441_v2, %v7274_v6  ;;  %v6445_v48 = vsel %vm6443_vm12, %v6442_v30, %v7275_v10 }
 0x5e3   :  { %v6447_v53 = vsel %vm6446_vm13, %v6444_v8, %v7279_v23  ;;  %v6448_v59 = vsel %vm6446_vm13, %v6445_v48, %v7280_v55 }
 0x5e4   :  { %v6449_v52 = vpack.c.bf16 %v6448_v59, %v6447_v53 }
 0x5e6   :  { %7195 = vmatmul.mubr.msk.bf16.vlgmr.msra.gmra.mxu0 %vm203_vm1, %v6449_v52 }
 0x6a6   :  { %v6540_v3 = vpop.f32.mrf.mxu0 }
 0x6a7   :  { %v6541_v54 = vadd.f32 %v6758_v24, %v6540_v3 }
 0x6a8   :  { %v7196_v1 = vpop.f32.mrf.mxu0 }
 0x6a9   :  { %v6547_v28 = vadd.f32 %v7411_v11, %v6541_v54 }
 0x6aa   :  { %v6543_v61 = vpop.f32.mrf.mxu0 }
 0x6ab   :  { %v6544_v12 = vadd.f32 %v6758_v24, %v6543_v61  ;;  %v6549_v40 = vsel %vm203_vm1, %v6547_v28, 0.0 }
 0x6ac   :  { %6550 = vadd.xlane.f32.xlu1 %v6549_v40  ;;  %v7197_v42 = vpop.f32.mrf.mxu0 }
 0x6ad   :  { %v6548_v29 = vadd.f32 %v7412_v63, %v6544_v12 }
 0x6af   :  { %v6552_v21 = vsel %vm203_vm1, %v6548_v29, 0.0 }
 0x6b0   :  { %6553 = vadd.xlane.f32.xlu0 %v6552_v21 }
 0x735   :  { %v6551_v17 = vpop.xlane.xlu1 %6550 }
 0x736   :  { %v6556_v60 = vmul.f32 0.010416667, %v6551_v17 }
 0x738   :  { %v6558_v45 = vsub.f32 %v6547_v28, %v6556_v60 }
 0x739   :  { %v6554_v41 = vpop.xlane.xlu0 %6553 }
 0x73a   :  { %v6557_v51 = vmul.f32 0.010416667, %v6554_v41  ;;  %v6560_v33 = vmul.f32 %v6558_v45, %v6558_v45 }
 0x73c   :  { %v6559_v31 = vsub.f32 %v6548_v29, %v6557_v51  ;;  %v6562_v38 = vsel %vm203_vm1, %v6560_v33, 0.0 }
 0x73d   :  { %6563 = vadd.xlane.f32.xlu0 %v6562_v38 }
 0x73e   :  { %v6561_v14 = vmul.f32 %v6559_v31, %v6559_v31 }
 0x740   :  { %v6565_v25 = vsel %vm203_vm1, %v6561_v14, 0.0 }
 0x741   :  { %6566 = vadd.xlane.f32.xlu1 %v6565_v25 }
 0x7c6   :  { %v6564_v27 = vpop.xlane.xlu0 %6563 }
 0x7c7   :  { %v6568_v5 = vmul.f32 0.010416667, %v6564_v27 }
 0x7c9   :  { %v6570_v49 = vadd.f32 1e-05, %v6568_v5 }
 0x7ca   :  { %v6567_v57 = vpop.xlane.xlu1 %6566 }
 0x7cb   :  { %7407 = vrsqrt.f32 %v6570_v49  ;;  %v6569_v56 = vmul.f32 0.010416667, %v6567_v57 }
 0x7cd   :  { %v6571_v18 = vadd.f32 1e-05, %v6569_v56 }
 0x7cf   :  { %7409 = vrsqrt.f32 %v6571_v18 }
 0x7d8   :  { %v7408_v0 = vpop.eup %7407 }
 0x7d9   :  { %v6574_v19 = vmul.f32 %v7408_v0, %v6558_v45 }
 0x7db   :  { %v6581_v35 = vmul.f32 %v6766_v9, %v6574_v19 }
 0x7dc   :  { %v7410_v46 = vpop.eup %7409 }
 0x7dd   :  { %v6575_v58 = vmul.f32 %v7410_v46, %v6559_v31  ;;  %v6588_v62 = vadd.f32 %v6767_v20, %v6581_v35 }
 0x7df   :  { %v6582_v16 = vmul.f32 %v6766_v9, %v6575_v58  ;;  %6590 = vst.msk [vmem:[#allocation8] sm:$0xff] %vm203_vm1, %v6588_v62 }
 0x7e1   :  { %v6589_v47 = vadd.f32 %v6767_v20, %v6582_v16 }
 0x7e3   :  { %6591 = vst.msk [vmem:[#allocation8 + $0x8] sm:$0xff] %vm203_vm1, %v6589_v47 }
 0x7e4   :  { %7484 = shalt.err (!%p7481_p5)
}
 0x7e5   :  { %6603 = dma.vmem_to_hbm [thread:$0]  %s6598_s8, 256, %s9366_s5, [#allocation4], %s7503_s28, %s7503_s28, %s7504_s29  }
 0x7e6   :  { %7497 = dma.done.wait [#allocation4], 256  }
 0x7e7   :  { %7498 = vsyncadd [#allocation4], 4294967040 }
 0x7e8   :  { %6607 = vsyncpa [#allocation3], 1 }
 0x7e9   :  { %6608 = vsyncpa [#allocation6], 1 }
 0x7ea   :  { %6609 = vsyncpa [#allocation4], 1 }

</bundles_post_ra>
